<compile_context>
chip_gen: v7x
topology: tpu7x:2x2x1
jax: 0.10.0
libtpu: 0.0.40
codegen_flags: <defaults>
</compile_context>

<pallas_src>
import jax
import jax.numpy as jnp
from jax.experimental import pallas as pl
from jax.experimental.pallas import tpu as pltpu


# -----------------------------------------------------------------------------
# Pallas kernel: stacked LSTM + final Linear + sigmoid
# -----------------------------------------------------------------------------
def hids_lstm_kernel(x_ref,        # (T*Bp, E)    f32  embedded inputs, time-major, flattened
                     wih0_ref,     # (E, 4H)      f32  layer-0 input weights (transposed, i/f/o *0.5)
                     wihr_ref,     # (L-1, H, 4H) f32  layers 1..L-1 input weights (transposed, scaled)
                     whh_ref,      # (L, H, 4H)   f32  recurrent weights (transposed, scaled)
                     b_ref,        # (L, 4H)      f32  combined bias b_ih + b_hh (scaled)
                     wlin_ref,     # (H, O)       f32  final linear weight (transposed)
                     blin_ref,     # (1, O)       f32  final linear bias
                     out_ref,      # (Bp, O)      f32  sigmoid(linear(h_last))
                     gates_ref,    # (T*Bp, 4H)   f32  VMEM scratch: hoisted projections
                     hseq_ref):    # (T*Bp, H)    f32  VMEM scratch: per-layer output sequence
    TB = gates_ref.shape[0]
    L, H, _H4 = whh_ref.shape
    B = out_ref.shape[0]
    T = TB // B

    h = jnp.zeros((B, H), jnp.float32)

    for l in range(L):                              # static layer loop (unrolled)
        whh_l = whh_ref[l].astype(jnp.bfloat16)     # (H, 4H) resident for the whole layer
        bias = b_ref[l:l + 1, :]                    # (1, 4H)

        if l == 0:
            layer_in = x_ref[...]                   # (T*B, E)
            wih = wih0_ref[...]
        else:
            layer_in = hseq_ref[...]                # (T*B, H) from previous layer
            wih = wihr_ref[l - 1]

        # Hoisted input projection for ALL timesteps (+ folded bias): one bf16 MXU
        # matmul per layer, off the serial chain; parked in VMEM scratch so it is
        # not 8 live vregs across the unrolled loop.
        gates_ref[...] = (
            jnp.dot(layer_in.astype(jnp.bfloat16), wih.astype(jnp.bfloat16),
                    preferred_element_type=jnp.float32) + bias)

        h = jnp.zeros((B, H), jnp.float32)
        c = jnp.zeros((B, H), jnp.float32)

        for t in range(T):                          # fully unrolled time loop
            # Only the (single-pass bf16) recurrent matmul remains on the recurrence.
            g = (gates_ref[t * B:(t + 1) * B, :]
                 + jnp.dot(h.astype(jnp.bfloat16), whh_l,
                           preferred_element_type=jnp.float32))       # (B, 4H) f32

            # Single EUP pass over the full 128-lane gate vreg.
            # i/f/o columns were pre-scaled by 0.5, so sigmoid(x) = 0.5*tanh(x/2)+0.5.
            tg = jnp.tanh(g)
            sg = 0.5 * tg + 0.5
            i_g = sg[:, 0 * H:1 * H]
            f_g = sg[:, 1 * H:2 * H]
            g_g = tg[:, 2 * H:3 * H]
            o_g = sg[:, 3 * H:4 * H]

            c = f_g * c + i_g * g_g
            h = o_g * jnp.tanh(c)

            if l < L - 1:
                hseq_ref[t * B:(t + 1) * B, :] = h  # one vst per step, next layer's input

    # Linear on the last timestep of the last layer + sigmoid (f32, off the chain).
    logits = (jnp.dot(h, wlin_ref[...], preferred_element_type=jnp.float32)
              + blin_ref[...])
    out_ref[...] = jax.nn.sigmoid(logits)


# -----------------------------------------------------------------------------
# Wrapper
# -----------------------------------------------------------------------------
def _hids_forward(tokens, params):
    emb = params["embedding"][tokens]                       # (B, T, E)  gather in plain JAX
    B, T, E = emb.shape
    H = params["w_hh"].shape[1]
    O = params["w_lin"].shape[1]

    # Fold sigmoid -> tanh identity into the parameters: scale i/f/o gate columns
    # of W_ih, W_hh and the combined bias by 0.5 (exact in f32/bf16).
    gate_scale = jnp.concatenate([
        jnp.full((H,), 0.5, jnp.float32),   # i
        jnp.full((H,), 0.5, jnp.float32),   # f
        jnp.ones((H,), jnp.float32),        # g (cell candidate, uses tanh directly)
        jnp.full((H,), 0.5, jnp.float32),   # o
    ])
    w_ih0 = params["w_ih0"] * gate_scale
    w_ihr = params["w_ih_rest"] * gate_scale
    w_hh = params["w_hh"] * gate_scale
    b = params["b"] * gate_scale

    # Pad batch to the f32 sublane minimum (8) so every vreg / MXU row is used.
    Bp = max(8, ((B + 7) // 8) * 8)
    x = jnp.transpose(emb, (1, 0, 2)).astype(jnp.float32)   # time-major (T, B, E)
    if Bp != B:
        x = jnp.pad(x, ((0, 0), (0, Bp - B), (0, 0)))
    x_flat = x.reshape(T * Bp, E)                            # (T*Bp, E)

    vmem = pl.BlockSpec(memory_space=pltpu.MemorySpace.VMEM)
    out = pl.pallas_call(
        hids_lstm_kernel,
        out_shape=jax.ShapeDtypeStruct((Bp, O), jnp.float32),
        in_specs=[vmem] * 7,
        out_specs=vmem,
        scratch_shapes=[pltpu.VMEM((T * Bp, 4 * H), jnp.float32),
                        pltpu.VMEM((T * Bp, H), jnp.float32)],
    )(x_flat, w_ih0, w_ihr, w_hh, b, params["w_lin"], params["b_lin"])
    return out[:B]


hids_forward = jax.jit(_hids_forward)


# -----------------------------------------------------------------------------
# Pure-JAX reference (for correctness check only) — plain f32, PyTorch semantics
# -----------------------------------------------------------------------------
def reference_forward(tokens, params):
    x = params["embedding"][tokens].astype(jnp.float32)      # (B, T, E)
    B, T, _ = x.shape
    L, H, _ = params["w_hh"].shape
    inp = x
    for l in range(L):
        wih = params["w_ih0"] if l == 0 else params["w_ih_rest"][l - 1]
        whh = params["w_hh"][l]
        b = params["b"][l]
        h = jnp.zeros((B, H), jnp.float32)
        c = jnp.zeros((B, H), jnp.float32)
        outs = []
        for t in range(T):
            gates = inp[:, t, :] @ wih + h @ whh + b
            i = jax.nn.sigmoid(gates[:, 0 * H:1 * H])
            f = jax.nn.sigmoid(gates[:, 1 * H:2 * H])
            g = jnp.tanh(gates[:, 2 * H:3 * H])
            o = jax.nn.sigmoid(gates[:, 3 * H:4 * H])
            c = f * c + i * g
            h = o * jnp.tanh(c)
            outs.append(h)
        inp = jnp.stack(outs, axis=1)
    logits = inp[:, -1, :] @ params["w_lin"] + params["b_lin"][0]
    return jax.nn.sigmoid(logits)


# -----------------------------------------------------------------------------
# Deterministic parameter init (synthetic; mirrors nn.Embedding / nn.LSTM /
# nn.Linear parameter shapes, with LSTM/Linear weights stored pre-transposed
# and the two LSTM bias vectors combined).  Gate column order: [i | f | g | o].
# -----------------------------------------------------------------------------
def init_params(key, vocab_size, embed_dim, hidden_dim, output_dim, num_layers):
    H, E, L, O = hidden_dim, embed_dim, num_layers, output_dim
    ks = jax.random.split(key, 8)
    s = 1.0 / jnp.sqrt(H)
    u = lambda k, shape: jax.random.uniform(k, shape, jnp.float32, -s, s)
    return {
        "embedding": jax.random.normal(ks[0], (vocab_size, E), jnp.float32),
        "w_ih0":     u(ks[1], (E, 4 * H)),            # layer 0 W_ih^T
        "w_ih_rest": u(ks[2], (L - 1, H, 4 * H)),     # layers 1..L-1 W_ih^T
        "w_hh":      u(ks[3], (L, H, 4 * H)),         # W_hh^T per layer
        "b":         u(ks[4], (L, 4 * H)) + u(ks[5], (L, 4 * H)),  # b_ih + b_hh
        "w_lin":     u(ks[6], (H, O)),                # Linear weight^T
        "b_lin":     u(ks[7], (1, O)),                # Linear bias
    }


if __name__ == "__main__":
    VOCAB, EMBED, HIDDEN, OUT, LAYERS = 16, 24, 32, 4, 5
    B, T = 2, 8

    key = jax.random.PRNGKey(0)
    k_param, k_tok = jax.random.split(key)
    params = init_params(k_param, VOCAB, EMBED, HIDDEN, OUT, LAYERS)
    tokens = jax.random.randint(k_tok, (B, T), 0, VOCAB, dtype=jnp.int32)

    y = jax.block_until_ready(hids_forward(tokens, params))
    y_ref = jax.block_until_ready(reference_forward(tokens, params))

    assert y.shape == (B, OUT), y.shape
    # Tolerance relaxed vs the pure-f32 reference because the kernel uses bf16 MXU
    # operands (f32 accumulation) across 5 layers x 8 timesteps.
    assert jnp.allclose(y, y_ref, rtol=2e-2, atol=2e-2), (y, y_ref)
    print("KERNEL_OK")
</pallas_src>

<mosaic_0001>
module attributes {stable_mosaic.version = 11 : i64} {
  func.func @hids_lstm_kernel(%arg0: memref<64x24xf32, #tpu.memory_space<vmem>>, %arg1: memref<24x128xf32, #tpu.memory_space<vmem>>, %arg2: memref<4x32x128xf32, #tpu.memory_space<vmem>>, %arg3: memref<5x32x128xf32, #tpu.memory_space<vmem>>, %arg4: memref<5x128xf32, #tpu.memory_space<vmem>>, %arg5: memref<32x4xf32, #tpu.memory_space<vmem>>, %arg6: memref<1x4xf32, #tpu.memory_space<vmem>>, %arg7: memref<8x4xf32, #tpu.memory_space<vmem>>, %arg8: memref<64x128xf32, #tpu.memory_space<vmem>>, %arg9: memref<64x32xf32, #tpu.memory_space<vmem>>) attributes {dimension_semantics = [], scalar_prefetch = 0 : i64, scratch_operands = 2 : i64, tpu.core_type = #tpu.core_type<tc>} {
    %c0 = arith.constant 0 : index
    %c0_0 = arith.constant 0 : index
    %c0_1 = arith.constant 0 : index
    %0 = vector.load %arg3[%c0, %c0_0, %c0_1] : memref<5x32x128xf32, #tpu.memory_space<vmem>>, vector<1x32x128xf32>
    %1 = vector.shape_cast %0 : vector<1x32x128xf32> to vector<32x128xf32>
    %2 = arith.truncf %1 : vector<32x128xf32> to vector<32x128xbf16>
    %c0_2 = arith.constant 0 : index
    %c0_3 = arith.constant 0 : index
    %3 = vector.load %arg4[%c0_2, %c0_3] : memref<5x128xf32, #tpu.memory_space<vmem>>, vector<1x128xf32>
    %c0_4 = arith.constant 0 : index
    %c0_5 = arith.constant 0 : index
    %4 = vector.load %arg0[%c0_4, %c0_5] : memref<64x24xf32, #tpu.memory_space<vmem>>, vector<64x24xf32>
    %c0_6 = arith.constant 0 : index
    %c0_7 = arith.constant 0 : index
    %5 = vector.load %arg1[%c0_6, %c0_7] : memref<24x128xf32, #tpu.memory_space<vmem>>, vector<24x128xf32>
    %6 = arith.truncf %4 : vector<64x24xf32> to vector<64x24xbf16>
    %7 = arith.truncf %5 : vector<24x128xf32> to vector<24x128xbf16>
    %cst = arith.constant dense<0.000000e+00> : vector<64x128xf32>
    %8 = tpu.matmul %6, %7, %cst {dimension_numbers = #tpu.dot_dimension_numbers<[1], [0], [0], [1], [0, 0, 1, 1], [], []>} : vector<64x24xbf16>, vector<24x128xbf16>, vector<64x128xf32> -> vector<64x128xf32>
    %9 = vector.broadcast %3 : vector<1x128xf32> to vector<64x128xf32>
    %10 = arith.addf %8, %9 : vector<64x128xf32>
    %c0_8 = arith.constant 0 : index
    %c0_9 = arith.constant 0 : index
    %11 = vector.load %arg8[%c0_8, %c0_9] : memref<64x128xf32, #tpu.memory_space<vmem>>, vector<64x128xf32>
    tpu.vector_store %arg8[%c0_8, %c0_9], %10 {strides = array<i32>} : memref<64x128xf32, #tpu.memory_space<vmem>>, vector<64x128xf32>,
    %cst_10 = arith.constant 0.000000e+00 : f32
    %12 = vector.broadcast %cst_10 : f32 to vector<8x32xf32>
    %cst_11 = arith.constant 0.000000e+00 : f32
    %13 = vector.broadcast %cst_11 : f32 to vector<8x32xf32>
    %c0_12 = arith.constant 0 : index
    %c0_13 = arith.constant 0 : index
    %14 = vector.load %arg8[%c0_12, %c0_13] : memref<64x128xf32, #tpu.memory_space<vmem>>, vector<8x128xf32>
    %15 = arith.truncf %12 : vector<8x32xf32> to vector<8x32xbf16>
    %cst_14 = arith.constant dense<0.000000e+00> : vector<8x128xf32>
    %16 = tpu.matmul %15, %2, %cst_14 {dimension_numbers = #tpu.dot_dimension_numbers<[1], [0], [0], [1], [0, 0, 1, 1], [], []>} : vector<8x32xbf16>, vector<32x128xbf16>, vector<8x128xf32> -> vector<8x128xf32>
    %17 = arith.addf %14, %16 : vector<8x128xf32>
    %18 = math.tanh %17 : vector<8x128xf32>
    %cst_15 = arith.constant 5.000000e-01 : f32
    %19 = vector.broadcast %cst_15 : f32 to vector<8x128xf32>
    %20 = arith.mulf %19, %18 : vector<8x128xf32>
    %cst_16 = arith.constant 5.000000e-01 : f32
    %21 = vector.broadcast %cst_16 : f32 to vector<8x128xf32>
    %22 = arith.addf %20, %21 : vector<8x128xf32>
    %23 = vector.extract_strided_slice %22 {offsets = [0, 0], sizes = [8, 32], strides = [1, 1]} : vector<8x128xf32> to vector<8x32xf32>
    %24 = vector.extract_strided_slice %22 {offsets = [0, 32], sizes = [8, 32], strides = [1, 1]} : vector<8x128xf32> to vector<8x32xf32>
    %25 = vector.extract_strided_slice %18 {offsets = [0, 64], sizes = [8, 32], strides = [1, 1]} : vector<8x128xf32> to vector<8x32xf32>
    %26 = vector.extract_strided_slice %22 {offsets = [0, 96], sizes = [8, 32], strides = [1, 1]} : vector<8x128xf32> to vector<8x32xf32>
    %27 = arith.mulf %24, %13 : vector<8x32xf32>
    %28 = arith.mulf %23, %25 : vector<8x32xf32>
    %29 = arith.addf %27, %28 : vector<8x32xf32>
    %30 = math.tanh %29 : vector<8x32xf32>
    %31 = arith.mulf %26, %30 : vector<8x32xf32>
    %c0_17 = arith.constant 0 : index
    %c0_18 = arith.constant 0 : index
    %32 = vector.load %arg9[%c0_17, %c0_18] : memref<64x32xf32, #tpu.memory_space<vmem>>, vector<8x32xf32>
    tpu.vector_store %arg9[%c0_17, %c0_18], %31 {strides = array<i32>} : memref<64x32xf32, #tpu.memory_space<vmem>>, vector<8x32xf32>,
    %c8 = arith.constant 8 : index
    %c0_19 = arith.constant 0 : index
    %33 = vector.load %arg8[%c8, %c0_19] : memref<64x128xf32, #tpu.memory_space<vmem>>, vector<8x128xf32>
    %34 = arith.truncf %31 : vector<8x32xf32> to vector<8x32xbf16>
    %cst_20 = arith.constant dense<0.000000e+00> : vector<8x128xf32>
    %35 = tpu.matmul %34, %2, %cst_20 {dimension_numbers = #tpu.dot_dimension_numbers<[1], [0], [0], [1], [0, 0, 1, 1], [], []>} : vector<8x32xbf16>, vector<32x128xbf16>, vector<8x128xf32> -> vector<8x128xf32>
    %36 = arith.addf %33, %35 : vector<8x128xf32>
    %37 = math.tanh %36 : vector<8x128xf32>
    %cst_21 = arith.constant 5.000000e-01 : f32
    %38 = vector.broadcast %cst_21 : f32 to vector<8x128xf32>
    %39 = arith.mulf %38, %37 : vector<8x128xf32>
    %cst_22 = arith.constant 5.000000e-01 : f32
    %40 = vector.broadcast %cst_22 : f32 to vector<8x128xf32>
    %41 = arith.addf %39, %40 : vector<8x128xf32>
    %42 = vector.extract_strided_slice %41 {offsets = [0, 0], sizes = [8, 32], strides = [1, 1]} : vector<8x128xf32> to vector<8x32xf32>
    %43 = vector.extract_strided_slice %41 {offsets = [0, 32], sizes = [8, 32], strides = [1, 1]} : vector<8x128xf32> to vector<8x32xf32>
    %44 = vector.extract_strided_slice %37 {offsets = [0, 64], sizes = [8, 32], strides = [1, 1]} : vector<8x128xf32> to vector<8x32xf32>
    %45 = vector.extract_strided_slice %41 {offsets = [0, 96], sizes = [8, 32], strides = [1, 1]} : vector<8x128xf32> to vector<8x32xf32>
    %46 = arith.mulf %43, %29 : vector<8x32xf32>
    %47 = arith.mulf %42, %44 : vector<8x32xf32>
    %48 = arith.addf %46, %47 : vector<8x32xf32>
    %49 = math.tanh %48 : vector<8x32xf32>
    %50 = arith.mulf %45, %49 : vector<8x32xf32>
    %c8_23 = arith.constant 8 : index
    %c0_24 = arith.constant 0 : index
    %51 = vector.load %arg9[%c8_23, %c0_24] : memref<64x32xf32, #tpu.memory_space<vmem>>, vector<8x32xf32>
    tpu.vector_store %arg9[%c8_23, %c0_24], %50 {strides = array<i32>} : memref<64x32xf32, #tpu.memory_space<vmem>>, vector<8x32xf32>,
    %c16 = arith.constant 16 : index
    %c0_25 = arith.constant 0 : index
    %52 = vector.load %arg8[%c16, %c0_25] : memref<64x128xf32, #tpu.memory_space<vmem>>, vector<8x128xf32>
    %53 = arith.truncf %50 : vector<8x32xf32> to vector<8x32xbf16>
    %cst_26 = arith.constant dense<0.000000e+00> : vector<8x128xf32>
    %54 = tpu.matmul %53, %2, %cst_26 {dimension_numbers = #tpu.dot_dimension_numbers<[1], [0], [0], [1], [0, 0, 1, 1], [], []>} : vector<8x32xbf16>, vector<32x128xbf16>, vector<8x128xf32> -> vector<8x128xf32>
    %55 = arith.addf %52, %54 : vector<8x128xf32>
    %56 = math.tanh %55 : vector<8x128xf32>
    %cst_27 = arith.constant 5.000000e-01 : f32
    %57 = vector.broadcast %cst_27 : f32 to vector<8x128xf32>
    %58 = arith.mulf %57, %56 : vector<8x128xf32>
    %cst_28 = arith.constant 5.000000e-01 : f32
    %59 = vector.broadcast %cst_28 : f32 to vector<8x128xf32>
    %60 = arith.addf %58, %59 : vector<8x128xf32>
    %61 = vector.extract_strided_slice %60 {offsets = [0, 0], sizes = [8, 32], strides = [1, 1]} : vector<8x128xf32> to vector<8x32xf32>
    %62 = vector.extract_strided_slice %60 {offsets = [0, 32], sizes = [8, 32], strides = [1, 1]} : vector<8x128xf32> to vector<8x32xf32>
    %63 = vector.extract_strided_slice %56 {offsets = [0, 64], sizes = [8, 32], strides = [1, 1]} : vector<8x128xf32> to vector<8x32xf32>
    %64 = vector.extract_strided_slice %60 {offsets = [0, 96], sizes = [8, 32], strides = [1, 1]} : vector<8x128xf32> to vector<8x32xf32>
    %65 = arith.mulf %62, %48 : vector<8x32xf32>
    %66 = arith.mulf %61, %63 : vector<8x32xf32>
    %67 = arith.addf %65, %66 : vector<8x32xf32>
    %68 = math.tanh %67 : vector<8x32xf32>
    %69 = arith.mulf %64, %68 : vector<8x32xf32>
    %c16_29 = arith.constant 16 : index
    %c0_30 = arith.constant 0 : index
    %70 = vector.load %arg9[%c16_29, %c0_30] : memref<64x32xf32, #tpu.memory_space<vmem>>, vector<8x32xf32>
    tpu.vector_store %arg9[%c16_29, %c0_30], %69 {strides = array<i32>} : memref<64x32xf32, #tpu.memory_space<vmem>>, vector<8x32xf32>,
    %c24 = arith.constant 24 : index
    %c0_31 = arith.constant 0 : index
    %71 = vector.load %arg8[%c24, %c0_31] : memref<64x128xf32, #tpu.memory_space<vmem>>, vector<8x128xf32>
    %72 = arith.truncf %69 : vector<8x32xf32> to vector<8x32xbf16>
    %cst_32 = arith.constant dense<0.000000e+00> : vector<8x128xf32>
    %73 = tpu.matmul %72, %2, %cst_32 {dimension_numbers = #tpu.dot_dimension_numbers<[1], [0], [0], [1], [0, 0, 1, 1], [], []>} : vector<8x32xbf16>, vector<32x128xbf16>, vector<8x128xf32> -> vector<8x128xf32>
    %74 = arith.addf %71, %73 : vector<8x128xf32>
    %75 = math.tanh %74 : vector<8x128xf32>
    %cst_33 = arith.constant 5.000000e-01 : f32
    %76 = vector.broadcast %cst_33 : f32 to vector<8x128xf32>
    %77 = arith.mulf %76, %75 : vector<8x128xf32>
    %cst_34 = arith.constant 5.000000e-01 : f32
    %78 = vector.broadcast %cst_34 : f32 to vector<8x128xf32>
    %79 = arith.addf %77, %78 : vector<8x128xf32>
    %80 = vector.extract_strided_slice %79 {offsets = [0, 0], sizes = [8, 32], strides = [1, 1]} : vector<8x128xf32> to vector<8x32xf32>
    %81 = vector.extract_strided_slice %79 {offsets = [0, 32], sizes = [8, 32], strides = [1, 1]} : vector<8x128xf32> to vector<8x32xf32>
    %82 = vector.extract_strided_slice %75 {offsets = [0, 64], sizes = [8, 32], strides = [1, 1]} : vector<8x128xf32> to vector<8x32xf32>
    %83 = vector.extract_strided_slice %79 {offsets = [0, 96], sizes = [8, 32], strides = [1, 1]} : vector<8x128xf32> to vector<8x32xf32>
    %84 = arith.mulf %81, %67 : vector<8x32xf32>
    %85 = arith.mulf %80, %82 : vector<8x32xf32>
    %86 = arith.addf %84, %85 : vector<8x32xf32>
    %87 = math.tanh %86 : vector<8x32xf32>
    %88 = arith.mulf %83, %87 : vector<8x32xf32>
    %c24_35 = arith.constant 24 : index
    %c0_36 = arith.constant 0 : index
    %89 = vector.load %arg9[%c24_35, %c0_36] : memref<64x32xf32, #tpu.memory_space<vmem>>, vector<8x32xf32>
    tpu.vector_store %arg9[%c24_35, %c0_36], %88 {strides = array<i32>} : memref<64x32xf32, #tpu.memory_space<vmem>>, vector<8x32xf32>,
    %c32 = arith.constant 32 : index
    %c0_37 = arith.constant 0 : index
    %90 = vector.load %arg8[%c32, %c0_37] : memref<64x128xf32, #tpu.memory_space<vmem>>, vector<8x128xf32>
    %91 = arith.truncf %88 : vector<8x32xf32> to vector<8x32xbf16>
    %cst_38 = arith.constant dense<0.000000e+00> : vector<8x128xf32>
    %92 = tpu.matmul %91, %2, %cst_38 {dimension_numbers = #tpu.dot_dimension_numbers<[1], [0], [0], [1], [0, 0, 1, 1], [], []>} : vector<8x32xbf16>, vector<32x128xbf16>, vector<8x128xf32> -> vector<8x128xf32>
    %93 = arith.addf %90, %92 : vector<8x128xf32>
    %94 = math.tanh %93 : vector<8x128xf32>
    %cst_39 = arith.constant 5.000000e-01 : f32
    %95 = vector.broadcast %cst_39 : f32 to vector<8x128xf32>
    %96 = arith.mulf %95, %94 : vector<8x128xf32>
    %cst_40 = arith.constant 5.000000e-01 : f32
    %97 = vector.broadcast %cst_40 : f32 to vector<8x128xf32>
    %98 = arith.addf %96, %97 : vector<8x128xf32>
    %99 = vector.extract_strided_slice %98 {offsets = [0, 0], sizes = [8, 32], strides = [1, 1]} : vector<8x128xf32> to vector<8x32xf32>
    %100 = vector.extract_strided_slice %98 {offsets = [0, 32], sizes = [8, 32], strides = [1, 1]} : vector<8x128xf32> to vector<8x32xf32>
    %101 = vector.extract_strided_slice %94 {offsets = [0, 64], sizes = [8, 32], strides = [1, 1]} : vector<8x128xf32> to vector<8x32xf32>
    %102 = vector.extract_strided_slice %98 {offsets = [0, 96], sizes = [8, 32], strides = [1, 1]} : vector<8x128xf32> to vector<8x32xf32>
    %103 = arith.mulf %100, %86 : vector<8x32xf32>
    %104 = arith.mulf %99, %101 : vector<8x32xf32>
    %105 = arith.addf %103, %104 : vector<8x32xf32>
    %106 = math.tanh %105 : vector<8x32xf32>
    %107 = arith.mulf %102, %106 : vector<8x32xf32>
    %c32_41 = arith.constant 32 : index
    %c0_42 = arith.constant 0 : index
    %108 = vector.load %arg9[%c32_41, %c0_42] : memref<64x32xf32, #tpu.memory_space<vmem>>, vector<8x32xf32>
    tpu.vector_store %arg9[%c32_41, %c0_42], %107 {strides = array<i32>} : memref<64x32xf32, #tpu.memory_space<vmem>>, vector<8x32xf32>,
    %c40 = arith.constant 40 : index
    %c0_43 = arith.constant 0 : index
    %109 = vector.load %arg8[%c40, %c0_43] : memref<64x128xf32, #tpu.memory_space<vmem>>, vector<8x128xf32>
    %110 = arith.truncf %107 : vector<8x32xf32> to vector<8x32xbf16>
    %cst_44 = arith.constant dense<0.000000e+00> : vector<8x128xf32>
    %111 = tpu.matmul %110, %2, %cst_44 {dimension_numbers = #tpu.dot_dimension_numbers<[1], [0], [0], [1], [0, 0, 1, 1], [], []>} : vector<8x32xbf16>, vector<32x128xbf16>, vector<8x128xf32> -> vector<8x128xf32>
    %112 = arith.addf %109, %111 : vector<8x128xf32>
    %113 = math.tanh %112 : vector<8x128xf32>
    %cst_45 = arith.constant 5.000000e-01 : f32
    %114 = vector.broadcast %cst_45 : f32 to vector<8x128xf32>
    %115 = arith.mulf %114, %113 : vector<8x128xf32>
    %cst_46 = arith.constant 5.000000e-01 : f32
    %116 = vector.broadcast %cst_46 : f32 to vector<8x128xf32>
    %117 = arith.addf %115, %116 : vector<8x128xf32>
    %118 = vector.extract_strided_slice %117 {offsets = [0, 0], sizes = [8, 32], strides = [1, 1]} : vector<8x128xf32> to vector<8x32xf32>
    %119 = vector.extract_strided_slice %117 {offsets = [0, 32], sizes = [8, 32], strides = [1, 1]} : vector<8x128xf32> to vector<8x32xf32>
    %120 = vector.extract_strided_slice %113 {offsets = [0, 64], sizes = [8, 32], strides = [1, 1]} : vector<8x128xf32> to vector<8x32xf32>
    %121 = vector.extract_strided_slice %117 {offsets = [0, 96], sizes = [8, 32], strides = [1, 1]} : vector<8x128xf32> to vector<8x32xf32>
    %122 = arith.mulf %119, %105 : vector<8x32xf32>
    %123 = arith.mulf %118, %120 : vector<8x32xf32>
    %124 = arith.addf %122, %123 : vector<8x32xf32>
    %125 = math.tanh %124 : vector<8x32xf32>
    %126 = arith.mulf %121, %125 : vector<8x32xf32>
    %c40_47 = arith.constant 40 : index
    %c0_48 = arith.constant 0 : index
    %127 = vector.load %arg9[%c40_47, %c0_48] : memref<64x32xf32, #tpu.memory_space<vmem>>, vector<8x32xf32>
    tpu.vector_store %arg9[%c40_47, %c0_48], %126 {strides = array<i32>} : memref<64x32xf32, #tpu.memory_space<vmem>>, vector<8x32xf32>,
    %c48 = arith.constant 48 : index
    %c0_49 = arith.constant 0 : index
    %128 = vector.load %arg8[%c48, %c0_49] : memref<64x128xf32, #tpu.memory_space<vmem>>, vector<8x128xf32>
    %129 = arith.truncf %126 : vector<8x32xf32> to vector<8x32xbf16>
    %cst_50 = arith.constant dense<0.000000e+00> : vector<8x128xf32>
    %130 = tpu.matmul %129, %2, %cst_50 {dimension_numbers = #tpu.dot_dimension_numbers<[1], [0], [0], [1], [0, 0, 1, 1], [], []>} : vector<8x32xbf16>, vector<32x128xbf16>, vector<8x128xf32> -> vector<8x128xf32>
    %131 = arith.addf %128, %130 : vector<8x128xf32>
    %132 = math.tanh %131 : vector<8x128xf32>
    %cst_51 = arith.constant 5.000000e-01 : f32
    %133 = vector.broadcast %cst_51 : f32 to vector<8x128xf32>
    %134 = arith.mulf %133, %132 : vector<8x128xf32>
    %cst_52 = arith.constant 5.000000e-01 : f32
    %135 = vector.broadcast %cst_52 : f32 to vector<8x128xf32>
    %136 = arith.addf %134, %135 : vector<8x128xf32>
    %137 = vector.extract_strided_slice %136 {offsets = [0, 0], sizes = [8, 32], strides = [1, 1]} : vector<8x128xf32> to vector<8x32xf32>
    %138 = vector.extract_strided_slice %136 {offsets = [0, 32], sizes = [8, 32], strides = [1, 1]} : vector<8x128xf32> to vector<8x32xf32>
    %139 = vector.extract_strided_slice %132 {offsets = [0, 64], sizes = [8, 32], strides = [1, 1]} : vector<8x128xf32> to vector<8x32xf32>
    %140 = vector.extract_strided_slice %136 {offsets = [0, 96], sizes = [8, 32], strides = [1, 1]} : vector<8x128xf32> to vector<8x32xf32>
    %141 = arith.mulf %138, %124 : vector<8x32xf32>
    %142 = arith.mulf %137, %139 : vector<8x32xf32>
    %143 = arith.addf %141, %142 : vector<8x32xf32>
    %144 = math.tanh %143 : vector<8x32xf32>
    %145 = arith.mulf %140, %144 : vector<8x32xf32>
    %c48_53 = arith.constant 48 : index
    %c0_54 = arith.constant 0 : index
    %146 = vector.load %arg9[%c48_53, %c0_54] : memref<64x32xf32, #tpu.memory_space<vmem>>, vector<8x32xf32>
    tpu.vector_store %arg9[%c48_53, %c0_54], %145 {strides = array<i32>} : memref<64x32xf32, #tpu.memory_space<vmem>>, vector<8x32xf32>,
    %c56 = arith.constant 56 : index
    %c0_55 = arith.constant 0 : index
    %147 = vector.load %arg8[%c56, %c0_55] : memref<64x128xf32, #tpu.memory_space<vmem>>, vector<8x128xf32>
    %148 = arith.truncf %145 : vector<8x32xf32> to vector<8x32xbf16>
    %cst_56 = arith.constant dense<0.000000e+00> : vector<8x128xf32>
    %149 = tpu.matmul %148, %2, %cst_56 {dimension_numbers = #tpu.dot_dimension_numbers<[1], [0], [0], [1], [0, 0, 1, 1], [], []>} : vector<8x32xbf16>, vector<32x128xbf16>, vector<8x128xf32> -> vector<8x128xf32>
    %150 = arith.addf %147, %149 : vector<8x128xf32>
    %151 = math.tanh %150 : vector<8x128xf32>
    %cst_57 = arith.constant 5.000000e-01 : f32
    %152 = vector.broadcast %cst_57 : f32 to vector<8x128xf32>
    %153 = arith.mulf %152, %151 : vector<8x128xf32>
    %cst_58 = arith.constant 5.000000e-01 : f32
    %154 = vector.broadcast %cst_58 : f32 to vector<8x128xf32>
    %155 = arith.addf %153, %154 : vector<8x128xf32>
    %156 = vector.extract_strided_slice %155 {offsets = [0, 0], sizes = [8, 32], strides = [1, 1]} : vector<8x128xf32> to vector<8x32xf32>
    %157 = vector.extract_strided_slice %155 {offsets = [0, 32], sizes = [8, 32], strides = [1, 1]} : vector<8x128xf32> to vector<8x32xf32>
    %158 = vector.extract_strided_slice %151 {offsets = [0, 64], sizes = [8, 32], strides = [1, 1]} : vector<8x128xf32> to vector<8x32xf32>
    %159 = vector.extract_strided_slice %155 {offsets = [0, 96], sizes = [8, 32], strides = [1, 1]} : vector<8x128xf32> to vector<8x32xf32>
    %160 = arith.mulf %157, %143 : vector<8x32xf32>
    %161 = arith.mulf %156, %158 : vector<8x32xf32>
    %162 = arith.addf %160, %161 : vector<8x32xf32>
    %163 = math.tanh %162 : vector<8x32xf32>
    %164 = arith.mulf %159, %163 : vector<8x32xf32>
    %c56_59 = arith.constant 56 : index
    %c0_60 = arith.constant 0 : index
    %165 = vector.load %arg9[%c56_59, %c0_60] : memref<64x32xf32, #tpu.memory_space<vmem>>, vector<8x32xf32>
    tpu.vector_store %arg9[%c56_59, %c0_60], %164 {strides = array<i32>} : memref<64x32xf32, #tpu.memory_space<vmem>>, vector<8x32xf32>,
    %c1 = arith.constant 1 : index
    %c0_61 = arith.constant 0 : index
    %c0_62 = arith.constant 0 : index
    %166 = vector.load %arg3[%c1, %c0_61, %c0_62] : memref<5x32x128xf32, #tpu.memory_space<vmem>>, vector<1x32x128xf32>
    %167 = vector.shape_cast %166 : vector<1x32x128xf32> to vector<32x128xf32>
    %168 = arith.truncf %167 : vector<32x128xf32> to vector<32x128xbf16>
    %c1_63 = arith.constant 1 : index
    %c0_64 = arith.constant 0 : index
    %169 = vector.load %arg4[%c1_63, %c0_64] : memref<5x128xf32, #tpu.memory_space<vmem>>, vector<1x128xf32>
    %c0_65 = arith.constant 0 : index
    %c0_66 = arith.constant 0 : index
    %170 = vector.load %arg9[%c0_65, %c0_66] : memref<64x32xf32, #tpu.memory_space<vmem>>, vector<64x32xf32>
    %c0_67 = arith.constant 0 : index
    %c0_68 = arith.constant 0 : index
    %c0_69 = arith.constant 0 : index
    %171 = vector.load %arg2[%c0_67, %c0_68, %c0_69] : memref<4x32x128xf32, #tpu.memory_space<vmem>>, vector<1x32x128xf32>
    %172 = vector.shape_cast %171 : vector<1x32x128xf32> to vector<32x128xf32>
    %173 = arith.truncf %170 : vector<64x32xf32> to vector<64x32xbf16>
    %174 = arith.truncf %172 : vector<32x128xf32> to vector<32x128xbf16>
    %cst_70 = arith.constant dense<0.000000e+00> : vector<64x128xf32>
    %175 = tpu.matmul %173, %174, %cst_70 {dimension_numbers = #tpu.dot_dimension_numbers<[1], [0], [0], [1], [0, 0, 1, 1], [], []>} : vector<64x32xbf16>, vector<32x128xbf16>, vector<64x128xf32> -> vector<64x128xf32>
    %176 = vector.broadcast %169 : vector<1x128xf32> to vector<64x128xf32>
    %177 = arith.addf %175, %176 : vector<64x128xf32>
    %c0_71 = arith.constant 0 : index
    %c0_72 = arith.constant 0 : index
    %178 = vector.load %arg8[%c0_71, %c0_72] : memref<64x128xf32, #tpu.memory_space<vmem>>, vector<64x128xf32>
    tpu.vector_store %arg8[%c0_71, %c0_72], %177 {strides = array<i32>} : memref<64x128xf32, #tpu.memory_space<vmem>>, vector<64x128xf32>,
    %cst_73 = arith.constant 0.000000e+00 : f32
    %179 = vector.broadcast %cst_73 : f32 to vector<8x32xf32>
    %cst_74 = arith.constant 0.000000e+00 : f32
    %180 = vector.broadcast %cst_74 : f32 to vector<8x32xf32>
    %c0_75 = arith.constant 0 : index
    %c0_76 = arith.constant 0 : index
    %181 = vector.load %arg8[%c0_75, %c0_76] : memref<64x128xf32, #tpu.memory_space<vmem>>, vector<8x128xf32>
    %182 = arith.truncf %179 : vector<8x32xf32> to vector<8x32xbf16>
    %cst_77 = arith.constant dense<0.000000e+00> : vector<8x128xf32>
    %183 = tpu.matmul %182, %168, %cst_77 {dimension_numbers = #tpu.dot_dimension_numbers<[1], [0], [0], [1], [0, 0, 1, 1], [], []>} : vector<8x32xbf16>, vector<32x128xbf16>, vector<8x128xf32> -> vector<8x128xf32>
    %184 = arith.addf %181, %183 : vector<8x128xf32>
    %185 = math.tanh %184 : vector<8x128xf32>
    %cst_78 = arith.constant 5.000000e-01 : f32
    %186 = vector.broadcast %cst_78 : f32 to vector<8x128xf32>
    %187 = arith.mulf %186, %185 : vector<8x128xf32>
    %cst_79 = arith.constant 5.000000e-01 : f32
    %188 = vector.broadcast %cst_79 : f32 to vector<8x128xf32>
    %189 = arith.addf %187, %188 : vector<8x128xf32>
    %190 = vector.extract_strided_slice %189 {offsets = [0, 0], sizes = [8, 32], strides = [1, 1]} : vector<8x128xf32> to vector<8x32xf32>
    %191 = vector.extract_strided_slice %189 {offsets = [0, 32], sizes = [8, 32], strides = [1, 1]} : vector<8x128xf32> to vector<8x32xf32>
    %192 = vector.extract_strided_slice %185 {offsets = [0, 64], sizes = [8, 32], strides = [1, 1]} : vector<8x128xf32> to vector<8x32xf32>
    %193 = vector.extract_strided_slice %189 {offsets = [0, 96], sizes = [8, 32], strides = [1, 1]} : vector<8x128xf32> to vector<8x32xf32>
    %194 = arith.mulf %191, %180 : vector<8x32xf32>
    %195 = arith.mulf %190, %192 : vector<8x32xf32>
    %196 = arith.addf %194, %195 : vector<8x32xf32>
    %197 = math.tanh %196 : vector<8x32xf32>
    %198 = arith.mulf %193, %197 : vector<8x32xf32>
    %c0_80 = arith.constant 0 : index
    %c0_81 = arith.constant 0 : index
    %199 = vector.load %arg9[%c0_80, %c0_81] : memref<64x32xf32, #tpu.memory_space<vmem>>, vector<8x32xf32>
    tpu.vector_store %arg9[%c0_80, %c0_81], %198 {strides = array<i32>} : memref<64x32xf32, #tpu.memory_space<vmem>>, vector<8x32xf32>,
    %c8_82 = arith.constant 8 : index
    %c0_83 = arith.constant 0 : index
    %200 = vector.load %arg8[%c8_82, %c0_83] : memref<64x128xf32, #tpu.memory_space<vmem>>, vector<8x128xf32>
    %201 = arith.truncf %198 : vector<8x32xf32> to vector<8x32xbf16>
    %cst_84 = arith.constant dense<0.000000e+00> : vector<8x128xf32>
    %202 = tpu.matmul %201, %168, %cst_84 {dimension_numbers = #tpu.dot_dimension_numbers<[1], [0], [0], [1], [0, 0, 1, 1], [], []>} : vector<8x32xbf16>, vector<32x128xbf16>, vector<8x128xf32> -> vector<8x128xf32>
    %203 = arith.addf %200, %202 : vector<8x128xf32>
    %204 = math.tanh %203 : vector<8x128xf32>
    %cst_85 = arith.constant 5.000000e-01 : f32
    %205 = vector.broadcast %cst_85 : f32 to vector<8x128xf32>
    %206 = arith.mulf %205, %204 : vector<8x128xf32>
    %cst_86 = arith.constant 5.000000e-01 : f32
    %207 = vector.broadcast %cst_86 : f32 to vector<8x128xf32>
    %208 = arith.addf %206, %207 : vector<8x128xf32>
    %209 = vector.extract_strided_slice %208 {offsets = [0, 0], sizes = [8, 32], strides = [1, 1]} : vector<8x128xf32> to vector<8x32xf32>
    %210 = vector.extract_strided_slice %208 {offsets = [0, 32], sizes = [8, 32], strides = [1, 1]} : vector<8x128xf32> to vector<8x32xf32>
    %211 = vector.extract_strided_slice %204 {offsets = [0, 64], sizes = [8, 32], strides = [1, 1]} : vector<8x128xf32> to vector<8x32xf32>
    %212 = vector.extract_strided_slice %208 {offsets = [0, 96], sizes = [8, 32], strides = [1, 1]} : vector<8x128xf32> to vector<8x32xf32>
    %213 = arith.mulf %210, %196 : vector<8x32xf32>
    %214 = arith.mulf %209, %211 : vector<8x32xf32>
    %215 = arith.addf %213, %214 : vector<8x32xf32>
    %216 = math.tanh %215 : vector<8x32xf32>
    %217 = arith.mulf %212, %216 : vector<8x32xf32>
    %c8_87 = arith.constant 8 : index
    %c0_88 = arith.constant 0 : index
    %218 = vector.load %arg9[%c8_87, %c0_88] : memref<64x32xf32, #tpu.memory_space<vmem>>, vector<8x32xf32>
    tpu.vector_store %arg9[%c8_87, %c0_88], %217 {strides = array<i32>} : memref<64x32xf32, #tpu.memory_space<vmem>>, vector<8x32xf32>,
    %c16_89 = arith.constant 16 : index
    %c0_90 = arith.constant 0 : index
    %219 = vector.load %arg8[%c16_89, %c0_90] : memref<64x128xf32, #tpu.memory_space<vmem>>, vector<8x128xf32>
    %220 = arith.truncf %217 : vector<8x32xf32> to vector<8x32xbf16>
    %cst_91 = arith.constant dense<0.000000e+00> : vector<8x128xf32>
    %221 = tpu.matmul %220, %168, %cst_91 {dimension_numbers = #tpu.dot_dimension_numbers<[1], [0], [0], [1], [0, 0, 1, 1], [], []>} : vector<8x32xbf16>, vector<32x128xbf16>, vector<8x128xf32> -> vector<8x128xf32>
    %222 = arith.addf %219, %221 : vector<8x128xf32>
    %223 = math.tanh %222 : vector<8x128xf32>
    %cst_92 = arith.constant 5.000000e-01 : f32
    %224 = vector.broadcast %cst_92 : f32 to vector<8x128xf32>
    %225 = arith.mulf %224, %223 : vector<8x128xf32>
    %cst_93 = arith.constant 5.000000e-01 : f32
    %226 = vector.broadcast %cst_93 : f32 to vector<8x128xf32>
    %227 = arith.addf %225, %226 : vector<8x128xf32>
    %228 = vector.extract_strided_slice %227 {offsets = [0, 0], sizes = [8, 32], strides = [1, 1]} : vector<8x128xf32> to vector<8x32xf32>
    %229 = vector.extract_strided_slice %227 {offsets = [0, 32], sizes = [8, 32], strides = [1, 1]} : vector<8x128xf32> to vector<8x32xf32>
    %230 = vector.extract_strided_slice %223 {offsets = [0, 64], sizes = [8, 32], strides = [1, 1]} : vector<8x128xf32> to vector<8x32xf32>
    %231 = vector.extract_strided_slice %227 {offsets = [0, 96], sizes = [8, 32], strides = [1, 1]} : vector<8x128xf32> to vector<8x32xf32>
    %232 = arith.mulf %229, %215 : vector<8x32xf32>
    %233 = arith.mulf %228, %230 : vector<8x32xf32>
    %234 = arith.addf %232, %233 : vector<8x32xf32>
    %235 = math.tanh %234 : vector<8x32xf32>
    %236 = arith.mulf %231, %235 : vector<8x32xf32>
    %c16_94 = arith.constant 16 : index
    %c0_95 = arith.constant 0 : index
    %237 = vector.load %arg9[%c16_94, %c0_95] : memref<64x32xf32, #tpu.memory_space<vmem>>, vector<8x32xf32>
    tpu.vector_store %arg9[%c16_94, %c0_95], %236 {strides = array<i32>} : memref<64x32xf32, #tpu.memory_space<vmem>>, vector<8x32xf32>,
    %c24_96 = arith.constant 24 : index
    %c0_97 = arith.constant 0 : index
    %238 = vector.load %arg8[%c24_96, %c0_97] : memref<64x128xf32, #tpu.memory_space<vmem>>, vector<8x128xf32>
    %239 = arith.truncf %236 : vector<8x32xf32> to vector<8x32xbf16>
    %cst_98 = arith.constant dense<0.000000e+00> : vector<8x128xf32>
    %240 = tpu.matmul %239, %168, %cst_98 {dimension_numbers = #tpu.dot_dimension_numbers<[1], [0], [0], [1], [0, 0, 1, 1], [], []>} : vector<8x32xbf16>, vector<32x128xbf16>, vector<8x128xf32> -> vector<8x128xf32>
    %241 = arith.addf %238, %240 : vector<8x128xf32>
    %242 = math.tanh %241 : vector<8x128xf32>
    %cst_99 = arith.constant 5.000000e-01 : f32
    %243 = vector.broadcast %cst_99 : f32 to vector<8x128xf32>
    %244 = arith.mulf %243, %242 : vector<8x128xf32>
    %cst_100 = arith.constant 5.000000e-01 : f32
    %245 = vector.broadcast %cst_100 : f32 to vector<8x128xf32>
    %246 = arith.addf %244, %245 : vector<8x128xf32>
    %247 = vector.extract_strided_slice %246 {offsets = [0, 0], sizes = [8, 32], strides = [1, 1]} : vector<8x128xf32> to vector<8x32xf32>
    %248 = vector.extract_strided_slice %246 {offsets = [0, 32], sizes = [8, 32], strides = [1, 1]} : vector<8x128xf32> to vector<8x32xf32>
    %249 = vector.extract_strided_slice %242 {offsets = [0, 64], sizes = [8, 32], strides = [1, 1]} : vector<8x128xf32> to vector<8x32xf32>
    %250 = vector.extract_strided_slice %246 {offsets = [0, 96], sizes = [8, 32], strides = [1, 1]} : vector<8x128xf32> to vector<8x32xf32>
    %251 = arith.mulf %248, %234 : vector<8x32xf32>
    %252 = arith.mulf %247, %249 : vector<8x32xf32>
    %253 = arith.addf %251, %252 : vector<8x32xf32>
    %254 = math.tanh %253 : vector<8x32xf32>
    %255 = arith.mulf %250, %254 : vector<8x32xf32>
    %c24_101 = arith.constant 24 : index
    %c0_102 = arith.constant 0 : index
    %256 = vector.load %arg9[%c24_101, %c0_102] : memref<64x32xf32, #tpu.memory_space<vmem>>, vector<8x32xf32>
    tpu.vector_store %arg9[%c24_101, %c0_102], %255 {strides = array<i32>} : memref<64x32xf32, #tpu.memory_space<vmem>>, vector<8x32xf32>,
    %c32_103 = arith.constant 32 : index
    %c0_104 = arith.constant 0 : index
    %257 = vector.load %arg8[%c32_103, %c0_104] : memref<64x128xf32, #tpu.memory_space<vmem>>, vector<8x128xf32>
    %258 = arith.truncf %255 : vector<8x32xf32> to vector<8x32xbf16>
    %cst_105 = arith.constant dense<0.000000e+00> : vector<8x128xf32>
    %259 = tpu.matmul %258, %168, %cst_105 {dimension_numbers = #tpu.dot_dimension_numbers<[1], [0], [0], [1], [0, 0, 1, 1], [], []>} : vector<8x32xbf16>, vector<32x128xbf16>, vector<8x128xf32> -> vector<8x128xf32>
    %260 = arith.addf %257, %259 : vector<8x128xf32>
    %261 = math.tanh %260 : vector<8x128xf32>
    %cst_106 = arith.constant 5.000000e-01 : f32
    %262 = vector.broadcast %cst_106 : f32 to vector<8x128xf32>
    %263 = arith.mulf %262, %261 : vector<8x128xf32>
    %cst_107 = arith.constant 5.000000e-01 : f32
    %264 = vector.broadcast %cst_107 : f32 to vector<8x128xf32>
    %265 = arith.addf %263, %264 : vector<8x128xf32>
    %266 = vector.extract_strided_slice %265 {offsets = [0, 0], sizes = [8, 32], strides = [1, 1]} : vector<8x128xf32> to vector<8x32xf32>
    %267 = vector.extract_strided_slice %265 {offsets = [0, 32], sizes = [8, 32], strides = [1, 1]} : vector<8x128xf32> to vector<8x32xf32>
    %268 = vector.extract_strided_slice %261 {offsets = [0, 64], sizes = [8, 32], strides = [1, 1]} : vector<8x128xf32> to vector<8x32xf32>
    %269 = vector.extract_strided_slice %265 {offsets = [0, 96], sizes = [8, 32], strides = [1, 1]} : vector<8x128xf32> to vector<8x32xf32>
    %270 = arith.mulf %267, %253 : vector<8x32xf32>
    %271 = arith.mulf %266, %268 : vector<8x32xf32>
    %272 = arith.addf %270, %271 : vector<8x32xf32>
    %273 = math.tanh %272 : vector<8x32xf32>
    %274 = arith.mulf %269, %273 : vector<8x32xf32>
    %c32_108 = arith.constant 32 : index
    %c0_109 = arith.constant 0 : index
    %275 = vector.load %arg9[%c32_108, %c0_109] : memref<64x32xf32, #tpu.memory_space<vmem>>, vector<8x32xf32>
    tpu.vector_store %arg9[%c32_108, %c0_109], %274 {strides = array<i32>} : memref<64x32xf32, #tpu.memory_space<vmem>>, vector<8x32xf32>,
    %c40_110 = arith.constant 40 : index
    %c0_111 = arith.constant 0 : index
    %276 = vector.load %arg8[%c40_110, %c0_111] : memref<64x128xf32, #tpu.memory_space<vmem>>, vector<8x128xf32>
    %277 = arith.truncf %274 : vector<8x32xf32> to vector<8x32xbf16>
    %cst_112 = arith.constant dense<0.000000e+00> : vector<8x128xf32>
    %278 = tpu.matmul %277, %168, %cst_112 {dimension_numbers = #tpu.dot_dimension_numbers<[1], [0], [0], [1], [0, 0, 1, 1], [], []>} : vector<8x32xbf16>, vector<32x128xbf16>, vector<8x128xf32> -> vector<8x128xf32>
    %279 = arith.addf %276, %278 : vector<8x128xf32>
    %280 = math.tanh %279 : vector<8x128xf32>
    %cst_113 = arith.constant 5.000000e-01 : f32
    %281 = vector.broadcast %cst_113 : f32 to vector<8x128xf32>
    %282 = arith.mulf %281, %280 : vector<8x128xf32>
    %cst_114 = arith.constant 5.000000e-01 : f32
    %283 = vector.broadcast %cst_114 : f32 to vector<8x128xf32>
    %284 = arith.addf %282, %283 : vector<8x128xf32>
    %285 = vector.extract_strided_slice %284 {offsets = [0, 0], sizes = [8, 32], strides = [1, 1]} : vector<8x128xf32> to vector<8x32xf32>
    %286 = vector.extract_strided_slice %284 {offsets = [0, 32], sizes = [8, 32], strides = [1, 1]} : vector<8x128xf32> to vector<8x32xf32>
    %287 = vector.extract_strided_slice %280 {offsets = [0, 64], sizes = [8, 32], strides = [1, 1]} : vector<8x128xf32> to vector<8x32xf32>
    %288 = vector.extract_strided_slice %284 {offsets = [0, 96], sizes = [8, 32], strides = [1, 1]} : vector<8x128xf32> to vector<8x32xf32>
    %289 = arith.mulf %286, %272 : vector<8x32xf32>
    %290 = arith.mulf %285, %287 : vector<8x32xf32>
    %291 = arith.addf %289, %290 : vector<8x32xf32>
    %292 = math.tanh %291 : vector<8x32xf32>
    %293 = arith.mulf %288, %292 : vector<8x32xf32>
    %c40_115 = arith.constant 40 : index
    %c0_116 = arith.constant 0 : index
    %294 = vector.load %arg9[%c40_115, %c0_116] : memref<64x32xf32, #tpu.memory_space<vmem>>, vector<8x32xf32>
    tpu.vector_store %arg9[%c40_115, %c0_116], %293 {strides = array<i32>} : memref<64x32xf32, #tpu.memory_space<vmem>>, vector<8x32xf32>,
    %c48_117 = arith.constant 48 : index
    %c0_118 = arith.constant 0 : index
    %295 = vector.load %arg8[%c48_117, %c0_118] : memref<64x128xf32, #tpu.memory_space<vmem>>, vector<8x128xf32>
    %296 = arith.truncf %293 : vector<8x32xf32> to vector<8x32xbf16>
    %cst_119 = arith.constant dense<0.000000e+00> : vector<8x128xf32>
    %297 = tpu.matmul %296, %168, %cst_119 {dimension_numbers = #tpu.dot_dimension_numbers<[1], [0], [0], [1], [0, 0, 1, 1], [], []>} : vector<8x32xbf16>, vector<32x128xbf16>, vector<8x128xf32> -> vector<8x128xf32>
    %298 = arith.addf %295, %297 : vector<8x128xf32>
    %299 = math.tanh %298 : vector<8x128xf32>
    %cst_120 = arith.constant 5.000000e-01 : f32
    %300 = vector.broadcast %cst_120 : f32 to vector<8x128xf32>
    %301 = arith.mulf %300, %299 : vector<8x128xf32>
    %cst_121 = arith.constant 5.000000e-01 : f32
    %302 = vector.broadcast %cst_121 : f32 to vector<8x128xf32>
    %303 = arith.addf %301, %302 : vector<8x128xf32>
    %304 = vector.extract_strided_slice %303 {offsets = [0, 0], sizes = [8, 32], strides = [1, 1]} : vector<8x128xf32> to vector<8x32xf32>
    %305 = vector.extract_strided_slice %303 {offsets = [0, 32], sizes = [8, 32], strides = [1, 1]} : vector<8x128xf32> to vector<8x32xf32>
    %306 = vector.extract_strided_slice %299 {offsets = [0, 64], sizes = [8, 32], strides = [1, 1]} : vector<8x128xf32> to vector<8x32xf32>
    %307 = vector.extract_strided_slice %303 {offsets = [0, 96], sizes = [8, 32], strides = [1, 1]} : vector<8x128xf32> to vector<8x32xf32>
    %308 = arith.mulf %305, %291 : vector<8x32xf32>
    %309 = arith.mulf %304, %306 : vector<8x32xf32>
    %310 = arith.addf %308, %309 : vector<8x32xf32>
    %311 = math.tanh %310 : vector<8x32xf32>
    %312 = arith.mulf %307, %311 : vector<8x32xf32>
    %c48_122 = arith.constant 48 : index
    %c0_123 = arith.constant 0 : index
    %313 = vector.load %arg9[%c48_122, %c0_123] : memref<64x32xf32, #tpu.memory_space<vmem>>, vector<8x32xf32>
    tpu.vector_store %arg9[%c48_122, %c0_123], %312 {strides = array<i32>} : memref<64x32xf32, #tpu.memory_space<vmem>>, vector<8x32xf32>,
    %c56_124 = arith.constant 56 : index
    %c0_125 = arith.constant 0 : index
    %314 = vector.load %arg8[%c56_124, %c0_125] : memref<64x128xf32, #tpu.memory_space<vmem>>, vector<8x128xf32>
    %315 = arith.truncf %312 : vector<8x32xf32> to vector<8x32xbf16>
    %cst_126 = arith.constant dense<0.000000e+00> : vector<8x128xf32>
    %316 = tpu.matmul %315, %168, %cst_126 {dimension_numbers = #tpu.dot_dimension_numbers<[1], [0], [0], [1], [0, 0, 1, 1], [], []>} : vector<8x32xbf16>, vector<32x128xbf16>, vector<8x128xf32> -> vector<8x128xf32>
    %317 = arith.addf %314, %316 : vector<8x128xf32>
    %318 = math.tanh %317 : vector<8x128xf32>
    %cst_127 = arith.constant 5.000000e-01 : f32
    %319 = vector.broadcast %cst_127 : f32 to vector<8x128xf32>
    %320 = arith.mulf %319, %318 : vector<8x128xf32>
    %cst_128 = arith.constant 5.000000e-01 : f32
    %321 = vector.broadcast %cst_128 : f32 to vector<8x128xf32>
    %322 = arith.addf %320, %321 : vector<8x128xf32>
    %323 = vector.extract_strided_slice %322 {offsets = [0, 0], sizes = [8, 32], strides = [1, 1]} : vector<8x128xf32> to vector<8x32xf32>
    %324 = vector.extract_strided_slice %322 {offsets = [0, 32], sizes = [8, 32], strides = [1, 1]} : vector<8x128xf32> to vector<8x32xf32>
    %325 = vector.extract_strided_slice %318 {offsets = [0, 64], sizes = [8, 32], strides = [1, 1]} : vector<8x128xf32> to vector<8x32xf32>
    %326 = vector.extract_strided_slice %322 {offsets = [0, 96], sizes = [8, 32], strides = [1, 1]} : vector<8x128xf32> to vector<8x32xf32>
    %327 = arith.mulf %324, %310 : vector<8x32xf32>
    %328 = arith.mulf %323, %325 : vector<8x32xf32>
    %329 = arith.addf %327, %328 : vector<8x32xf32>
    %330 = math.tanh %329 : vector<8x32xf32>
    %331 = arith.mulf %326, %330 : vector<8x32xf32>
    %c56_129 = arith.constant 56 : index
    %c0_130 = arith.constant 0 : index
    %332 = vector.load %arg9[%c56_129, %c0_130] : memref<64x32xf32, #tpu.memory_space<vmem>>, vector<8x32xf32>
    tpu.vector_store %arg9[%c56_129, %c0_130], %331 {strides = array<i32>} : memref<64x32xf32, #tpu.memory_space<vmem>>, vector<8x32xf32>,
    %c2 = arith.constant 2 : index
    %c0_131 = arith.constant 0 : index
    %c0_132 = arith.constant 0 : index
    %333 = vector.load %arg3[%c2, %c0_131, %c0_132] : memref<5x32x128xf32, #tpu.memory_space<vmem>>, vector<1x32x128xf32>
    %334 = vector.shape_cast %333 : vector<1x32x128xf32> to vector<32x128xf32>
    %335 = arith.truncf %334 : vector<32x128xf32> to vector<32x128xbf16>
    %c2_133 = arith.constant 2 : index
    %c0_134 = arith.constant 0 : index
    %336 = vector.load %arg4[%c2_133, %c0_134] : memref<5x128xf32, #tpu.memory_space<vmem>>, vector<1x128xf32>
    %c0_135 = arith.constant 0 : index
    %c0_136 = arith.constant 0 : index
    %337 = vector.load %arg9[%c0_135, %c0_136] : memref<64x32xf32, #tpu.memory_space<vmem>>, vector<64x32xf32>
    %c1_137 = arith.constant 1 : index
    %c0_138 = arith.constant 0 : index
    %c0_139 = arith.constant 0 : index
    %338 = vector.load %arg2[%c1_137, %c0_138, %c0_139] : memref<4x32x128xf32, #tpu.memory_space<vmem>>, vector<1x32x128xf32>
    %339 = vector.shape_cast %338 : vector<1x32x128xf32> to vector<32x128xf32>
    %340 = arith.truncf %337 : vector<64x32xf32> to vector<64x32xbf16>
    %341 = arith.truncf %339 : vector<32x128xf32> to vector<32x128xbf16>
    %cst_140 = arith.constant dense<0.000000e+00> : vector<64x128xf32>
    %342 = tpu.matmul %340, %341, %cst_140 {dimension_numbers = #tpu.dot_dimension_numbers<[1], [0], [0], [1], [0, 0, 1, 1], [], []>} : vector<64x32xbf16>, vector<32x128xbf16>, vector<64x128xf32> -> vector<64x128xf32>
    %343 = vector.broadcast %336 : vector<1x128xf32> to vector<64x128xf32>
    %344 = arith.addf %342, %343 : vector<64x128xf32>
    %c0_141 = arith.constant 0 : index
    %c0_142 = arith.constant 0 : index
    %345 = vector.load %arg8[%c0_141, %c0_142] : memref<64x128xf32, #tpu.memory_space<vmem>>, vector<64x128xf32>
    tpu.vector_store %arg8[%c0_141, %c0_142], %344 {strides = array<i32>} : memref<64x128xf32, #tpu.memory_space<vmem>>, vector<64x128xf32>,
    %cst_143 = arith.constant 0.000000e+00 : f32
    %346 = vector.broadcast %cst_143 : f32 to vector<8x32xf32>
    %cst_144 = arith.constant 0.000000e+00 : f32
    %347 = vector.broadcast %cst_144 : f32 to vector<8x32xf32>
    %c0_145 = arith.constant 0 : index
    %c0_146 = arith.constant 0 : index
    %348 = vector.load %arg8[%c0_145, %c0_146] : memref<64x128xf32, #tpu.memory_space<vmem>>, vector<8x128xf32>
    %349 = arith.truncf %346 : vector<8x32xf32> to vector<8x32xbf16>
    %cst_147 = arith.constant dense<0.000000e+00> : vector<8x128xf32>
    %350 = tpu.matmul %349, %335, %cst_147 {dimension_numbers = #tpu.dot_dimension_numbers<[1], [0], [0], [1], [0, 0, 1, 1], [], []>} : vector<8x32xbf16>, vector<32x128xbf16>, vector<8x128xf32> -> vector<8x128xf32>
    %351 = arith.addf %348, %350 : vector<8x128xf32>
    %352 = math.tanh %351 : vector<8x128xf32>
    %cst_148 = arith.constant 5.000000e-01 : f32
    %353 = vector.broadcast %cst_148 : f32 to vector<8x128xf32>
    %354 = arith.mulf %353, %352 : vector<8x128xf32>
    %cst_149 = arith.constant 5.000000e-01 : f32
    %355 = vector.broadcast %cst_149 : f32 to vector<8x128xf32>
    %356 = arith.addf %354, %355 : vector<8x128xf32>
    %357 = vector.extract_strided_slice %356 {offsets = [0, 0], sizes = [8, 32], strides = [1, 1]} : vector<8x128xf32> to vector<8x32xf32>
    %358 = vector.extract_strided_slice %356 {offsets = [0, 32], sizes = [8, 32], strides = [1, 1]} : vector<8x128xf32> to vector<8x32xf32>
    %359 = vector.extract_strided_slice %352 {offsets = [0, 64], sizes = [8, 32], strides = [1, 1]} : vector<8x128xf32> to vector<8x32xf32>
    %360 = vector.extract_strided_slice %356 {offsets = [0, 96], sizes = [8, 32], strides = [1, 1]} : vector<8x128xf32> to vector<8x32xf32>
    %361 = arith.mulf %358, %347 : vector<8x32xf32>
    %362 = arith.mulf %357, %359 : vector<8x32xf32>
    %363 = arith.addf %361, %362 : vector<8x32xf32>
    %364 = math.tanh %363 : vector<8x32xf32>
    %365 = arith.mulf %360, %364 : vector<8x32xf32>
    %c0_150 = arith.constant 0 : index
    %c0_151 = arith.constant 0 : index
    %366 = vector.load %arg9[%c0_150, %c0_151] : memref<64x32xf32, #tpu.memory_space<vmem>>, vector<8x32xf32>
    tpu.vector_store %arg9[%c0_150, %c0_151], %365 {strides = array<i32>} : memref<64x32xf32, #tpu.memory_space<vmem>>, vector<8x32xf32>,
    %c8_152 = arith.constant 8 : index
    %c0_153 = arith.constant 0 : index
    %367 = vector.load %arg8[%c8_152, %c0_153] : memref<64x128xf32, #tpu.memory_space<vmem>>, vector<8x128xf32>
    %368 = arith.truncf %365 : vector<8x32xf32> to vector<8x32xbf16>
    %cst_154 = arith.constant dense<0.000000e+00> : vector<8x128xf32>
    %369 = tpu.matmul %368, %335, %cst_154 {dimension_numbers = #tpu.dot_dimension_numbers<[1], [0], [0], [1], [0, 0, 1, 1], [], []>} : vector<8x32xbf16>, vector<32x128xbf16>, vector<8x128xf32> -> vector<8x128xf32>
    %370 = arith.addf %367, %369 : vector<8x128xf32>
    %371 = math.tanh %370 : vector<8x128xf32>
    %cst_155 = arith.constant 5.000000e-01 : f32
    %372 = vector.broadcast %cst_155 : f32 to vector<8x128xf32>
    %373 = arith.mulf %372, %371 : vector<8x128xf32>
    %cst_156 = arith.constant 5.000000e-01 : f32
    %374 = vector.broadcast %cst_156 : f32 to vector<8x128xf32>
    %375 = arith.addf %373, %374 : vector<8x128xf32>
    %376 = vector.extract_strided_slice %375 {offsets = [0, 0], sizes = [8, 32], strides = [1, 1]} : vector<8x128xf32> to vector<8x32xf32>
    %377 = vector.extract_strided_slice %375 {offsets = [0, 32], sizes = [8, 32], strides = [1, 1]} : vector<8x128xf32> to vector<8x32xf32>
    %378 = vector.extract_strided_slice %371 {offsets = [0, 64], sizes = [8, 32], strides = [1, 1]} : vector<8x128xf32> to vector<8x32xf32>
    %379 = vector.extract_strided_slice %375 {offsets = [0, 96], sizes = [8, 32], strides = [1, 1]} : vector<8x128xf32> to vector<8x32xf32>
    %380 = arith.mulf %377, %363 : vector<8x32xf32>
    %381 = arith.mulf %376, %378 : vector<8x32xf32>
    %382 = arith.addf %380, %381 : vector<8x32xf32>
    %383 = math.tanh %382 : vector<8x32xf32>
    %384 = arith.mulf %379, %383 : vector<8x32xf32>
    %c8_157 = arith.constant 8 : index
    %c0_158 = arith.constant 0 : index
    %385 = vector.load %arg9[%c8_157, %c0_158] : memref<64x32xf32, #tpu.memory_space<vmem>>, vector<8x32xf32>
    tpu.vector_store %arg9[%c8_157, %c0_158], %384 {strides = array<i32>} : memref<64x32xf32, #tpu.memory_space<vmem>>, vector<8x32xf32>,
    %c16_159 = arith.constant 16 : index
    %c0_160 = arith.constant 0 : index
    %386 = vector.load %arg8[%c16_159, %c0_160] : memref<64x128xf32, #tpu.memory_space<vmem>>, vector<8x128xf32>
    %387 = arith.truncf %384 : vector<8x32xf32> to vector<8x32xbf16>
    %cst_161 = arith.constant dense<0.000000e+00> : vector<8x128xf32>
    %388 = tpu.matmul %387, %335, %cst_161 {dimension_numbers = #tpu.dot_dimension_numbers<[1], [0], [0], [1], [0, 0, 1, 1], [], []>} : vector<8x32xbf16>, vector<32x128xbf16>, vector<8x128xf32> -> vector<8x128xf32>
    %389 = arith.addf %386, %388 : vector<8x128xf32>
    %390 = math.tanh %389 : vector<8x128xf32>
    %cst_162 = arith.constant 5.000000e-01 : f32
    %391 = vector.broadcast %cst_162 : f32 to vector<8x128xf32>
    %392 = arith.mulf %391, %390 : vector<8x128xf32>
    %cst_163 = arith.constant 5.000000e-01 : f32
    %393 = vector.broadcast %cst_163 : f32 to vector<8x128xf32>
    %394 = arith.addf %392, %393 : vector<8x128xf32>
    %395 = vector.extract_strided_slice %394 {offsets = [0, 0], sizes = [8, 32], strides = [1, 1]} : vector<8x128xf32> to vector<8x32xf32>
    %396 = vector.extract_strided_slice %394 {offsets = [0, 32], sizes = [8, 32], strides = [1, 1]} : vector<8x128xf32> to vector<8x32xf32>
    %397 = vector.extract_strided_slice %390 {offsets = [0, 64], sizes = [8, 32], strides = [1, 1]} : vector<8x128xf32> to vector<8x32xf32>
    %398 = vector.extract_strided_slice %394 {offsets = [0, 96], sizes = [8, 32], strides = [1, 1]} : vector<8x128xf32> to vector<8x32xf32>
    %399 = arith.mulf %396, %382 : vector<8x32xf32>
    %400 = arith.mulf %395, %397 : vector<8x32xf32>
    %401 = arith.addf %399, %400 : vector<8x32xf32>
    %402 = math.tanh %401 : vector<8x32xf32>
    %403 = arith.mulf %398, %402 : vector<8x32xf32>
    %c16_164 = arith.constant 16 : index
    %c0_165 = arith.constant 0 : index
    %404 = vector.load %arg9[%c16_164, %c0_165] : memref<64x32xf32, #tpu.memory_space<vmem>>, vector<8x32xf32>
    tpu.vector_store %arg9[%c16_164, %c0_165], %403 {strides = array<i32>} : memref<64x32xf32, #tpu.memory_space<vmem>>, vector<8x32xf32>,
    %c24_166 = arith.constant 24 : index
    %c0_167 = arith.constant 0 : index
    %405 = vector.load %arg8[%c24_166, %c0_167] : memref<64x128xf32, #tpu.memory_space<vmem>>, vector<8x128xf32>
    %406 = arith.truncf %403 : vector<8x32xf32> to vector<8x32xbf16>
    %cst_168 = arith.constant dense<0.000000e+00> : vector<8x128xf32>
    %407 = tpu.matmul %406, %335, %cst_168 {dimension_numbers = #tpu.dot_dimension_numbers<[1], [0], [0], [1], [0, 0, 1, 1], [], []>} : vector<8x32xbf16>, vector<32x128xbf16>, vector<8x128xf32> -> vector<8x128xf32>
    %408 = arith.addf %405, %407 : vector<8x128xf32>
    %409 = math.tanh %408 : vector<8x128xf32>
    %cst_169 = arith.constant 5.000000e-01 : f32
    %410 = vector.broadcast %cst_169 : f32 to vector<8x128xf32>
    %411 = arith.mulf %410, %409 : vector<8x128xf32>
    %cst_170 = arith.constant 5.000000e-01 : f32
    %412 = vector.broadcast %cst_170 : f32 to vector<8x128xf32>
    %413 = arith.addf %411, %412 : vector<8x128xf32>
    %414 = vector.extract_strided_slice %413 {offsets = [0, 0], sizes = [8, 32], strides = [1, 1]} : vector<8x128xf32> to vector<8x32xf32>
    %415 = vector.extract_strided_slice %413 {offsets = [0, 32], sizes = [8, 32], strides = [1, 1]} : vector<8x128xf32> to vector<8x32xf32>
    %416 = vector.extract_strided_slice %409 {offsets = [0, 64], sizes = [8, 32], strides = [1, 1]} : vector<8x128xf32> to vector<8x32xf32>
    %417 = vector.extract_strided_slice %413 {offsets = [0, 96], sizes = [8, 32], strides = [1, 1]} : vector<8x128xf32> to vector<8x32xf32>
    %418 = arith.mulf %415, %401 : vector<8x32xf32>
    %419 = arith.mulf %414, %416 : vector<8x32xf32>
    %420 = arith.addf %418, %419 : vector<8x32xf32>
    %421 = math.tanh %420 : vector<8x32xf32>
    %422 = arith.mulf %417, %421 : vector<8x32xf32>
    %c24_171 = arith.constant 24 : index
    %c0_172 = arith.constant 0 : index
    %423 = vector.load %arg9[%c24_171, %c0_172] : memref<64x32xf32, #tpu.memory_space<vmem>>, vector<8x32xf32>
    tpu.vector_store %arg9[%c24_171, %c0_172], %422 {strides = array<i32>} : memref<64x32xf32, #tpu.memory_space<vmem>>, vector<8x32xf32>,
    %c32_173 = arith.constant 32 : index
    %c0_174 = arith.constant 0 : index
    %424 = vector.load %arg8[%c32_173, %c0_174] : memref<64x128xf32, #tpu.memory_space<vmem>>, vector<8x128xf32>
    %425 = arith.truncf %422 : vector<8x32xf32> to vector<8x32xbf16>
    %cst_175 = arith.constant dense<0.000000e+00> : vector<8x128xf32>
    %426 = tpu.matmul %425, %335, %cst_175 {dimension_numbers = #tpu.dot_dimension_numbers<[1], [0], [0], [1], [0, 0, 1, 1], [], []>} : vector<8x32xbf16>, vector<32x128xbf16>, vector<8x128xf32> -> vector<8x128xf32>
    %427 = arith.addf %424, %426 : vector<8x128xf32>
    %428 = math.tanh %427 : vector<8x128xf32>
    %cst_176 = arith.constant 5.000000e-01 : f32
    %429 = vector.broadcast %cst_176 : f32 to vector<8x128xf32>
    %430 = arith.mulf %429, %428 : vector<8x128xf32>
    %cst_177 = arith.constant 5.000000e-01 : f32
    %431 = vector.broadcast %cst_177 : f32 to vector<8x128xf32>
    %432 = arith.addf %430, %431 : vector<8x128xf32>
    %433 = vector.extract_strided_slice %432 {offsets = [0, 0], sizes = [8, 32], strides = [1, 1]} : vector<8x128xf32> to vector<8x32xf32>
    %434 = vector.extract_strided_slice %432 {offsets = [0, 32], sizes = [8, 32], strides = [1, 1]} : vector<8x128xf32> to vector<8x32xf32>
    %435 = vector.extract_strided_slice %428 {offsets = [0, 64], sizes = [8, 32], strides = [1, 1]} : vector<8x128xf32> to vector<8x32xf32>
    %436 = vector.extract_strided_slice %432 {offsets = [0, 96], sizes = [8, 32], strides = [1, 1]} : vector<8x128xf32> to vector<8x32xf32>
    %437 = arith.mulf %434, %420 : vector<8x32xf32>
    %438 = arith.mulf %433, %435 : vector<8x32xf32>
    %439 = arith.addf %437, %438 : vector<8x32xf32>
    %440 = math.tanh %439 : vector<8x32xf32>
    %441 = arith.mulf %436, %440 : vector<8x32xf32>
    %c32_178 = arith.constant 32 : index
    %c0_179 = arith.constant 0 : index
    %442 = vector.load %arg9[%c32_178, %c0_179] : memref<64x32xf32, #tpu.memory_space<vmem>>, vector<8x32xf32>
    tpu.vector_store %arg9[%c32_178, %c0_179], %441 {strides = array<i32>} : memref<64x32xf32, #tpu.memory_space<vmem>>, vector<8x32xf32>,
    %c40_180 = arith.constant 40 : index
    %c0_181 = arith.constant 0 : index
    %443 = vector.load %arg8[%c40_180, %c0_181] : memref<64x128xf32, #tpu.memory_space<vmem>>, vector<8x128xf32>
    %444 = arith.truncf %441 : vector<8x32xf32> to vector<8x32xbf16>
    %cst_182 = arith.constant dense<0.000000e+00> : vector<8x128xf32>
    %445 = tpu.matmul %444, %335, %cst_182 {dimension_numbers = #tpu.dot_dimension_numbers<[1], [0], [0], [1], [0, 0, 1, 1], [], []>} : vector<8x32xbf16>, vector<32x128xbf16>, vector<8x128xf32> -> vector<8x128xf32>
    %446 = arith.addf %443, %445 : vector<8x128xf32>
    %447 = math.tanh %446 : vector<8x128xf32>
    %cst_183 = arith.constant 5.000000e-01 : f32
    %448 = vector.broadcast %cst_183 : f32 to vector<8x128xf32>
    %449 = arith.mulf %448, %447 : vector<8x128xf32>
    %cst_184 = arith.constant 5.000000e-01 : f32
    %450 = vector.broadcast %cst_184 : f32 to vector<8x128xf32>
    %451 = arith.addf %449, %450 : vector<8x128xf32>
    %452 = vector.extract_strided_slice %451 {offsets = [0, 0], sizes = [8, 32], strides = [1, 1]} : vector<8x128xf32> to vector<8x32xf32>
    %453 = vector.extract_strided_slice %451 {offsets = [0, 32], sizes = [8, 32], strides = [1, 1]} : vector<8x128xf32> to vector<8x32xf32>
    %454 = vector.extract_strided_slice %447 {offsets = [0, 64], sizes = [8, 32], strides = [1, 1]} : vector<8x128xf32> to vector<8x32xf32>
    %455 = vector.extract_strided_slice %451 {offsets = [0, 96], sizes = [8, 32], strides = [1, 1]} : vector<8x128xf32> to vector<8x32xf32>
    %456 = arith.mulf %453, %439 : vector<8x32xf32>
    %457 = arith.mulf %452, %454 : vector<8x32xf32>
    %458 = arith.addf %456, %457 : vector<8x32xf32>
    %459 = math.tanh %458 : vector<8x32xf32>
    %460 = arith.mulf %455, %459 : vector<8x32xf32>
    %c40_185 = arith.constant 40 : index
    %c0_186 = arith.constant 0 : index
    %461 = vector.load %arg9[%c40_185, %c0_186] : memref<64x32xf32, #tpu.memory_space<vmem>>, vector<8x32xf32>
    tpu.vector_store %arg9[%c40_185, %c0_186], %460 {strides = array<i32>} : memref<64x32xf32, #tpu.memory_space<vmem>>, vector<8x32xf32>,
    %c48_187 = arith.constant 48 : index
    %c0_188 = arith.constant 0 : index
    %462 = vector.load %arg8[%c48_187, %c0_188] : memref<64x128xf32, #tpu.memory_space<vmem>>, vector<8x128xf32>
    %463 = arith.truncf %460 : vector<8x32xf32> to vector<8x32xbf16>
    %cst_189 = arith.constant dense<0.000000e+00> : vector<8x128xf32>
    %464 = tpu.matmul %463, %335, %cst_189 {dimension_numbers = #tpu.dot_dimension_numbers<[1], [0], [0], [1], [0, 0, 1, 1], [], []>} : vector<8x32xbf16>, vector<32x128xbf16>, vector<8x128xf32> -> vector<8x128xf32>
    %465 = arith.addf %462, %464 : vector<8x128xf32>
    %466 = math.tanh %465 : vector<8x128xf32>
    %cst_190 = arith.constant 5.000000e-01 : f32
    %467 = vector.broadcast %cst_190 : f32 to vector<8x128xf32>
    %468 = arith.mulf %467, %466 : vector<8x128xf32>
    %cst_191 = arith.constant 5.000000e-01 : f32
    %469 = vector.broadcast %cst_191 : f32 to vector<8x128xf32>
    %470 = arith.addf %468, %469 : vector<8x128xf32>
    %471 = vector.extract_strided_slice %470 {offsets = [0, 0], sizes = [8, 32], strides = [1, 1]} : vector<8x128xf32> to vector<8x32xf32>
    %472 = vector.extract_strided_slice %470 {offsets = [0, 32], sizes = [8, 32], strides = [1, 1]} : vector<8x128xf32> to vector<8x32xf32>
    %473 = vector.extract_strided_slice %466 {offsets = [0, 64], sizes = [8, 32], strides = [1, 1]} : vector<8x128xf32> to vector<8x32xf32>
    %474 = vector.extract_strided_slice %470 {offsets = [0, 96], sizes = [8, 32], strides = [1, 1]} : vector<8x128xf32> to vector<8x32xf32>
    %475 = arith.mulf %472, %458 : vector<8x32xf32>
    %476 = arith.mulf %471, %473 : vector<8x32xf32>
    %477 = arith.addf %475, %476 : vector<8x32xf32>
    %478 = math.tanh %477 : vector<8x32xf32>
    %479 = arith.mulf %474, %478 : vector<8x32xf32>
    %c48_192 = arith.constant 48 : index
    %c0_193 = arith.constant 0 : index
    %480 = vector.load %arg9[%c48_192, %c0_193] : memref<64x32xf32, #tpu.memory_space<vmem>>, vector<8x32xf32>
    tpu.vector_store %arg9[%c48_192, %c0_193], %479 {strides = array<i32>} : memref<64x32xf32, #tpu.memory_space<vmem>>, vector<8x32xf32>,
    %c56_194 = arith.constant 56 : index
    %c0_195 = arith.constant 0 : index
    %481 = vector.load %arg8[%c56_194, %c0_195] : memref<64x128xf32, #tpu.memory_space<vmem>>, vector<8x128xf32>
    %482 = arith.truncf %479 : vector<8x32xf32> to vector<8x32xbf16>
    %cst_196 = arith.constant dense<0.000000e+00> : vector<8x128xf32>
    %483 = tpu.matmul %482, %335, %cst_196 {dimension_numbers = #tpu.dot_dimension_numbers<[1], [0], [0], [1], [0, 0, 1, 1], [], []>} : vector<8x32xbf16>, vector<32x128xbf16>, vector<8x128xf32> -> vector<8x128xf32>
    %484 = arith.addf %481, %483 : vector<8x128xf32>
    %485 = math.tanh %484 : vector<8x128xf32>
    %cst_197 = arith.constant 5.000000e-01 : f32
    %486 = vector.broadcast %cst_197 : f32 to vector<8x128xf32>
    %487 = arith.mulf %486, %485 : vector<8x128xf32>
    %cst_198 = arith.constant 5.000000e-01 : f32
    %488 = vector.broadcast %cst_198 : f32 to vector<8x128xf32>
    %489 = arith.addf %487, %488 : vector<8x128xf32>
    %490 = vector.extract_strided_slice %489 {offsets = [0, 0], sizes = [8, 32], strides = [1, 1]} : vector<8x128xf32> to vector<8x32xf32>
    %491 = vector.extract_strided_slice %489 {offsets = [0, 32], sizes = [8, 32], strides = [1, 1]} : vector<8x128xf32> to vector<8x32xf32>
    %492 = vector.extract_strided_slice %485 {offsets = [0, 64], sizes = [8, 32], strides = [1, 1]} : vector<8x128xf32> to vector<8x32xf32>
    %493 = vector.extract_strided_slice %489 {offsets = [0, 96], sizes = [8, 32], strides = [1, 1]} : vector<8x128xf32> to vector<8x32xf32>
    %494 = arith.mulf %491, %477 : vector<8x32xf32>
    %495 = arith.mulf %490, %492 : vector<8x32xf32>
    %496 = arith.addf %494, %495 : vector<8x32xf32>
    %497 = math.tanh %496 : vector<8x32xf32>
    %498 = arith.mulf %493, %497 : vector<8x32xf32>
    %c56_199 = arith.constant 56 : index
    %c0_200 = arith.constant 0 : index
    %499 = vector.load %arg9[%c56_199, %c0_200] : memref<64x32xf32, #tpu.memory_space<vmem>>, vector<8x32xf32>
    tpu.vector_store %arg9[%c56_199, %c0_200], %498 {strides = array<i32>} : memref<64x32xf32, #tpu.memory_space<vmem>>, vector<8x32xf32>,
    %c3 = arith.constant 3 : index
    %c0_201 = arith.constant 0 : index
    %c0_202 = arith.constant 0 : index
    %500 = vector.load %arg3[%c3, %c0_201, %c0_202] : memref<5x32x128xf32, #tpu.memory_space<vmem>>, vector<1x32x128xf32>
    %501 = vector.shape_cast %500 : vector<1x32x128xf32> to vector<32x128xf32>
    %502 = arith.truncf %501 : vector<32x128xf32> to vector<32x128xbf16>
    %c3_203 = arith.constant 3 : index
    %c0_204 = arith.constant 0 : index
    %503 = vector.load %arg4[%c3_203, %c0_204] : memref<5x128xf32, #tpu.memory_space<vmem>>, vector<1x128xf32>
    %c0_205 = arith.constant 0 : index
    %c0_206 = arith.constant 0 : index
    %504 = vector.load %arg9[%c0_205, %c0_206] : memref<64x32xf32, #tpu.memory_space<vmem>>, vector<64x32xf32>
    %c2_207 = arith.constant 2 : index
    %c0_208 = arith.constant 0 : index
    %c0_209 = arith.constant 0 : index
    %505 = vector.load %arg2[%c2_207, %c0_208, %c0_209] : memref<4x32x128xf32, #tpu.memory_space<vmem>>, vector<1x32x128xf32>
    %506 = vector.shape_cast %505 : vector<1x32x128xf32> to vector<32x128xf32>
    %507 = arith.truncf %504 : vector<64x32xf32> to vector<64x32xbf16>
    %508 = arith.truncf %506 : vector<32x128xf32> to vector<32x128xbf16>
    %cst_210 = arith.constant dense<0.000000e+00> : vector<64x128xf32>
    %509 = tpu.matmul %507, %508, %cst_210 {dimension_numbers = #tpu.dot_dimension_numbers<[1], [0], [0], [1], [0, 0, 1, 1], [], []>} : vector<64x32xbf16>, vector<32x128xbf16>, vector<64x128xf32> -> vector<64x128xf32>
    %510 = vector.broadcast %503 : vector<1x128xf32> to vector<64x128xf32>
    %511 = arith.addf %509, %510 : vector<64x128xf32>
    %c0_211 = arith.constant 0 : index
    %c0_212 = arith.constant 0 : index
    %512 = vector.load %arg8[%c0_211, %c0_212] : memref<64x128xf32, #tpu.memory_space<vmem>>, vector<64x128xf32>
    tpu.vector_store %arg8[%c0_211, %c0_212], %511 {strides = array<i32>} : memref<64x128xf32, #tpu.memory_space<vmem>>, vector<64x128xf32>,
    %cst_213 = arith.constant 0.000000e+00 : f32
    %513 = vector.broadcast %cst_213 : f32 to vector<8x32xf32>
    %cst_214 = arith.constant 0.000000e+00 : f32
    %514 = vector.broadcast %cst_214 : f32 to vector<8x32xf32>
    %c0_215 = arith.constant 0 : index
    %c0_216 = arith.constant 0 : index
    %515 = vector.load %arg8[%c0_215, %c0_216] : memref<64x128xf32, #tpu.memory_space<vmem>>, vector<8x128xf32>
    %516 = arith.truncf %513 : vector<8x32xf32> to vector<8x32xbf16>
    %cst_217 = arith.constant dense<0.000000e+00> : vector<8x128xf32>
    %517 = tpu.matmul %516, %502, %cst_217 {dimension_numbers = #tpu.dot_dimension_numbers<[1], [0], [0], [1], [0, 0, 1, 1], [], []>} : vector<8x32xbf16>, vector<32x128xbf16>, vector<8x128xf32> -> vector<8x128xf32>
    %518 = arith.addf %515, %517 : vector<8x128xf32>
    %519 = math.tanh %518 : vector<8x128xf32>
    %cst_218 = arith.constant 5.000000e-01 : f32
    %520 = vector.broadcast %cst_218 : f32 to vector<8x128xf32>
    %521 = arith.mulf %520, %519 : vector<8x128xf32>
    %cst_219 = arith.constant 5.000000e-01 : f32
    %522 = vector.broadcast %cst_219 : f32 to vector<8x128xf32>
    %523 = arith.addf %521, %522 : vector<8x128xf32>
    %524 = vector.extract_strided_slice %523 {offsets = [0, 0], sizes = [8, 32], strides = [1, 1]} : vector<8x128xf32> to vector<8x32xf32>
    %525 = vector.extract_strided_slice %523 {offsets = [0, 32], sizes = [8, 32], strides = [1, 1]} : vector<8x128xf32> to vector<8x32xf32>
    %526 = vector.extract_strided_slice %519 {offsets = [0, 64], sizes = [8, 32], strides = [1, 1]} : vector<8x128xf32> to vector<8x32xf32>
    %527 = vector.extract_strided_slice %523 {offsets = [0, 96], sizes = [8, 32], strides = [1, 1]} : vector<8x128xf32> to vector<8x32xf32>
    %528 = arith.mulf %525, %514 : vector<8x32xf32>
    %529 = arith.mulf %524, %526 : vector<8x32xf32>
    %530 = arith.addf %528, %529 : vector<8x32xf32>
    %531 = math.tanh %530 : vector<8x32xf32>
    %532 = arith.mulf %527, %531 : vector<8x32xf32>
    %c0_220 = arith.constant 0 : index
    %c0_221 = arith.constant 0 : index
    %533 = vector.load %arg9[%c0_220, %c0_221] : memref<64x32xf32, #tpu.memory_space<vmem>>, vector<8x32xf32>
    tpu.vector_store %arg9[%c0_220, %c0_221], %532 {strides = array<i32>} : memref<64x32xf32, #tpu.memory_space<vmem>>, vector<8x32xf32>,
    %c8_222 = arith.constant 8 : index
    %c0_223 = arith.constant 0 : index
    %534 = vector.load %arg8[%c8_222, %c0_223] : memref<64x128xf32, #tpu.memory_space<vmem>>, vector<8x128xf32>
    %535 = arith.truncf %532 : vector<8x32xf32> to vector<8x32xbf16>
    %cst_224 = arith.constant dense<0.000000e+00> : vector<8x128xf32>
    %536 = tpu.matmul %535, %502, %cst_224 {dimension_numbers = #tpu.dot_dimension_numbers<[1], [0], [0], [1], [0, 0, 1, 1], [], []>} : vector<8x32xbf16>, vector<32x128xbf16>, vector<8x128xf32> -> vector<8x128xf32>
    %537 = arith.addf %534, %536 : vector<8x128xf32>
    %538 = math.tanh %537 : vector<8x128xf32>
    %cst_225 = arith.constant 5.000000e-01 : f32
    %539 = vector.broadcast %cst_225 : f32 to vector<8x128xf32>
    %540 = arith.mulf %539, %538 : vector<8x128xf32>
    %cst_226 = arith.constant 5.000000e-01 : f32
    %541 = vector.broadcast %cst_226 : f32 to vector<8x128xf32>
    %542 = arith.addf %540, %541 : vector<8x128xf32>
    %543 = vector.extract_strided_slice %542 {offsets = [0, 0], sizes = [8, 32], strides = [1, 1]} : vector<8x128xf32> to vector<8x32xf32>
    %544 = vector.extract_strided_slice %542 {offsets = [0, 32], sizes = [8, 32], strides = [1, 1]} : vector<8x128xf32> to vector<8x32xf32>
    %545 = vector.extract_strided_slice %538 {offsets = [0, 64], sizes = [8, 32], strides = [1, 1]} : vector<8x128xf32> to vector<8x32xf32>
    %546 = vector.extract_strided_slice %542 {offsets = [0, 96], sizes = [8, 32], strides = [1, 1]} : vector<8x128xf32> to vector<8x32xf32>
    %547 = arith.mulf %544, %530 : vector<8x32xf32>
    %548 = arith.mulf %543, %545 : vector<8x32xf32>
    %549 = arith.addf %547, %548 : vector<8x32xf32>
    %550 = math.tanh %549 : vector<8x32xf32>
    %551 = arith.mulf %546, %550 : vector<8x32xf32>
    %c8_227 = arith.constant 8 : index
    %c0_228 = arith.constant 0 : index
    %552 = vector.load %arg9[%c8_227, %c0_228] : memref<64x32xf32, #tpu.memory_space<vmem>>, vector<8x32xf32>
    tpu.vector_store %arg9[%c8_227, %c0_228], %551 {strides = array<i32>} : memref<64x32xf32, #tpu.memory_space<vmem>>, vector<8x32xf32>,
    %c16_229 = arith.constant 16 : index
    %c0_230 = arith.constant 0 : index
    %553 = vector.load %arg8[%c16_229, %c0_230] : memref<64x128xf32, #tpu.memory_space<vmem>>, vector<8x128xf32>
    %554 = arith.truncf %551 : vector<8x32xf32> to vector<8x32xbf16>
    %cst_231 = arith.constant dense<0.000000e+00> : vector<8x128xf32>
    %555 = tpu.matmul %554, %502, %cst_231 {dimension_numbers = #tpu.dot_dimension_numbers<[1], [0], [0], [1], [0, 0, 1, 1], [], []>} : vector<8x32xbf16>, vector<32x128xbf16>, vector<8x128xf32> -> vector<8x128xf32>
    %556 = arith.addf %553, %555 : vector<8x128xf32>
    %557 = math.tanh %556 : vector<8x128xf32>
    %cst_232 = arith.constant 5.000000e-01 : f32
    %558 = vector.broadcast %cst_232 : f32 to vector<8x128xf32>
    %559 = arith.mulf %558, %557 : vector<8x128xf32>
    %cst_233 = arith.constant 5.000000e-01 : f32
    %560 = vector.broadcast %cst_233 : f32 to vector<8x128xf32>
    %561 = arith.addf %559, %560 : vector<8x128xf32>
    %562 = vector.extract_strided_slice %561 {offsets = [0, 0], sizes = [8, 32], strides = [1, 1]} : vector<8x128xf32> to vector<8x32xf32>
    %563 = vector.extract_strided_slice %561 {offsets = [0, 32], sizes = [8, 32], strides = [1, 1]} : vector<8x128xf32> to vector<8x32xf32>
    %564 = vector.extract_strided_slice %557 {offsets = [0, 64], sizes = [8, 32], strides = [1, 1]} : vector<8x128xf32> to vector<8x32xf32>
    %565 = vector.extract_strided_slice %561 {offsets = [0, 96], sizes = [8, 32], strides = [1, 1]} : vector<8x128xf32> to vector<8x32xf32>
    %566 = arith.mulf %563, %549 : vector<8x32xf32>
    %567 = arith.mulf %562, %564 : vector<8x32xf32>
    %568 = arith.addf %566, %567 : vector<8x32xf32>
    %569 = math.tanh %568 : vector<8x32xf32>
    %570 = arith.mulf %565, %569 : vector<8x32xf32>
    %c16_234 = arith.constant 16 : index
    %c0_235 = arith.constant 0 : index
    %571 = vector.load %arg9[%c16_234, %c0_235] : memref<64x32xf32, #tpu.memory_space<vmem>>, vector<8x32xf32>
    tpu.vector_store %arg9[%c16_234, %c0_235], %570 {strides = array<i32>} : memref<64x32xf32, #tpu.memory_space<vmem>>, vector<8x32xf32>,
    %c24_236 = arith.constant 24 : index
    %c0_237 = arith.constant 0 : index
    %572 = vector.load %arg8[%c24_236, %c0_237] : memref<64x128xf32, #tpu.memory_space<vmem>>, vector<8x128xf32>
    %573 = arith.truncf %570 : vector<8x32xf32> to vector<8x32xbf16>
    %cst_238 = arith.constant dense<0.000000e+00> : vector<8x128xf32>
    %574 = tpu.matmul %573, %502, %cst_238 {dimension_numbers = #tpu.dot_dimension_numbers<[1], [0], [0], [1], [0, 0, 1, 1], [], []>} : vector<8x32xbf16>, vector<32x128xbf16>, vector<8x128xf32> -> vector<8x128xf32>
    %575 = arith.addf %572, %574 : vector<8x128xf32>
    %576 = math.tanh %575 : vector<8x128xf32>
    %cst_239 = arith.constant 5.000000e-01 : f32
    %577 = vector.broadcast %cst_239 : f32 to vector<8x128xf32>
    %578 = arith.mulf %577, %576 : vector<8x128xf32>
    %cst_240 = arith.constant 5.000000e-01 : f32
    %579 = vector.broadcast %cst_240 : f32 to vector<8x128xf32>
    %580 = arith.addf %578, %579 : vector<8x128xf32>
    %581 = vector.extract_strided_slice %580 {offsets = [0, 0], sizes = [8, 32], strides = [1, 1]} : vector<8x128xf32> to vector<8x32xf32>
    %582 = vector.extract_strided_slice %580 {offsets = [0, 32], sizes = [8, 32], strides = [1, 1]} : vector<8x128xf32> to vector<8x32xf32>
    %583 = vector.extract_strided_slice %576 {offsets = [0, 64], sizes = [8, 32], strides = [1, 1]} : vector<8x128xf32> to vector<8x32xf32>
    %584 = vector.extract_strided_slice %580 {offsets = [0, 96], sizes = [8, 32], strides = [1, 1]} : vector<8x128xf32> to vector<8x32xf32>
    %585 = arith.mulf %582, %568 : vector<8x32xf32>
    %586 = arith.mulf %581, %583 : vector<8x32xf32>
    %587 = arith.addf %585, %586 : vector<8x32xf32>
    %588 = math.tanh %587 : vector<8x32xf32>
    %589 = arith.mulf %584, %588 : vector<8x32xf32>
    %c24_241 = arith.constant 24 : index
    %c0_242 = arith.constant 0 : index
    %590 = vector.load %arg9[%c24_241, %c0_242] : memref<64x32xf32, #tpu.memory_space<vmem>>, vector<8x32xf32>
    tpu.vector_store %arg9[%c24_241, %c0_242], %589 {strides = array<i32>} : memref<64x32xf32, #tpu.memory_space<vmem>>, vector<8x32xf32>,
    %c32_243 = arith.constant 32 : index
    %c0_244 = arith.constant 0 : index
    %591 = vector.load %arg8[%c32_243, %c0_244] : memref<64x128xf32, #tpu.memory_space<vmem>>, vector<8x128xf32>
    %592 = arith.truncf %589 : vector<8x32xf32> to vector<8x32xbf16>
    %cst_245 = arith.constant dense<0.000000e+00> : vector<8x128xf32>
    %593 = tpu.matmul %592, %502, %cst_245 {dimension_numbers = #tpu.dot_dimension_numbers<[1], [0], [0], [1], [0, 0, 1, 1], [], []>} : vector<8x32xbf16>, vector<32x128xbf16>, vector<8x128xf32> -> vector<8x128xf32>
    %594 = arith.addf %591, %593 : vector<8x128xf32>
    %595 = math.tanh %594 : vector<8x128xf32>
    %cst_246 = arith.constant 5.000000e-01 : f32
    %596 = vector.broadcast %cst_246 : f32 to vector<8x128xf32>
    %597 = arith.mulf %596, %595 : vector<8x128xf32>
    %cst_247 = arith.constant 5.000000e-01 : f32
    %598 = vector.broadcast %cst_247 : f32 to vector<8x128xf32>
    %599 = arith.addf %597, %598 : vector<8x128xf32>
    %600 = vector.extract_strided_slice %599 {offsets = [0, 0], sizes = [8, 32], strides = [1, 1]} : vector<8x128xf32> to vector<8x32xf32>
    %601 = vector.extract_strided_slice %599 {offsets = [0, 32], sizes = [8, 32], strides = [1, 1]} : vector<8x128xf32> to vector<8x32xf32>
    %602 = vector.extract_strided_slice %595 {offsets = [0, 64], sizes = [8, 32], strides = [1, 1]} : vector<8x128xf32> to vector<8x32xf32>
    %603 = vector.extract_strided_slice %599 {offsets = [0, 96], sizes = [8, 32], strides = [1, 1]} : vector<8x128xf32> to vector<8x32xf32>
    %604 = arith.mulf %601, %587 : vector<8x32xf32>
    %605 = arith.mulf %600, %602 : vector<8x32xf32>
    %606 = arith.addf %604, %605 : vector<8x32xf32>
    %607 = math.tanh %606 : vector<8x32xf32>
    %608 = arith.mulf %603, %607 : vector<8x32xf32>
    %c32_248 = arith.constant 32 : index
    %c0_249 = arith.constant 0 : index
    %609 = vector.load %arg9[%c32_248, %c0_249] : memref<64x32xf32, #tpu.memory_space<vmem>>, vector<8x32xf32>
    tpu.vector_store %arg9[%c32_248, %c0_249], %608 {strides = array<i32>} : memref<64x32xf32, #tpu.memory_space<vmem>>, vector<8x32xf32>,
    %c40_250 = arith.constant 40 : index
    %c0_251 = arith.constant 0 : index
    %610 = vector.load %arg8[%c40_250, %c0_251] : memref<64x128xf32, #tpu.memory_space<vmem>>, vector<8x128xf32>
    %611 = arith.truncf %608 : vector<8x32xf32> to vector<8x32xbf16>
    %cst_252 = arith.constant dense<0.000000e+00> : vector<8x128xf32>
    %612 = tpu.matmul %611, %502, %cst_252 {dimension_numbers = #tpu.dot_dimension_numbers<[1], [0], [0], [1], [0, 0, 1, 1], [], []>} : vector<8x32xbf16>, vector<32x128xbf16>, vector<8x128xf32> -> vector<8x128xf32>
    %613 = arith.addf %610, %612 : vector<8x128xf32>
    %614 = math.tanh %613 : vector<8x128xf32>
    %cst_253 = arith.constant 5.000000e-01 : f32
    %615 = vector.broadcast %cst_253 : f32 to vector<8x128xf32>
    %616 = arith.mulf %615, %614 : vector<8x128xf32>
    %cst_254 = arith.constant 5.000000e-01 : f32
    %617 = vector.broadcast %cst_254 : f32 to vector<8x128xf32>
    %618 = arith.addf %616, %617 : vector<8x128xf32>
    %619 = vector.extract_strided_slice %618 {offsets = [0, 0], sizes = [8, 32], strides = [1, 1]} : vector<8x128xf32> to vector<8x32xf32>
    %620 = vector.extract_strided_slice %618 {offsets = [0, 32], sizes = [8, 32], strides = [1, 1]} : vector<8x128xf32> to vector<8x32xf32>
    %621 = vector.extract_strided_slice %614 {offsets = [0, 64], sizes = [8, 32], strides = [1, 1]} : vector<8x128xf32> to vector<8x32xf32>
    %622 = vector.extract_strided_slice %618 {offsets = [0, 96], sizes = [8, 32], strides = [1, 1]} : vector<8x128xf32> to vector<8x32xf32>
    %623 = arith.mulf %620, %606 : vector<8x32xf32>
    %624 = arith.mulf %619, %621 : vector<8x32xf32>
    %625 = arith.addf %623, %624 : vector<8x32xf32>
    %626 = math.tanh %625 : vector<8x32xf32>
    %627 = arith.mulf %622, %626 : vector<8x32xf32>
    %c40_255 = arith.constant 40 : index
    %c0_256 = arith.constant 0 : index
    %628 = vector.load %arg9[%c40_255, %c0_256] : memref<64x32xf32, #tpu.memory_space<vmem>>, vector<8x32xf32>
    tpu.vector_store %arg9[%c40_255, %c0_256], %627 {strides = array<i32>} : memref<64x32xf32, #tpu.memory_space<vmem>>, vector<8x32xf32>,
    %c48_257 = arith.constant 48 : index
    %c0_258 = arith.constant 0 : index
    %629 = vector.load %arg8[%c48_257, %c0_258] : memref<64x128xf32, #tpu.memory_space<vmem>>, vector<8x128xf32>
    %630 = arith.truncf %627 : vector<8x32xf32> to vector<8x32xbf16>
    %cst_259 = arith.constant dense<0.000000e+00> : vector<8x128xf32>
    %631 = tpu.matmul %630, %502, %cst_259 {dimension_numbers = #tpu.dot_dimension_numbers<[1], [0], [0], [1], [0, 0, 1, 1], [], []>} : vector<8x32xbf16>, vector<32x128xbf16>, vector<8x128xf32> -> vector<8x128xf32>
    %632 = arith.addf %629, %631 : vector<8x128xf32>
    %633 = math.tanh %632 : vector<8x128xf32>
    %cst_260 = arith.constant 5.000000e-01 : f32
    %634 = vector.broadcast %cst_260 : f32 to vector<8x128xf32>
    %635 = arith.mulf %634, %633 : vector<8x128xf32>
    %cst_261 = arith.constant 5.000000e-01 : f32
    %636 = vector.broadcast %cst_261 : f32 to vector<8x128xf32>
    %637 = arith.addf %635, %636 : vector<8x128xf32>
    %638 = vector.extract_strided_slice %637 {offsets = [0, 0], sizes = [8, 32], strides = [1, 1]} : vector<8x128xf32> to vector<8x32xf32>
    %639 = vector.extract_strided_slice %637 {offsets = [0, 32], sizes = [8, 32], strides = [1, 1]} : vector<8x128xf32> to vector<8x32xf32>
    %640 = vector.extract_strided_slice %633 {offsets = [0, 64], sizes = [8, 32], strides = [1, 1]} : vector<8x128xf32> to vector<8x32xf32>
    %641 = vector.extract_strided_slice %637 {offsets = [0, 96], sizes = [8, 32], strides = [1, 1]} : vector<8x128xf32> to vector<8x32xf32>
    %642 = arith.mulf %639, %625 : vector<8x32xf32>
    %643 = arith.mulf %638, %640 : vector<8x32xf32>
    %644 = arith.addf %642, %643 : vector<8x32xf32>
    %645 = math.tanh %644 : vector<8x32xf32>
    %646 = arith.mulf %641, %645 : vector<8x32xf32>
    %c48_262 = arith.constant 48 : index
    %c0_263 = arith.constant 0 : index
    %647 = vector.load %arg9[%c48_262, %c0_263] : memref<64x32xf32, #tpu.memory_space<vmem>>, vector<8x32xf32>
    tpu.vector_store %arg9[%c48_262, %c0_263], %646 {strides = array<i32>} : memref<64x32xf32, #tpu.memory_space<vmem>>, vector<8x32xf32>,
    %c56_264 = arith.constant 56 : index
    %c0_265 = arith.constant 0 : index
    %648 = vector.load %arg8[%c56_264, %c0_265] : memref<64x128xf32, #tpu.memory_space<vmem>>, vector<8x128xf32>
    %649 = arith.truncf %646 : vector<8x32xf32> to vector<8x32xbf16>
    %cst_266 = arith.constant dense<0.000000e+00> : vector<8x128xf32>
    %650 = tpu.matmul %649, %502, %cst_266 {dimension_numbers = #tpu.dot_dimension_numbers<[1], [0], [0], [1], [0, 0, 1, 1], [], []>} : vector<8x32xbf16>, vector<32x128xbf16>, vector<8x128xf32> -> vector<8x128xf32>
    %651 = arith.addf %648, %650 : vector<8x128xf32>
    %652 = math.tanh %651 : vector<8x128xf32>
    %cst_267 = arith.constant 5.000000e-01 : f32
    %653 = vector.broadcast %cst_267 : f32 to vector<8x128xf32>
    %654 = arith.mulf %653, %652 : vector<8x128xf32>
    %cst_268 = arith.constant 5.000000e-01 : f32
    %655 = vector.broadcast %cst_268 : f32 to vector<8x128xf32>
    %656 = arith.addf %654, %655 : vector<8x128xf32>
    %657 = vector.extract_strided_slice %656 {offsets = [0, 0], sizes = [8, 32], strides = [1, 1]} : vector<8x128xf32> to vector<8x32xf32>
    %658 = vector.extract_strided_slice %656 {offsets = [0, 32], sizes = [8, 32], strides = [1, 1]} : vector<8x128xf32> to vector<8x32xf32>
    %659 = vector.extract_strided_slice %652 {offsets = [0, 64], sizes = [8, 32], strides = [1, 1]} : vector<8x128xf32> to vector<8x32xf32>
    %660 = vector.extract_strided_slice %656 {offsets = [0, 96], sizes = [8, 32], strides = [1, 1]} : vector<8x128xf32> to vector<8x32xf32>
    %661 = arith.mulf %658, %644 : vector<8x32xf32>
    %662 = arith.mulf %657, %659 : vector<8x32xf32>
    %663 = arith.addf %661, %662 : vector<8x32xf32>
    %664 = math.tanh %663 : vector<8x32xf32>
    %665 = arith.mulf %660, %664 : vector<8x32xf32>
    %c56_269 = arith.constant 56 : index
    %c0_270 = arith.constant 0 : index
    %666 = vector.load %arg9[%c56_269, %c0_270] : memref<64x32xf32, #tpu.memory_space<vmem>>, vector<8x32xf32>
    tpu.vector_store %arg9[%c56_269, %c0_270], %665 {strides = array<i32>} : memref<64x32xf32, #tpu.memory_space<vmem>>, vector<8x32xf32>,
    %c4 = arith.constant 4 : index
    %c0_271 = arith.constant 0 : index
    %c0_272 = arith.constant 0 : index
    %667 = vector.load %arg3[%c4, %c0_271, %c0_272] : memref<5x32x128xf32, #tpu.memory_space<vmem>>, vector<1x32x128xf32>
    %668 = vector.shape_cast %667 : vector<1x32x128xf32> to vector<32x128xf32>
    %669 = arith.truncf %668 : vector<32x128xf32> to vector<32x128xbf16>
    %c4_273 = arith.constant 4 : index
    %c0_274 = arith.constant 0 : index
    %670 = vector.load %arg4[%c4_273, %c0_274] : memref<5x128xf32, #tpu.memory_space<vmem>>, vector<1x128xf32>
    %c0_275 = arith.constant 0 : index
    %c0_276 = arith.constant 0 : index
    %671 = vector.load %arg9[%c0_275, %c0_276] : memref<64x32xf32, #tpu.memory_space<vmem>>, vector<64x32xf32>
    %c3_277 = arith.constant 3 : index
    %c0_278 = arith.constant 0 : index
    %c0_279 = arith.constant 0 : index
    %672 = vector.load %arg2[%c3_277, %c0_278, %c0_279] : memref<4x32x128xf32, #tpu.memory_space<vmem>>, vector<1x32x128xf32>
    %673 = vector.shape_cast %672 : vector<1x32x128xf32> to vector<32x128xf32>
    %674 = arith.truncf %671 : vector<64x32xf32> to vector<64x32xbf16>
    %675 = arith.truncf %673 : vector<32x128xf32> to vector<32x128xbf16>
    %cst_280 = arith.constant dense<0.000000e+00> : vector<64x128xf32>
    %676 = tpu.matmul %674, %675, %cst_280 {dimension_numbers = #tpu.dot_dimension_numbers<[1], [0], [0], [1], [0, 0, 1, 1], [], []>} : vector<64x32xbf16>, vector<32x128xbf16>, vector<64x128xf32> -> vector<64x128xf32>
    %677 = vector.broadcast %670 : vector<1x128xf32> to vector<64x128xf32>
    %678 = arith.addf %676, %677 : vector<64x128xf32>
    %c0_281 = arith.constant 0 : index
    %c0_282 = arith.constant 0 : index
    %679 = vector.load %arg8[%c0_281, %c0_282] : memref<64x128xf32, #tpu.memory_space<vmem>>, vector<64x128xf32>
    tpu.vector_store %arg8[%c0_281, %c0_282], %678 {strides = array<i32>} : memref<64x128xf32, #tpu.memory_space<vmem>>, vector<64x128xf32>,
    %cst_283 = arith.constant 0.000000e+00 : f32
    %680 = vector.broadcast %cst_283 : f32 to vector<8x32xf32>
    %cst_284 = arith.constant 0.000000e+00 : f32
    %681 = vector.broadcast %cst_284 : f32 to vector<8x32xf32>
    %c0_285 = arith.constant 0 : index
    %c0_286 = arith.constant 0 : index
    %682 = vector.load %arg8[%c0_285, %c0_286] : memref<64x128xf32, #tpu.memory_space<vmem>>, vector<8x128xf32>
    %683 = arith.truncf %680 : vector<8x32xf32> to vector<8x32xbf16>
    %cst_287 = arith.constant dense<0.000000e+00> : vector<8x128xf32>
    %684 = tpu.matmul %683, %669, %cst_287 {dimension_numbers = #tpu.dot_dimension_numbers<[1], [0], [0], [1], [0, 0, 1, 1], [], []>} : vector<8x32xbf16>, vector<32x128xbf16>, vector<8x128xf32> -> vector<8x128xf32>
    %685 = arith.addf %682, %684 : vector<8x128xf32>
    %686 = math.tanh %685 : vector<8x128xf32>
    %cst_288 = arith.constant 5.000000e-01 : f32
    %687 = vector.broadcast %cst_288 : f32 to vector<8x128xf32>
    %688 = arith.mulf %687, %686 : vector<8x128xf32>
    %cst_289 = arith.constant 5.000000e-01 : f32
    %689 = vector.broadcast %cst_289 : f32 to vector<8x128xf32>
    %690 = arith.addf %688, %689 : vector<8x128xf32>
    %691 = vector.extract_strided_slice %690 {offsets = [0, 0], sizes = [8, 32], strides = [1, 1]} : vector<8x128xf32> to vector<8x32xf32>
    %692 = vector.extract_strided_slice %690 {offsets = [0, 32], sizes = [8, 32], strides = [1, 1]} : vector<8x128xf32> to vector<8x32xf32>
    %693 = vector.extract_strided_slice %686 {offsets = [0, 64], sizes = [8, 32], strides = [1, 1]} : vector<8x128xf32> to vector<8x32xf32>
    %694 = vector.extract_strided_slice %690 {offsets = [0, 96], sizes = [8, 32], strides = [1, 1]} : vector<8x128xf32> to vector<8x32xf32>
    %695 = arith.mulf %692, %681 : vector<8x32xf32>
    %696 = arith.mulf %691, %693 : vector<8x32xf32>
    %697 = arith.addf %695, %696 : vector<8x32xf32>
    %698 = math.tanh %697 : vector<8x32xf32>
    %699 = arith.mulf %694, %698 : vector<8x32xf32>
    %c8_290 = arith.constant 8 : index
    %c0_291 = arith.constant 0 : index
    %700 = vector.load %arg8[%c8_290, %c0_291] : memref<64x128xf32, #tpu.memory_space<vmem>>, vector<8x128xf32>
    %701 = arith.truncf %699 : vector<8x32xf32> to vector<8x32xbf16>
    %cst_292 = arith.constant dense<0.000000e+00> : vector<8x128xf32>
    %702 = tpu.matmul %701, %669, %cst_292 {dimension_numbers = #tpu.dot_dimension_numbers<[1], [0], [0], [1], [0, 0, 1, 1], [], []>} : vector<8x32xbf16>, vector<32x128xbf16>, vector<8x128xf32> -> vector<8x128xf32>
    %703 = arith.addf %700, %702 : vector<8x128xf32>
    %704 = math.tanh %703 : vector<8x128xf32>
    %cst_293 = arith.constant 5.000000e-01 : f32
    %705 = vector.broadcast %cst_293 : f32 to vector<8x128xf32>
    %706 = arith.mulf %705, %704 : vector<8x128xf32>
    %cst_294 = arith.constant 5.000000e-01 : f32
    %707 = vector.broadcast %cst_294 : f32 to vector<8x128xf32>
    %708 = arith.addf %706, %707 : vector<8x128xf32>
    %709 = vector.extract_strided_slice %708 {offsets = [0, 0], sizes = [8, 32], strides = [1, 1]} : vector<8x128xf32> to vector<8x32xf32>
    %710 = vector.extract_strided_slice %708 {offsets = [0, 32], sizes = [8, 32], strides = [1, 1]} : vector<8x128xf32> to vector<8x32xf32>
    %711 = vector.extract_strided_slice %704 {offsets = [0, 64], sizes = [8, 32], strides = [1, 1]} : vector<8x128xf32> to vector<8x32xf32>
    %712 = vector.extract_strided_slice %708 {offsets = [0, 96], sizes = [8, 32], strides = [1, 1]} : vector<8x128xf32> to vector<8x32xf32>
    %713 = arith.mulf %710, %697 : vector<8x32xf32>
    %714 = arith.mulf %709, %711 : vector<8x32xf32>
    %715 = arith.addf %713, %714 : vector<8x32xf32>
    %716 = math.tanh %715 : vector<8x32xf32>
    %717 = arith.mulf %712, %716 : vector<8x32xf32>
    %c16_295 = arith.constant 16 : index
    %c0_296 = arith.constant 0 : index
    %718 = vector.load %arg8[%c16_295, %c0_296] : memref<64x128xf32, #tpu.memory_space<vmem>>, vector<8x128xf32>
    %719 = arith.truncf %717 : vector<8x32xf32> to vector<8x32xbf16>
    %cst_297 = arith.constant dense<0.000000e+00> : vector<8x128xf32>
    %720 = tpu.matmul %719, %669, %cst_297 {dimension_numbers = #tpu.dot_dimension_numbers<[1], [0], [0], [1], [0, 0, 1, 1], [], []>} : vector<8x32xbf16>, vector<32x128xbf16>, vector<8x128xf32> -> vector<8x128xf32>
    %721 = arith.addf %718, %720 : vector<8x128xf32>
    %722 = math.tanh %721 : vector<8x128xf32>
    %cst_298 = arith.constant 5.000000e-01 : f32
    %723 = vector.broadcast %cst_298 : f32 to vector<8x128xf32>
    %724 = arith.mulf %723, %722 : vector<8x128xf32>
    %cst_299 = arith.constant 5.000000e-01 : f32
    %725 = vector.broadcast %cst_299 : f32 to vector<8x128xf32>
    %726 = arith.addf %724, %725 : vector<8x128xf32>
    %727 = vector.extract_strided_slice %726 {offsets = [0, 0], sizes = [8, 32], strides = [1, 1]} : vector<8x128xf32> to vector<8x32xf32>
    %728 = vector.extract_strided_slice %726 {offsets = [0, 32], sizes = [8, 32], strides = [1, 1]} : vector<8x128xf32> to vector<8x32xf32>
    %729 = vector.extract_strided_slice %722 {offsets = [0, 64], sizes = [8, 32], strides = [1, 1]} : vector<8x128xf32> to vector<8x32xf32>
    %730 = vector.extract_strided_slice %726 {offsets = [0, 96], sizes = [8, 32], strides = [1, 1]} : vector<8x128xf32> to vector<8x32xf32>
    %731 = arith.mulf %728, %715 : vector<8x32xf32>
    %732 = arith.mulf %727, %729 : vector<8x32xf32>
    %733 = arith.addf %731, %732 : vector<8x32xf32>
    %734 = math.tanh %733 : vector<8x32xf32>
    %735 = arith.mulf %730, %734 : vector<8x32xf32>
    %c24_300 = arith.constant 24 : index
    %c0_301 = arith.constant 0 : index
    %736 = vector.load %arg8[%c24_300, %c0_301] : memref<64x128xf32, #tpu.memory_space<vmem>>, vector<8x128xf32>
    %737 = arith.truncf %735 : vector<8x32xf32> to vector<8x32xbf16>
    %cst_302 = arith.constant dense<0.000000e+00> : vector<8x128xf32>
    %738 = tpu.matmul %737, %669, %cst_302 {dimension_numbers = #tpu.dot_dimension_numbers<[1], [0], [0], [1], [0, 0, 1, 1], [], []>} : vector<8x32xbf16>, vector<32x128xbf16>, vector<8x128xf32> -> vector<8x128xf32>
    %739 = arith.addf %736, %738 : vector<8x128xf32>
    %740 = math.tanh %739 : vector<8x128xf32>
    %cst_303 = arith.constant 5.000000e-01 : f32
    %741 = vector.broadcast %cst_303 : f32 to vector<8x128xf32>
    %742 = arith.mulf %741, %740 : vector<8x128xf32>
    %cst_304 = arith.constant 5.000000e-01 : f32
    %743 = vector.broadcast %cst_304 : f32 to vector<8x128xf32>
    %744 = arith.addf %742, %743 : vector<8x128xf32>
    %745 = vector.extract_strided_slice %744 {offsets = [0, 0], sizes = [8, 32], strides = [1, 1]} : vector<8x128xf32> to vector<8x32xf32>
    %746 = vector.extract_strided_slice %744 {offsets = [0, 32], sizes = [8, 32], strides = [1, 1]} : vector<8x128xf32> to vector<8x32xf32>
    %747 = vector.extract_strided_slice %740 {offsets = [0, 64], sizes = [8, 32], strides = [1, 1]} : vector<8x128xf32> to vector<8x32xf32>
    %748 = vector.extract_strided_slice %744 {offsets = [0, 96], sizes = [8, 32], strides = [1, 1]} : vector<8x128xf32> to vector<8x32xf32>
    %749 = arith.mulf %746, %733 : vector<8x32xf32>
    %750 = arith.mulf %745, %747 : vector<8x32xf32>
    %751 = arith.addf %749, %750 : vector<8x32xf32>
    %752 = math.tanh %751 : vector<8x32xf32>
    %753 = arith.mulf %748, %752 : vector<8x32xf32>
    %c32_305 = arith.constant 32 : index
    %c0_306 = arith.constant 0 : index
    %754 = vector.load %arg8[%c32_305, %c0_306] : memref<64x128xf32, #tpu.memory_space<vmem>>, vector<8x128xf32>
    %755 = arith.truncf %753 : vector<8x32xf32> to vector<8x32xbf16>
    %cst_307 = arith.constant dense<0.000000e+00> : vector<8x128xf32>
    %756 = tpu.matmul %755, %669, %cst_307 {dimension_numbers = #tpu.dot_dimension_numbers<[1], [0], [0], [1], [0, 0, 1, 1], [], []>} : vector<8x32xbf16>, vector<32x128xbf16>, vector<8x128xf32> -> vector<8x128xf32>
    %757 = arith.addf %754, %756 : vector<8x128xf32>
    %758 = math.tanh %757 : vector<8x128xf32>
    %cst_308 = arith.constant 5.000000e-01 : f32
    %759 = vector.broadcast %cst_308 : f32 to vector<8x128xf32>
    %760 = arith.mulf %759, %758 : vector<8x128xf32>
    %cst_309 = arith.constant 5.000000e-01 : f32
    %761 = vector.broadcast %cst_309 : f32 to vector<8x128xf32>
    %762 = arith.addf %760, %761 : vector<8x128xf32>
    %763 = vector.extract_strided_slice %762 {offsets = [0, 0], sizes = [8, 32], strides = [1, 1]} : vector<8x128xf32> to vector<8x32xf32>
    %764 = vector.extract_strided_slice %762 {offsets = [0, 32], sizes = [8, 32], strides = [1, 1]} : vector<8x128xf32> to vector<8x32xf32>
    %765 = vector.extract_strided_slice %758 {offsets = [0, 64], sizes = [8, 32], strides = [1, 1]} : vector<8x128xf32> to vector<8x32xf32>
    %766 = vector.extract_strided_slice %762 {offsets = [0, 96], sizes = [8, 32], strides = [1, 1]} : vector<8x128xf32> to vector<8x32xf32>
    %767 = arith.mulf %764, %751 : vector<8x32xf32>
    %768 = arith.mulf %763, %765 : vector<8x32xf32>
    %769 = arith.addf %767, %768 : vector<8x32xf32>
    %770 = math.tanh %769 : vector<8x32xf32>
    %771 = arith.mulf %766, %770 : vector<8x32xf32>
    %c40_310 = arith.constant 40 : index
    %c0_311 = arith.constant 0 : index
    %772 = vector.load %arg8[%c40_310, %c0_311] : memref<64x128xf32, #tpu.memory_space<vmem>>, vector<8x128xf32>
    %773 = arith.truncf %771 : vector<8x32xf32> to vector<8x32xbf16>
    %cst_312 = arith.constant dense<0.000000e+00> : vector<8x128xf32>
    %774 = tpu.matmul %773, %669, %cst_312 {dimension_numbers = #tpu.dot_dimension_numbers<[1], [0], [0], [1], [0, 0, 1, 1], [], []>} : vector<8x32xbf16>, vector<32x128xbf16>, vector<8x128xf32> -> vector<8x128xf32>
    %775 = arith.addf %772, %774 : vector<8x128xf32>
    %776 = math.tanh %775 : vector<8x128xf32>
    %cst_313 = arith.constant 5.000000e-01 : f32
    %777 = vector.broadcast %cst_313 : f32 to vector<8x128xf32>
    %778 = arith.mulf %777, %776 : vector<8x128xf32>
    %cst_314 = arith.constant 5.000000e-01 : f32
    %779 = vector.broadcast %cst_314 : f32 to vector<8x128xf32>
    %780 = arith.addf %778, %779 : vector<8x128xf32>
    %781 = vector.extract_strided_slice %780 {offsets = [0, 0], sizes = [8, 32], strides = [1, 1]} : vector<8x128xf32> to vector<8x32xf32>
    %782 = vector.extract_strided_slice %780 {offsets = [0, 32], sizes = [8, 32], strides = [1, 1]} : vector<8x128xf32> to vector<8x32xf32>
    %783 = vector.extract_strided_slice %776 {offsets = [0, 64], sizes = [8, 32], strides = [1, 1]} : vector<8x128xf32> to vector<8x32xf32>
    %784 = vector.extract_strided_slice %780 {offsets = [0, 96], sizes = [8, 32], strides = [1, 1]} : vector<8x128xf32> to vector<8x32xf32>
    %785 = arith.mulf %782, %769 : vector<8x32xf32>
    %786 = arith.mulf %781, %783 : vector<8x32xf32>
    %787 = arith.addf %785, %786 : vector<8x32xf32>
    %788 = math.tanh %787 : vector<8x32xf32>
    %789 = arith.mulf %784, %788 : vector<8x32xf32>
    %c48_315 = arith.constant 48 : index
    %c0_316 = arith.constant 0 : index
    %790 = vector.load %arg8[%c48_315, %c0_316] : memref<64x128xf32, #tpu.memory_space<vmem>>, vector<8x128xf32>
    %791 = arith.truncf %789 : vector<8x32xf32> to vector<8x32xbf16>
    %cst_317 = arith.constant dense<0.000000e+00> : vector<8x128xf32>
    %792 = tpu.matmul %791, %669, %cst_317 {dimension_numbers = #tpu.dot_dimension_numbers<[1], [0], [0], [1], [0, 0, 1, 1], [], []>} : vector<8x32xbf16>, vector<32x128xbf16>, vector<8x128xf32> -> vector<8x128xf32>
    %793 = arith.addf %790, %792 : vector<8x128xf32>
    %794 = math.tanh %793 : vector<8x128xf32>
    %cst_318 = arith.constant 5.000000e-01 : f32
    %795 = vector.broadcast %cst_318 : f32 to vector<8x128xf32>
    %796 = arith.mulf %795, %794 : vector<8x128xf32>
    %cst_319 = arith.constant 5.000000e-01 : f32
    %797 = vector.broadcast %cst_319 : f32 to vector<8x128xf32>
    %798 = arith.addf %796, %797 : vector<8x128xf32>
    %799 = vector.extract_strided_slice %798 {offsets = [0, 0], sizes = [8, 32], strides = [1, 1]} : vector<8x128xf32> to vector<8x32xf32>
    %800 = vector.extract_strided_slice %798 {offsets = [0, 32], sizes = [8, 32], strides = [1, 1]} : vector<8x128xf32> to vector<8x32xf32>
    %801 = vector.extract_strided_slice %794 {offsets = [0, 64], sizes = [8, 32], strides = [1, 1]} : vector<8x128xf32> to vector<8x32xf32>
    %802 = vector.extract_strided_slice %798 {offsets = [0, 96], sizes = [8, 32], strides = [1, 1]} : vector<8x128xf32> to vector<8x32xf32>
    %803 = arith.mulf %800, %787 : vector<8x32xf32>
    %804 = arith.mulf %799, %801 : vector<8x32xf32>
    %805 = arith.addf %803, %804 : vector<8x32xf32>
    %806 = math.tanh %805 : vector<8x32xf32>
    %807 = arith.mulf %802, %806 : vector<8x32xf32>
    %c56_320 = arith.constant 56 : index
    %c0_321 = arith.constant 0 : index
    %808 = vector.load %arg8[%c56_320, %c0_321] : memref<64x128xf32, #tpu.memory_space<vmem>>, vector<8x128xf32>
    %809 = arith.truncf %807 : vector<8x32xf32> to vector<8x32xbf16>
    %cst_322 = arith.constant dense<0.000000e+00> : vector<8x128xf32>
    %810 = tpu.matmul %809, %669, %cst_322 {dimension_numbers = #tpu.dot_dimension_numbers<[1], [0], [0], [1], [0, 0, 1, 1], [], []>} : vector<8x32xbf16>, vector<32x128xbf16>, vector<8x128xf32> -> vector<8x128xf32>
    %811 = arith.addf %808, %810 : vector<8x128xf32>
    %812 = math.tanh %811 : vector<8x128xf32>
    %cst_323 = arith.constant 5.000000e-01 : f32
    %813 = vector.broadcast %cst_323 : f32 to vector<8x128xf32>
    %814 = arith.mulf %813, %812 : vector<8x128xf32>
    %cst_324 = arith.constant 5.000000e-01 : f32
    %815 = vector.broadcast %cst_324 : f32 to vector<8x128xf32>
    %816 = arith.addf %814, %815 : vector<8x128xf32>
    %817 = vector.extract_strided_slice %816 {offsets = [0, 0], sizes = [8, 32], strides = [1, 1]} : vector<8x128xf32> to vector<8x32xf32>
    %818 = vector.extract_strided_slice %816 {offsets = [0, 32], sizes = [8, 32], strides = [1, 1]} : vector<8x128xf32> to vector<8x32xf32>
    %819 = vector.extract_strided_slice %812 {offsets = [0, 64], sizes = [8, 32], strides = [1, 1]} : vector<8x128xf32> to vector<8x32xf32>
    %820 = vector.extract_strided_slice %816 {offsets = [0, 96], sizes = [8, 32], strides = [1, 1]} : vector<8x128xf32> to vector<8x32xf32>
    %821 = arith.mulf %818, %805 : vector<8x32xf32>
    %822 = arith.mulf %817, %819 : vector<8x32xf32>
    %823 = arith.addf %821, %822 : vector<8x32xf32>
    %824 = math.tanh %823 : vector<8x32xf32>
    %825 = arith.mulf %820, %824 : vector<8x32xf32>
    %c0_325 = arith.constant 0 : index
    %c0_326 = arith.constant 0 : index
    %826 = vector.load %arg5[%c0_325, %c0_326] : memref<32x4xf32, #tpu.memory_space<vmem>>, vector<32x4xf32>
    %cst_327 = arith.constant dense<0.000000e+00> : vector<8x4xf32>
    %827 = tpu.matmul %825, %826, %cst_327 {dimension_numbers = #tpu.dot_dimension_numbers<[1], [0], [0], [1], [0, 0, 1, 1], [], []>} : vector<8x32xf32>, vector<32x4xf32>, vector<8x4xf32> -> vector<8x4xf32>
    %c0_328 = arith.constant 0 : index
    %c0_329 = arith.constant 0 : index
    %828 = vector.load %arg6[%c0_328, %c0_329] : memref<1x4xf32, #tpu.memory_space<vmem>>, vector<1x4xf32>
    %829 = vector.broadcast %828 : vector<1x4xf32> to vector<8x4xf32>
    %830 = arith.addf %827, %829 : vector<8x4xf32>
    %831 = arith.negf %830 : vector<8x4xf32>
    %832 = math.exp %831 : vector<8x4xf32>
    %cst_330 = arith.constant 1.000000e+00 : f32
    %833 = vector.broadcast %cst_330 : f32 to vector<8x4xf32>
    %834 = arith.addf %833, %832 : vector<8x4xf32>
    %835 = arith.divf %833, %834 : vector<8x4xf32>
    %c0_331 = arith.constant 0 : index
    %c0_332 = arith.constant 0 : index
    %836 = vector.load %arg7[%c0_331, %c0_332] : memref<8x4xf32, #tpu.memory_space<vmem>>, vector<8x4xf32>
    tpu.vector_store %arg7[%c0_331, %c0_332], %835 {strides = array<i32>} : memref<8x4xf32, #tpu.memory_space<vmem>>, vector<8x4xf32>,
    return
  }
}

</mosaic_0001>

<bundles_post_ra>
// kernel: _hids_forward.1
= control target key start
LH: loop header
LB: loop body
LE: loop exit
PB: predicated region body
PF: predicated region fallthrough
CT: control target
= control target key end

     0   :  { %v4409_v3 = vmov 0.0   ;;  %vm4410_vm0 = vmmov 0   ;;  %vm68_vm1 = vcmask 1043456   ;;  %vm55_vm2 = vcmask 195584   ;;  %s4412_s24 = smov 64   ;;  %s4413_s25 = smov 32   ;;  %s5468_s1 = inlined_call_operand.vmem [shape: f32[24,128], index: 1, kind: input, shape index: {}]   ;;  %s5469_s3 = inlined_call_operand.vmem [shape: f32[5,32,128], index: 3, kind: input, shape index: {}]   ;;  %s5470_s0 = inlined_call_operand.vmem [shape: f32[64,24], index: 0, kind: input, shape index: {}]   ;;  %s5471_s4 = inlined_call_operand.vmem [shape: f32[5,128], index: 4, kind: input, shape index: {}]   ;;  %s5472_s2 = inlined_call_operand.vmem [shape: f32[4,32,128], index: 2, kind: input, shape index: {}]   ;;  %s5473_s5 = inlined_call_operand.vmem [shape: f32[32,4], index: 5, kind: input, shape index: {}]   ;;  %s5474_s6 = inlined_call_operand.vmem [shape: f32[1,4], index: 6, kind: input, shape index: {}]   ;;  %s5475_s7 = inlined_call_operand.vmem [shape: f32[8,4], index: 7, kind: output, shape index: {}]  }
   0x1   :  { %v42_v0 = vld [vmem:[%s5468_s1] sm:$0xff]  ;;  %v43_v1 = vld [vmem:[%s5468_s1 + $0x8] sm:$0xff]  ;;  %v44_v2 = vld [vmem:[%s5468_s1 + $0x10] sm:$0xff]  ;;  %3853 = vmatprep.subr.bf16.mxu1 %v4409_v3  ;;  %3857 = vmatprep.mubr.msk.bf16.mxu1 %vm4410_vm0, %v4409_v3  ;;  %v4411_v19 = vmov 0   ;;  %vm146_vm3 = vcmask 261120   ;;  %vm3589_vm4 = vcmask 31744  }
   0x2   :  { %v49_v4 = vpack.c.bf16 %v43_v1, %v42_v0  ;;  %v50_v5 = vpack.c.bf16 %v44_v2, %v44_v2  ;;  %v27_v6 = vld [vmem:[%s5469_s3] sm:$0xff]  ;;  %v28_v7 = vld [vmem:[%s5469_s3 + $0x8] sm:$0xff]  ;;  %v29_v8 = vld [vmem:[%s5469_s3 + $0x10] sm:$0xff] }
   0x3   :  { %v4476_v9 = vpack.c.bf16 %v28_v7, %v27_v6  ;;  %v30_v10 = vld [vmem:[%s5469_s3 + $0x18] sm:$0xff]  ;;  %v34_v11 = vld [vmem:[%s5470_s0] sm:$0xff]  ;;  %v35_v12 = vld [vmem:[%s5470_s0 + $0x8] sm:$0xff] }
   0x4   :  { %3841 = vmatprep.subr.bf16.mxu0 %v49_v4  ;;  %v45_v13 = vpack.c.bf16 %v35_v12, %v34_v11  ;;  %v4488_v14 = vpack.c.bf16 %v30_v10, %v29_v8  ;;  %v36_v15 = vld [vmem:[%s5470_s0 + $0x10] sm:$0xff]  ;;  %v37_v16 = vld [vmem:[%s5470_s0 + $0x18] sm:$0xff]  ;;  %v70_v17 = vsel %vm68_vm1, %v50_v5, 0  ;;  %v4516_v20 = vld [vmem:[%s5471_s4] ss:$0 sm:$0xff] }
   0x5   :  { %3842 = vmatpush3.bf16.msra.mxu0 %v49_v4  ;;  %3854 = vmatpush3.bf16.msra.mxu1 %v4476_v9  ;;  %v46_v18 = vpack.c.bf16 %v37_v16, %v36_v15  ;;  %v38_v58 = vld [vmem:[%s5470_s0 + $0x20] sm:$0xff]  ;;  %v39_v59 = vld [vmem:[%s5470_s0 + $0x28] sm:$0xff]  ;;  %v40_v60 = vld [vmem:[%s5470_s0 + $0x30] sm:$0xff] }
   0x6   :  { %4238 = vmatprep.subr.msk.bf16.mxu0 %vm68_vm1, %v50_v5  ;;  %3855 = vmatprep.subr.bf16.mxu1 %v4409_v3  ;;  %v47_v61 = vpack.c.bf16 %v39_v59, %v38_v58  ;;  %v41_v62 = vld [vmem:[%s5470_s0 + $0x38] sm:$0xff] }
   0x7   :  { %3845 = vmatprep.mubr.msk.bf16.mxu0 %vm55_vm2, %v45_v13  ;;  %v48_v63 = vpack.c.bf16 %v41_v62, %v40_v60 }
   0x9   :  { %3844 = vmatpush3.bf16.msra.mxu0 %v70_v17  ;;  %3856 = vmatpush3.bf16.msra.mxu1 %v4488_v14 }
   0xa   :  { %3861 = vmatprep.subr.bf16.mxu1 %v4409_v3  ;;  %3869 = vmatprep.subr.bf16.mxu0 %v4409_v3 }
   0xc   :  { %3846 = vmatmul.mubr.msk.bf16.vlgmr.msra.gmra.mrb[0].mxu0 %vm55_vm2, %v46_v18  ;;  %3858 = vmatmul.mubr.bf16.vlgmr.msra.gmra.mrb[0].mxu1 %v4411_v19 }
   0xd   :  { %3862 = vmatpush3.bf16.msra.mxu1 %v4476_v9  ;;  %3865 = vmatprep.mubr.msk.bf16.mxu1 %vm4410_vm0, %v4409_v3 }
   0xe   :  { %3863 = vmatprep.subr.bf16.mxu1 %v4409_v3  ;;  %3870 = vmatpush3.bf16.msra.mxu0 %v4476_v9 }
   0xf   :  { %3871 = vmatprep.subr.bf16.mxu0 %v4409_v3  ;;  %3849 = vmatprep.mubr.msk.bf16.mxu0 %vm55_vm2, %v47_v61 }
  0x11   :  { %3864 = vmatpush3.bf16.msra.mxu1 %v4488_v14 }
  0x12   :  { %3872 = vmatpush3.bf16.msra.mxu0 %v4488_v14  ;;  %3877 = vmatprep.subr.bf16.mxu1 %v4409_v3 }
  0x13   :  { %3885 = vmatprep.subr.bf16.mxu0 %v4409_v3 }
  0x14   :  { %3850 = vmatmul.mubr.msk.bf16.gmra.mrb[4].mxu0 %vm55_vm2, %v48_v63 }
  0x15   :  { %3873 = vmatprep.mubr.msk.bf16.mxu0 %vm4410_vm0, %v4409_v3 }
  0xdf   :  { %v4518_v21 = vpop.f32.mrb[0].mxu0  ;;  %v184_v22 = vpop.f32.mrb[0].mxu1 }
  0xe0   :  { %v106_v23 = vpop.f32.mrb[1].mxu0  ;;  %v3859_v24 = vpop.f32.mrb[1].mxu1  ;;  %v115_v11 = vadd.f32 %v4518_v21, %v4516_v20 }
  0xe1   :  { %v107_v25 = vadd.f32 %v4516_v20, %v106_v23  ;;  %v4521_v26 = vpop.f32.mrb[2].mxu0  ;;  %v187_v27 = vpop.f32.mrb[2].mxu1 }
  0xe2   :  { %v109_v28 = vpop.f32.mrb[3].mxu0  ;;  %v3860_v29 = vpop.f32.mrb[3].mxu1 }
  0xe3   :  { %v190_v30 = vadd.f32 %v184_v22, %v107_v25  ;;  %v110_v44 = vadd.f32 %v4516_v20, %v109_v28 }
  0xe5   :  { %4245 = vtanh.f32 %v190_v30 }
  0xe7   :  { %v4563_v5 = vpop.f32.mrb[4].mxu0 }
  0xe8   :  { %v4565_v6 = vpop.f32.mrb[5].mxu0 }
  0xe9   :  { %v4567_v7 = vpop.f32.mrb[6].mxu0 }
  0xea   :  { %v4569_v8 = vpop.f32.mrb[7].mxu0 }
  0xef   :  { %v4246_v31 = vpop.eup %4245 }
  0xf0   :  { %196 = vrot.lane.b32.xlu0 %v4246_v31, %s4412_s24  ;;  %v192_v32 = vmul.f32 0.5, %v4246_v31 }
  0xf2   :  { %v193_v33 = vadd.f32 0.5, %v192_v32 }
  0xf4   :  { %v194_v36 = vmul.f32 0.0, %v193_v33 }
 0x162   :  { %v197_v34 = vpop.permute.xlu0 %196 }
 0x163   :  { %v199_v35 = vmul.f32 %v197_v34, %v193_v33  ;;  %v118_v34 = vadd.f32 %v4521_v26, %v4516_v20 }
 0x165   :  { %201 = vrot.lane.b32.xlu0 %v199_v35, %s4413_s25 }
 0x1d7   :  { %v202_v37 = vpop.permute.xlu0 %201 }
 0x1d8   :  { %v204_v38 = vadd.f32 %v202_v37, %v194_v36 }
 0x1da   :  { %4247 = vtanh.f32 %v204_v38 }
 0x1e4   :  { %v4248_v39 = vpop.eup %4247 }
 0x1e5   :  { %207 = vrot.lane.b32.xlu1 %v4248_v39, %s4412_s24 }
 0x257   :  { %v208_v40 = vpop.permute.xlu1 %207 }
 0x258   :  { %v4526_v41 = vmul.f32 %v208_v40, %v193_v33 }
 0x25a   :  { %v217_v42 = vpack.c.bf16 %v4526_v41, %v4526_v41 }
 0x25c   :  { %219 = vrot.lane.b32.xlu1 %v217_v42, %s4413_s25 }
 0x2ce   :  { %v220_v43 = vpop.permute.xlu1 %219 }
 0x2cf   :  { %3866 = vmatmul.mubr.msk.bf16.vlgmr.msra.gmra.mrb[4].mxu1 %vm146_vm3, %v220_v43 }
 0x2d0   :  { %3878 = vmatpush3.bf16.msra.mxu1 %v4476_v9  ;;  %3881 = vmatprep.mubr.msk.bf16.mxu1 %vm4410_vm0, %v4409_v3 }
 0x2d1   :  { %3879 = vmatprep.subr.bf16.mxu1 %v4409_v3 }
 0x2d4   :  { %3880 = vmatpush3.bf16.msra.mxu1 %v4488_v14 }
 0x2d5   :  { %3893 = vmatprep.subr.bf16.mxu1 %v4409_v3 }
 0x3a2   :  { %v258_v45 = vpop.f32.mrb[4].mxu1 }
 0x3a3   :  { %v264_v46 = vadd.f32 %v258_v45, %v110_v44  ;;  %v3867_v47 = vpop.f32.mrb[5].mxu1 }
 0x3a4   :  { %v261_v48 = vpop.f32.mrb[6].mxu1 }
 0x3a5   :  { %4249 = vtanh.f32 %v264_v46  ;;  %v3868_v49 = vpop.f32.mrb[7].mxu1 }
 0x3af   :  { %v4250_v50 = vpop.eup %4249 }
 0x3b0   :  { %270 = vrot.lane.b32.xlu0 %v4250_v50, %s4412_s24  ;;  %v266_v51 = vmul.f32 0.5, %v4250_v50 }
 0x3b2   :  { %v267_v52 = vadd.f32 0.5, %v266_v51 }
 0x3b4   :  { %v268_v55 = vmul.f32 %v267_v52, %v204_v38 }
 0x422   :  { %v271_v53 = vpop.permute.xlu0 %270 }
 0x423   :  { %v273_v54 = vmul.f32 %v271_v53, %v267_v52  ;;  %v123_v53 = vadd.f32 %v4516_v20, %v4565_v6 }
 0x425   :  { %275 = vrot.lane.b32.xlu1 %v273_v54, %s4413_s25 }
 0x497   :  { %v276_v56 = vpop.permute.xlu1 %275 }
 0x498   :  { %v278_v57 = vadd.f32 %v276_v56, %v268_v55 }
 0x49a   :  { %4251 = vtanh.f32 %v278_v57 }
 0x4a4   :  { %v4252_v0 = vpop.eup %4251 }
 0x4a5   :  { %281 = vrot.lane.b32.xlu0 %v4252_v0, %s4412_s24 }
 0x517   :  { %v282_v1 = vpop.permute.xlu0 %281 }
 0x518   :  { %v4558_v2 = vmul.f32 %v282_v1, %v267_v52 }
 0x51a   :  { %v291_v4 = vpack.c.bf16 %v4558_v2, %v4558_v2 }
 0x51c   :  { %293 = vrot.lane.b32.xlu1 %v291_v4, %s4413_s25 }
 0x58e   :  { %v294_v10 = vpop.permute.xlu1 %293 }
 0x58f   :  { %3874 = vmatmul.mubr.msk.bf16.vlgmr.msra.gmra.mrb[8].mxu0 %vm146_vm3, %v294_v10 }
 0x590   :  { %3886 = vmatpush3.bf16.msra.mxu0 %v4476_v9  ;;  %3889 = vmatprep.mubr.msk.bf16.mxu0 %vm4410_vm0, %v4409_v3 }
 0x591   :  { %3887 = vmatprep.subr.bf16.mxu0 %v4409_v3 }
 0x594   :  { %3888 = vmatpush3.bf16.msra.mxu0 %v4488_v14 }
 0x595   :  { %3901 = vmatprep.subr.bf16.mxu0 %v4409_v3 }
 0x662   :  { %v332_v12 = vpop.f32.mrb[8].mxu0 }
 0x663   :  { %v338_v13 = vadd.f32 %v332_v12, %v115_v11  ;;  %v3875_v15 = vpop.f32.mrb[9].mxu0 }
 0x664   :  { %v335_v16 = vpop.f32.mrb[10].mxu0  ;;  %v126_v15 = vadd.f32 %v4516_v20, %v4569_v8 }
 0x665   :  { %4253 = vtanh.f32 %v338_v13  ;;  %v3876_v17 = vpop.f32.mrb[11].mxu0 }
 0x66f   :  { %v4254_v18 = vpop.eup %4253 }
 0x670   :  { %344 = vrot.lane.b32.xlu0 %v4254_v18, %s4412_s24  ;;  %v340_v22 = vmul.f32 0.5, %v4254_v18 }
 0x672   :  { %v341_v23 = vadd.f32 0.5, %v340_v22 }
 0x674   :  { %v342_v27 = vmul.f32 %v341_v23, %v278_v57 }
 0x6e2   :  { %v345_v24 = vpop.permute.xlu0 %344 }
 0x6e3   :  { %v347_v25 = vmul.f32 %v345_v24, %v341_v23 }
 0x6e5   :  { %349 = vrot.lane.b32.xlu1 %v347_v25, %s4413_s25 }
 0x757   :  { %v350_v28 = vpop.permute.xlu1 %349 }
 0x758   :  { %v352_v29 = vadd.f32 %v350_v28, %v342_v27 }
 0x75a   :  { %4255 = vtanh.f32 %v352_v29 }
 0x764   :  { %v4256_v21 = vpop.eup %4255 }
 0x765   :  { %355 = vrot.lane.b32.xlu0 %v4256_v21, %s4412_s24 }
 0x7d7   :  { %v356_v30 = vpop.permute.xlu0 %355 }
 0x7d8   :  { %v4583_v31 = vmul.f32 %v356_v30, %v341_v23 }
 0x7da   :  { %v365_v32 = vpack.c.bf16 %v4583_v31, %v4583_v31 }
 0x7dc   :  { %367 = vrot.lane.b32.xlu1 %v365_v32, %s4413_s25 }
 0x84e   :  { %v368_v33 = vpop.permute.xlu1 %367 }
 0x84f   :  { %3882 = vmatmul.mubr.msk.bf16.vlgmr.msra.gmra.mrb[8].mxu1 %vm146_vm3, %v368_v33 }
 0x850   :  { %3894 = vmatpush3.bf16.msra.mxu1 %v4476_v9  ;;  %3897 = vmatprep.mubr.msk.bf16.mxu1 %vm4410_vm0, %v4409_v3 }
 0x851   :  { %3895 = vmatprep.subr.bf16.mxu1 %v4409_v3 }
 0x854   :  { %3896 = vmatpush3.bf16.msra.mxu1 %v4488_v14 }
 0x855   :  { %3909 = vmatprep.subr.bf16.mxu1 %v4409_v3 }
 0x922   :  { %v406_v35 = vpop.f32.mrb[8].mxu1 }
 0x923   :  { %v412_v36 = vadd.f32 %v406_v35, %v118_v34  ;;  %v3883_v37 = vpop.f32.mrb[9].mxu1  ;;  %v131_v35 = vadd.f32 %v4563_v5, %v4516_v20 }
 0x924   :  { %v409_v38 = vpop.f32.mrb[10].mxu1 }
 0x925   :  { %4257 = vtanh.f32 %v412_v36  ;;  %v3884_v39 = vpop.f32.mrb[11].mxu1 }
 0x92f   :  { %v4258_v40 = vpop.eup %4257 }
 0x930   :  { %418 = vrot.lane.b32.xlu0 %v4258_v40, %s4412_s24  ;;  %v414_v42 = vmul.f32 0.5, %v4258_v40 }
 0x932   :  { %v415_v43 = vadd.f32 0.5, %v414_v42 }
 0x934   :  { %v416_v46 = vmul.f32 %v415_v43, %v352_v29 }
 0x9a2   :  { %v419_v44 = vpop.permute.xlu0 %418 }
 0x9a3   :  { %v421_v45 = vmul.f32 %v419_v44, %v415_v43 }
 0x9a5   :  { %423 = vrot.lane.b32.xlu1 %v421_v45, %s4413_s25 }
 0xa17   :  { %v424_v47 = vpop.permute.xlu1 %423 }
 0xa18   :  { %v426_v48 = vadd.f32 %v424_v47, %v416_v46 }
 0xa1a   :  { %4259 = vtanh.f32 %v426_v48 }
 0xa24   :  { %v4260_v26 = vpop.eup %4259 }
 0xa25   :  { %429 = vrot.lane.b32.xlu0 %v4260_v26, %s4412_s24 }
 0xa97   :  { %v430_v49 = vpop.permute.xlu0 %429 }
 0xa98   :  { %v4600_v50 = vmul.f32 %v430_v49, %v415_v43 }
 0xa9a   :  { %v439_v51 = vpack.c.bf16 %v4600_v50, %v4600_v50 }
 0xa9c   :  { %441 = vrot.lane.b32.xlu1 %v439_v51, %s4413_s25  ;;  %v750_v51 = vld [vmem:[%s5472_s2] sm:$0xff] }
 0xb0e   :  { %v442_v52 = vpop.permute.xlu1 %441 }
 0xb0f   :  { %3890 = vmatmul.mubr.msk.bf16.vlgmr.msra.gmra.mrb[12].mxu0 %vm146_vm3, %v442_v52  ;;  %v752_v52 = vld [vmem:[%s5472_s2 + $0x10] sm:$0xff] }
 0xb10   :  { %3902 = vmatpush3.bf16.msra.mxu0 %v4476_v9  ;;  %3905 = vmatprep.mubr.msk.bf16.mxu0 %vm4410_vm0, %v4409_v3 }
 0xb11   :  { %3903 = vmatprep.subr.bf16.mxu0 %v4409_v3 }
 0xb14   :  { %3904 = vmatpush3.bf16.msra.mxu0 %v4488_v14 }
 0xbe2   :  { %v480_v54 = vpop.f32.mrb[12].mxu0 }
 0xbe3   :  { %v486_v55 = vadd.f32 %v480_v54, %v123_v53  ;;  %v3891_v56 = vpop.f32.mrb[13].mxu0  ;;  %v753_v53 = vld [vmem:[%s5472_s2 + $0x18] sm:$0xff] }
 0xbe4   :  { %v483_v57 = vpop.f32.mrb[14].mxu0  ;;  %v759_v54 = vpack.c.bf16 %v753_v53, %v752_v52 }
 0xbe5   :  { %4261 = vtanh.f32 %v486_v55  ;;  %v3892_v58 = vpop.f32.mrb[15].mxu0 }
 0xbef   :  { %v4262_v59 = vpop.eup %4261 }
 0xbf0   :  { %492 = vrot.lane.b32.xlu0 %v4262_v59, %s4412_s24  ;;  %v488_v60 = vmul.f32 0.5, %v4262_v59 }
 0xbf2   :  { %v489_v61 = vadd.f32 0.5, %v488_v60 }
 0xbf4   :  { %v490_v0 = vmul.f32 %v489_v61, %v426_v48 }
 0xc62   :  { %v493_v62 = vpop.permute.xlu0 %492 }
 0xc63   :  { %v495_v63 = vmul.f32 %v493_v62, %v489_v61 }
 0xc65   :  { %497 = vrot.lane.b32.xlu1 %v495_v63, %s4413_s25  ;;  %v3608_v63 = vld [vmem:[%s5469_s3 + $0x28] sm:$0xff] }
 0xcd7   :  { %v498_v1 = vpop.permute.xlu1 %497 }
 0xcd8   :  { %v500_v4 = vadd.f32 %v498_v1, %v490_v0 }
 0xcda   :  { %4263 = vtanh.f32 %v500_v4 }
 0xce4   :  { %v4264_v6 = vpop.eup %4263 }
 0xce5   :  { %503 = vrot.lane.b32.xlu0 %v4264_v6, %s4412_s24 }
 0xd57   :  { %v504_v10 = vpop.permute.xlu0 %503 }
 0xd58   :  { %v4616_v11 = vmul.f32 %v504_v10, %v489_v61  ;;  %v3609_v10 = vld [vmem:[%s5469_s3 + $0x30] sm:$0xff] }
 0xd5a   :  { %v513_v12 = vpack.c.bf16 %v4616_v11, %v4616_v11 }
 0xd5c   :  { %515 = vrot.lane.b32.xlu1 %v513_v12, %s4413_s25  ;;  %v3610_v12 = vld [vmem:[%s5469_s3 + $0x38] sm:$0xff] }
 0xdce   :  { %v516_v13 = vpop.permute.xlu1 %515 }
 0xdcf   :  { %3898 = vmatmul.mubr.msk.bf16.vlgmr.msra.gmra.mrb[12].mxu1 %vm146_vm3, %v516_v13  ;;  %v4695_v13 = vpack.c.bf16 %v3610_v12, %v3609_v10 }
 0xdd0   :  { %3910 = vmatpush3.bf16.msra.mxu1 %v4476_v9  ;;  %3913 = vmatprep.mubr.msk.bf16.mxu1 %vm4410_vm0, %v4409_v3 }
 0xdd1   :  { %3911 = vmatprep.subr.bf16.mxu1 %v4409_v3 }
 0xdd4   :  { %3912 = vmatpush3.bf16.msra.mxu1 %v4488_v14 }
 0xdd5   :  { %3929 = vmatprep.subr.bf16.mxu1 %v4409_v3 }
 0xea2   :  { %v554_v16 = vpop.f32.mrb[12].mxu1 }
 0xea3   :  { %v560_v17 = vadd.f32 %v554_v16, %v126_v15  ;;  %v3899_v18 = vpop.f32.mrb[13].mxu1 }
 0xea4   :  { %v557_v22 = vpop.f32.mrb[14].mxu1 }
 0xea5   :  { %4265 = vtanh.f32 %v560_v17  ;;  %v3900_v23 = vpop.f32.mrb[15].mxu1 }
 0xea6   :  { %v134_v23 = vadd.f32 %v4567_v7, %v4516_v20 }
 0xeaf   :  { %v4266_v24 = vpop.eup %4265 }
 0xeb0   :  { %566 = vrot.lane.b32.xlu0 %v4266_v24, %s4412_s24  ;;  %v562_v9 = vmul.f32 0.5, %v4266_v24 }
 0xeb2   :  { %v563_v25 = vadd.f32 0.5, %v562_v9 }
 0xeb4   :  { %v564_v14 = vmul.f32 %v563_v25, %v500_v4 }
 0xf22   :  { %v567_v27 = vpop.permute.xlu0 %566 }
 0xf23   :  { %v569_v28 = vmul.f32 %v567_v27, %v563_v25 }
 0xf25   :  { %571 = vrot.lane.b32.xlu1 %v569_v28, %s4413_s25 }
 0xf97   :  { %v572_v29 = vpop.permute.xlu1 %571 }
 0xf98   :  { %v574_v21 = vadd.f32 %v572_v29, %v564_v14  ;;  %v4722_v14 = vld [vmem:[%s5471_s4 + $0x1] ss:$0 sm:$0xff] }
 0xf9a   :  { %4267 = vtanh.f32 %v574_v21 }
 0xfa4   :  { %v4268_v8 = vpop.eup %4267 }
 0xfa5   :  { %577 = vrot.lane.b32.xlu0 %v4268_v8, %s4412_s24 }
0x1017   :  { %v578_v30 = vpop.permute.xlu0 %577 }
0x1018   :  { %v4633_v32 = vmul.f32 %v578_v30, %v563_v25 }
0x101a   :  { %v587_v33 = vpack.c.bf16 %v4633_v32, %v4633_v32 }
0x101c   :  { %589 = vrot.lane.b32.xlu1 %v587_v33, %s4413_s25 }
0x108e   :  { %v590_v34 = vpop.permute.xlu1 %589 }
0x108f   :  { %3906 = vmatmul.mubr.msk.bf16.vlgmr.msra.gmra.mrb[16].mxu0 %vm146_vm3, %v590_v34 }
0x1162   :  { %v628_v36 = vpop.f32.mrb[16].mxu0 }
0x1163   :  { %v634_v37 = vadd.f32 %v628_v36, %v131_v35  ;;  %v3907_v38 = vpop.f32.mrb[17].mxu0 }
0x1164   :  { %v631_v39 = vpop.f32.mrb[18].mxu0 }
0x1165   :  { %4269 = vtanh.f32 %v634_v37  ;;  %v3908_v40 = vpop.f32.mrb[19].mxu0 }
0x116f   :  { %v4270_v42 = vpop.eup %4269 }
0x1170   :  { %640 = vrot.lane.b32.xlu0 %v4270_v42, %s4412_s24  ;;  %v636_v43 = vmul.f32 0.5, %v4270_v42 }
0x1172   :  { %v637_v44 = vadd.f32 0.5, %v636_v43 }
0x1174   :  { %v638_v5 = vmul.f32 %v637_v44, %v574_v21 }
0x11e2   :  { %v641_v45 = vpop.permute.xlu0 %640 }
0x11e3   :  { %v643_v46 = vmul.f32 %v641_v45, %v637_v44 }
0x11e5   :  { %645 = vrot.lane.b32.xlu1 %v643_v46, %s4413_s25 }
0x11e9   :  { %212 = vrot.lane.b32.xlu1 %v4526_v41, %s4413_s25  ;;  %v751_v41 = vld [vmem:[%s5472_s2 + $0x8] sm:$0xff] }
0x11ed   :  { %360 = vrot.lane.b32.xlu1 %v4583_v31, %s4413_s25  ;;  %v758_v31 = vpack.c.bf16 %v751_v41, %v750_v51 }
0x11ef   :  { %3917 = vmatprep.subr.bf16.mxu0 %v758_v31 }
0x11f0   :  { %3918 = vmatpush3.bf16.msra.mxu0 %v758_v31 }
0x11f1   :  { %3919 = vmatprep.subr.bf16.mxu0 %v759_v54 }
0x11f4   :  { %3920 = vmatpush3.bf16.msra.mxu0 %v759_v54 }
0x11f5   :  { %3945 = vmatprep.subr.bf16.mxu0 %v4409_v3 }
0x1257   :  { %v646_v47 = vpop.permute.xlu1 %645 }
0x1258   :  { %v4647_v48 = vadd.f32 %v646_v47, %v638_v5 }
0x125a   :  { %4271 = vtanh.f32 %v4647_v48 }
0x125b   :  { %v213_v26 = vpop.permute.xlu1 %212 }
0x125c   :  { %215 = vst.msk [vmem:[#allocation3] sm:$0xff] %vm146_vm3, %v213_v26 }
0x125f   :  { %v361_v49 = vpop.permute.xlu1 %360 }
0x1260   :  { %363 = vst.msk [vmem:[#allocation3 + $0x10] sm:$0xff] %vm146_vm3, %v361_v49 }
0x1263   :  { %v742_v61 = vld [vmem:[#allocation3] sm:$0xff] }
0x1264   :  { %v4272_v55 = vpop.eup %4271 }
0x1265   :  { %651 = vrot.lane.b32.xlu0 %v4272_v55, %s4412_s24 }
0x1267   :  { %v744_v0 = vld [vmem:[#allocation3 + $0x10] sm:$0xff] }
0x1269   :  { %286 = vrot.lane.b32.xlu0 %v4558_v2, %s4413_s25 }
0x126d   :  { %434 = vrot.lane.b32.xlu0 %v4600_v50, %s4413_s25  ;;  %v3607_v50 = vld [vmem:[%s5469_s3 + $0x20] sm:$0xff] }
0x126e   :  { %v4684_v6 = vpack.c.bf16 %v3608_v63, %v3607_v50 }
0x12d7   :  { %v652_v56 = vpop.permute.xlu0 %651 }
0x12d8   :  { %v4670_v57 = vmul.f32 %v652_v56, %v637_v44 }
0x12da   :  { %v661_v58 = vpack.c.bf16 %v4670_v57, %v4670_v57 }
0x12db   :  { %v287_v59 = vpop.permute.xlu0 %286 }
0x12dc   :  { %289 = vst.msk [vmem:[#allocation3 + $0x8] sm:$0xff] %vm146_vm3, %v287_v59  ;;  %663 = vrot.lane.b32.xlu1 %v661_v58, %s4413_s25 }
0x12df   :  { %v435_v60 = vpop.permute.xlu0 %434 }
0x12e0   :  { %437 = vst.msk [vmem:[#allocation3 + $0x18] sm:$0xff] %vm146_vm3, %v435_v60 }
0x12e3   :  { %v743_v62 = vld [vmem:[#allocation3 + $0x8] sm:$0xff] }
0x12e4   :  { %v754_v2 = vpack.c.bf16 %v743_v62, %v742_v61 }
0x12e6   :  { %3921 = vmatprep.mubr.msk.bf16.mxu0 %vm146_vm3, %v754_v2 }
0x12e7   :  { %v745_v1 = vld [vmem:[#allocation3 + $0x18] sm:$0xff] }
0x12e8   :  { %v755_v4 = vpack.c.bf16 %v745_v1, %v744_v0 }
0x12ea   :  { %3922 = vmatmul.mubr.msk.bf16.vlgmr.msra.gmra.mrb[20].mxu0 %vm146_vm3, %v755_v4 }
0x12eb   :  { %3946 = vmatpush3.bf16.msra.mxu0 %v4684_v6 }
0x12ec   :  { %3947 = vmatprep.subr.bf16.mxu0 %v4409_v3 }
0x12ef   :  { %3948 = vmatpush3.bf16.msra.mxu0 %v4695_v13 }
0x12f0   :  { %3961 = vmatprep.subr.bf16.mxu0 %v4409_v3 }
0x134e   :  { %v664_v15 = vpop.permute.xlu1 %663 }
0x134f   :  { %3914 = vmatmul.mubr.msk.bf16.vlgmr.msra.gmra.mrb[16].mxu1 %vm146_vm3, %v664_v15 }
0x1350   :  { %3930 = vmatpush3.bf16.msra.mxu1 %v4684_v6  ;;  %3933 = vmatprep.mubr.msk.bf16.mxu1 %vm4410_vm0, %v4409_v3 }
0x1351   :  { %3931 = vmatprep.subr.bf16.mxu1 %v4409_v3 }
0x1354   :  { %3932 = vmatpush3.bf16.msra.mxu1 %v4695_v13 }
0x1355   :  { %3937 = vmatprep.subr.bf16.mxu1 %v4409_v3 }
0x1357   :  { %3934 = vmatmul.mubr.bf16.vlgmr.msra.gmra.mrb[20].mxu1 %v4411_v19 }
0x1358   :  { %3938 = vmatpush3.bf16.msra.mxu1 %v4684_v6  ;;  %3941 = vmatprep.mubr.msk.bf16.mxu1 %vm4410_vm0, %v4409_v3 }
0x1359   :  { %3939 = vmatprep.subr.bf16.mxu1 %v4409_v3 }
0x135c   :  { %3940 = vmatpush3.bf16.msra.mxu1 %v4695_v13 }
0x135d   :  { %3953 = vmatprep.subr.bf16.mxu1 %v4409_v3 }
0x13bd   :  { %v4713_v16 = vpop.f32.mrb[20].mxu0 }
0x13be   :  { %v810_v17 = vpop.f32.mrb[21].mxu0 }
0x13bf   :  { %v4715_v18 = vpop.f32.mrb[22].mxu0  ;;  %v811_v29 = vadd.f32 %v4722_v14, %v810_v17 }
0x13c0   :  { %v813_v22 = vpop.f32.mrb[23].mxu0 }
0x13c1   :  { %v814_v56 = vadd.f32 %v4722_v14, %v813_v22 }
0x1422   :  { %v702_v24 = vpop.f32.mrb[16].mxu1 }
0x1423   :  { %v708_v9 = vadd.f32 %v702_v24, %v134_v23  ;;  %v3915_v25 = vpop.f32.mrb[17].mxu1 }
0x1424   :  { %v705_v27 = vpop.f32.mrb[18].mxu1 }
0x1425   :  { %v3916_v28 = vpop.f32.mrb[19].mxu1 }
0x142a   :  { %v884_v21 = vpop.f32.mrb[20].mxu1 }
0x142b   :  { %v890_v8 = vadd.f32 %v884_v21, %v811_v29  ;;  %v3935_v30 = vpop.f32.mrb[21].mxu1 }
0x142c   :  { %v887_v33 = vpop.f32.mrb[22].mxu1 }
0x142d   :  { %4273 = vtanh.f32 %v890_v8  ;;  %v3936_v34 = vpop.f32.mrb[23].mxu1 }
0x1437   :  { %v4274_v35 = vpop.eup %4273 }
0x1438   :  { %896 = vrot.lane.b32.xlu0 %v4274_v35, %s4412_s24  ;;  %v892_v20 = vmul.f32 0.5, %v4274_v35  ;;  %v819_v35 = vadd.f32 %v4713_v16, %v4722_v14 }
0x143a   :  { %v893_v7 = vadd.f32 0.5, %v892_v20 }
0x143c   :  { %v894_v38 = vmul.f32 0.0, %v893_v7 }
0x14aa   :  { %v897_v36 = vpop.permute.xlu0 %896 }
0x14ab   :  { %v899_v37 = vmul.f32 %v897_v36, %v893_v7 }
0x14ad   :  { %901 = vrot.lane.b32.xlu1 %v899_v37, %s4413_s25 }
0x151f   :  { %v902_v39 = vpop.permute.xlu1 %901 }
0x1520   :  { %v904_v40 = vadd.f32 %v902_v39, %v894_v38 }
0x1522   :  { %4275 = vtanh.f32 %v904_v40 }
0x1523   :  { %4277 = vtanh.f32 %v708_v9 }
0x152c   :  { %v4276_v42 = vpop.eup %4275 }
0x152d   :  { %907 = vrot.lane.b32.xlu0 %v4276_v42, %s4412_s24  ;;  %v4278_v43 = vpop.eup %4277 }
0x152e   :  { %v710_v44 = vmul.f32 0.5, %v4278_v43 }
0x1530   :  { %v711_v47 = vadd.f32 0.5, %v710_v44 }
0x1531   :  { %714 = vrot.lane.b32.xlu0 %v4278_v43, %s4412_s24 }
0x1532   :  { %v712_v41 = vmul.f32 %v711_v47, %v4647_v48 }
0x159f   :  { %v908_v45 = vpop.permute.xlu0 %907 }
0x15a0   :  { %v4729_v46 = vmul.f32 %v908_v45, %v893_v7 }
0x15a2   :  { %v917_v5 = vpack.c.bf16 %v4729_v46, %v4729_v46 }
0x15a3   :  { %v715_v26 = vpop.permute.xlu0 %714 }
0x15a4   :  { %v717_v49 = vmul.f32 %v715_v26, %v711_v47  ;;  %919 = vrot.lane.b32.xlu1 %v917_v5, %s4413_s25 }
0x15a6   :  { %719 = vrot.lane.b32.xlu0 %v717_v49, %s4413_s25 }
0x1616   :  { %v920_v51 = vpop.permute.xlu1 %919 }
0x1617   :  { %3942 = vmatmul.mubr.msk.bf16.vlgmr.msra.gmra.mrb[24].mxu1 %vm146_vm3, %v920_v51 }
0x1618   :  { %v720_v31 = vpop.permute.xlu0 %719  ;;  %3954 = vmatpush3.bf16.msra.mxu1 %v4684_v6  ;;  %3957 = vmatprep.mubr.msk.bf16.mxu1 %vm4410_vm0, %v4409_v3 }
0x1619   :  { %v722_v52 = vadd.f32 %v720_v31, %v712_v41  ;;  %3955 = vmatprep.subr.bf16.mxu1 %v4409_v3  ;;  %v822_v31 = vadd.f32 %v4715_v18, %v4722_v14 }
0x161b   :  { %4279 = vtanh.f32 %v722_v52 }
0x161c   :  { %3956 = vmatpush3.bf16.msra.mxu1 %v4695_v13 }
0x161d   :  { %3969 = vmatprep.subr.bf16.mxu1 %v4409_v3 }
0x1625   :  { %v4280_v53 = vpop.eup %4279 }
0x1626   :  { %725 = vrot.lane.b32.xlu0 %v4280_v53, %s4412_s24 }
0x162a   :  { %508 = vrot.lane.b32.xlu0 %v4616_v11, %s4413_s25 }
0x162e   :  { %656 = vrot.lane.b32.xlu0 %v4670_v57, %s4413_s25 }
0x1698   :  { %v726_v48 = vpop.permute.xlu0 %725 }
0x1699   :  { %v728_v12 = vmul.f32 %v726_v48, %v711_v47 }
0x169c   :  { %v509_v54 = vpop.permute.xlu0 %508 }
0x169d   :  { %511 = vst.msk [vmem:[#allocation3 + $0x20] sm:$0xff] %vm146_vm3, %v509_v54 }
0x16a0   :  { %v657_v55 = vpop.permute.xlu0 %656 }
0x16a1   :  { %659 = vst.msk [vmem:[#allocation3 + $0x30] sm:$0xff] %vm146_vm3, %v657_v55 }
0x16a4   :  { %v746_v9 = vld [vmem:[#allocation3 + $0x20] sm:$0xff] }
0x16a8   :  { %v748_v27 = vld [vmem:[#allocation3 + $0x30] sm:$0xff] }
0x16ea   :  { %v958_v58 = vpop.f32.mrb[24].mxu1 }
0x16eb   :  { %v964_v59 = vadd.f32 %v958_v58, %v814_v56  ;;  %v3943_v60 = vpop.f32.mrb[25].mxu1 }
0x16ec   :  { %v961_v61 = vpop.f32.mrb[26].mxu1 }
0x16ed   :  { %4281 = vtanh.f32 %v964_v59  ;;  %v3944_v62 = vpop.f32.mrb[27].mxu1 }
0x16f7   :  { %v4282_v2 = vpop.eup %4281 }
0x16f8   :  { %970 = vrot.lane.b32.xlu1 %v4282_v2, %s4412_s24  ;;  %v966_v11 = vmul.f32 0.5, %v4282_v2 }
0x16fa   :  { %v967_v57 = vadd.f32 0.5, %v966_v11 }
0x16fc   :  { %v968_v0 = vmul.f32 %v967_v57, %v904_v40 }
0x176a   :  { %v971_v50 = vpop.permute.xlu1 %970 }
0x176b   :  { %v973_v63 = vmul.f32 %v971_v50, %v967_v57 }
0x176d   :  { %975 = vrot.lane.b32.xlu1 %v973_v63, %s4413_s25 }
0x17df   :  { %v976_v1 = vpop.permute.xlu1 %975 }
0x17e0   :  { %v978_v4 = vadd.f32 %v976_v1, %v968_v0 }
0x17e2   :  { %4283 = vtanh.f32 %v978_v4 }
0x17ec   :  { %v4284_v10 = vpop.eup %4283 }
0x17ed   :  { %981 = vrot.lane.b32.xlu1 %v4284_v10, %s4412_s24 }
0x17f1   :  { %582 = vrot.lane.b32.xlu1 %v4633_v32, %s4413_s25 }
0x17f5   :  { %730 = vrot.lane.b32.xlu1 %v728_v12, %s4413_s25 }
0x185f   :  { %v982_v15 = vpop.permute.xlu1 %981 }
0x1860   :  { %v4757_v17 = vmul.f32 %v982_v15, %v967_v57 }
0x1862   :  { %v991_v22 = vpack.c.bf16 %v4757_v17, %v4757_v17 }
0x1863   :  { %v583_v23 = vpop.permute.xlu1 %582 }
0x1864   :  { %585 = vst.msk [vmem:[#allocation3 + $0x28] sm:$0xff] %vm146_vm3, %v583_v23  ;;  %993 = vrot.lane.b32.xlu0 %v991_v22, %s4413_s25 }
0x1867   :  { %v731_v24 = vpop.permute.xlu1 %730 }
0x1868   :  { %733 = vst.msk [vmem:[#allocation3 + $0x38] sm:$0xff] %vm146_vm3, %v731_v24 }
0x186b   :  { %v747_v25 = vld [vmem:[#allocation3 + $0x28] sm:$0xff] }
0x186c   :  { %v756_v32 = vpack.c.bf16 %v747_v25, %v746_v9 }
0x186e   :  { %3925 = vmatprep.mubr.msk.bf16.mxu0 %vm146_vm3, %v756_v32 }
0x186f   :  { %v749_v28 = vld [vmem:[#allocation3 + $0x38] sm:$0xff] }
0x1870   :  { %v757_v29 = vpack.c.bf16 %v749_v28, %v748_v27 }
0x1872   :  { %3926 = vmatmul.mubr.msk.bf16.gmra.mrb[24].mxu0 %vm146_vm3, %v757_v29 }
0x1873   :  { %3949 = vmatprep.mubr.msk.bf16.mxu0 %vm4410_vm0, %v4409_v3 }
0x18d6   :  { %v994_v21 = vpop.permute.xlu0 %993 }
0x18d7   :  { %3950 = vmatmul.mubr.msk.bf16.vlgmr.msra.gmra.mrb[28].mxu0 %vm146_vm3, %v994_v21 }
0x18d8   :  { %3962 = vmatpush3.bf16.msra.mxu0 %v4684_v6  ;;  %3965 = vmatprep.mubr.msk.bf16.mxu0 %vm4410_vm0, %v4409_v3 }
0x18d9   :  { %3963 = vmatprep.subr.bf16.mxu0 %v4409_v3 }
0x18dc   :  { %3964 = vmatpush3.bf16.msra.mxu0 %v4695_v13 }
0x18dd   :  { %3977 = vmatprep.subr.bf16.mxu0 %v4409_v3 }
0x1945   :  { %v4775_v8 = vpop.f32.mrb[24].mxu0 }
0x1946   :  { %v4777_v30 = vpop.f32.mrb[25].mxu0 }
0x1947   :  { %v4779_v33 = vpop.f32.mrb[26].mxu0  ;;  %v827_v1 = vadd.f32 %v4722_v14, %v4777_v30 }
0x1948   :  { %v4781_v34 = vpop.f32.mrb[27].mxu0 }
0x19aa   :  { %v1032_v20 = vpop.f32.mrb[28].mxu0 }
0x19ab   :  { %v1038_v7 = vadd.f32 %v1032_v20, %v819_v35  ;;  %v3951_v36 = vpop.f32.mrb[29].mxu0 }
0x19ac   :  { %v1035_v37 = vpop.f32.mrb[30].mxu0  ;;  %v830_v36 = vadd.f32 %v4722_v14, %v4781_v34 }
0x19ad   :  { %4285 = vtanh.f32 %v1038_v7  ;;  %v3952_v38 = vpop.f32.mrb[31].mxu0 }
0x19b7   :  { %v4286_v39 = vpop.eup %4285 }
0x19b8   :  { %1044 = vrot.lane.b32.xlu1 %v4286_v39, %s4412_s24  ;;  %v1040_v40 = vmul.f32 0.5, %v4286_v39 }
0x19ba   :  { %v1041_v42 = vadd.f32 0.5, %v1040_v40 }
0x19bc   :  { %v1042_v45 = vmul.f32 %v1041_v42, %v978_v4 }
0x1a2a   :  { %v1045_v43 = vpop.permute.xlu1 %1044 }
0x1a2b   :  { %v1047_v44 = vmul.f32 %v1045_v43, %v1041_v42 }
0x1a2d   :  { %1049 = vrot.lane.b32.xlu0 %v1047_v44, %s4413_s25 }
0x1a9f   :  { %v1050_v5 = vpop.permute.xlu0 %1049 }
0x1aa0   :  { %v1052_v47 = vadd.f32 %v1050_v5, %v1042_v45 }
0x1aa2   :  { %4287 = vtanh.f32 %v1052_v47 }
0x1aac   :  { %v4288_v16 = vpop.eup %4287 }
0x1aad   :  { %1055 = vrot.lane.b32.xlu1 %v4288_v16, %s4412_s24 }
0x1b1f   :  { %v1056_v26 = vpop.permute.xlu1 %1055 }
0x1b20   :  { %v4788_v49 = vmul.f32 %v1056_v26, %v1041_v42 }
0x1b22   :  { %v1065_v51 = vpack.c.bf16 %v4788_v49, %v4788_v49 }
0x1b24   :  { %1067 = vrot.lane.b32.xlu0 %v1065_v51, %s4413_s25 }
0x1b96   :  { %v1068_v41 = vpop.permute.xlu0 %1067 }
0x1b97   :  { %3958 = vmatmul.mubr.msk.bf16.vlgmr.msra.gmra.mrb[28].mxu1 %vm146_vm3, %v1068_v41 }
0x1b98   :  { %3970 = vmatpush3.bf16.msra.mxu1 %v4684_v6  ;;  %3973 = vmatprep.mubr.msk.bf16.mxu1 %vm4410_vm0, %v4409_v3 }
0x1b99   :  { %3971 = vmatprep.subr.bf16.mxu1 %v4409_v3 }
0x1b9c   :  { %3972 = vmatpush3.bf16.msra.mxu1 %v4695_v13 }
0x1b9d   :  { %3985 = vmatprep.subr.bf16.mxu1 %v4409_v3 }
0x1c6a   :  { %v1106_v52 = vpop.f32.mrb[28].mxu1 }
0x1c6b   :  { %v1112_v53 = vadd.f32 %v1106_v52, %v822_v31  ;;  %v3959_v48 = vpop.f32.mrb[29].mxu1  ;;  %v835_v52 = vadd.f32 %v4775_v8, %v4722_v14 }
0x1c6c   :  { %v1109_v54 = vpop.f32.mrb[30].mxu1 }
0x1c6d   :  { %4289 = vtanh.f32 %v1112_v53  ;;  %v3960_v55 = vpop.f32.mrb[31].mxu1 }
0x1c77   :  { %v4290_v56 = vpop.eup %4289 }
0x1c78   :  { %1118 = vrot.lane.b32.xlu1 %v4290_v56, %s4412_s24  ;;  %v1114_v58 = vmul.f32 0.5, %v4290_v56 }
0x1c7a   :  { %v1115_v59 = vadd.f32 0.5, %v1114_v58 }
0x1c7c   :  { %v1116_v62 = vmul.f32 %v1115_v59, %v1052_v47 }
0x1cea   :  { %v1119_v60 = vpop.permute.xlu1 %1118 }
0x1ceb   :  { %v1121_v61 = vmul.f32 %v1119_v60, %v1115_v59 }
0x1ced   :  { %1123 = vrot.lane.b32.xlu0 %v1121_v61, %s4413_s25 }
0x1d5f   :  { %v1124_v2 = vpop.permute.xlu0 %1123 }
0x1d60   :  { %v1126_v11 = vadd.f32 %v1124_v2, %v1116_v62 }
0x1d62   :  { %4291 = vtanh.f32 %v1126_v11 }
0x1d6c   :  { %v4292_v18 = vpop.eup %4291 }
0x1d6d   :  { %1129 = vrot.lane.b32.xlu1 %v4292_v18, %s4412_s24 }
0x1ddf   :  { %v1130_v57 = vpop.permute.xlu1 %1129 }
0x1de0   :  { %v4805_v50 = vmul.f32 %v1130_v57, %v1115_v59 }
0x1de2   :  { %v1139_v63 = vpack.c.bf16 %v4805_v50, %v4805_v50 }
0x1de4   :  { %1141 = vrot.lane.b32.xlu0 %v1139_v63, %s4413_s25  ;;  %v3627_v63 = vld [vmem:[%s5472_s2 + $0x20] sm:$0xff] }
0x1e56   :  { %v1142_v0 = vpop.permute.xlu0 %1141 }
0x1e57   :  { %3966 = vmatmul.mubr.msk.bf16.vlgmr.msra.gmra.mrb[32].mxu0 %vm146_vm3, %v1142_v0  ;;  %v3629_v0 = vld [vmem:[%s5472_s2 + $0x30] sm:$0xff] }
0x1e58   :  { %3978 = vmatpush3.bf16.msra.mxu0 %v4684_v6  ;;  %3981 = vmatprep.mubr.msk.bf16.mxu0 %vm4410_vm0, %v4409_v3 }
0x1e59   :  { %3979 = vmatprep.subr.bf16.mxu0 %v4409_v3 }
0x1e5c   :  { %3980 = vmatpush3.bf16.msra.mxu0 %v4695_v13 }
0x1f2a   :  { %v1180_v4 = vpop.f32.mrb[32].mxu0 }
0x1f2b   :  { %v1186_v10 = vadd.f32 %v1180_v4, %v827_v1  ;;  %v3967_v12 = vpop.f32.mrb[33].mxu0  ;;  %v3630_v1 = vld [vmem:[%s5472_s2 + $0x38] sm:$0xff] }
0x1f2c   :  { %v1183_v15 = vpop.f32.mrb[34].mxu0  ;;  %v1460_v4 = vpack.c.bf16 %v3630_v1, %v3629_v0 }
0x1f2d   :  { %4293 = vtanh.f32 %v1186_v10  ;;  %v3968_v22 = vpop.f32.mrb[35].mxu0 }
0x1f37   :  { %v4294_v23 = vpop.eup %4293 }
0x1f38   :  { %1192 = vrot.lane.b32.xlu1 %v4294_v23, %s4412_s24  ;;  %v1188_v24 = vmul.f32 0.5, %v4294_v23 }
0x1f3a   :  { %v1189_v9 = vadd.f32 0.5, %v1188_v24 }
0x1f3c   :  { %v1190_v27 = vmul.f32 %v1189_v9, %v1126_v11 }
0x1faa   :  { %v1193_v25 = vpop.permute.xlu1 %1192 }
0x1fab   :  { %v1195_v32 = vmul.f32 %v1193_v25, %v1189_v9 }
0x1fad   :  { %1197 = vrot.lane.b32.xlu0 %v1195_v32, %s4413_s25  ;;  %v3624_v32 = vld [vmem:[%s5469_s3 + $0x48] sm:$0xff] }
0x201f   :  { %v1198_v28 = vpop.permute.xlu0 %1197 }
0x2020   :  { %v1200_v29 = vadd.f32 %v1198_v28, %v1190_v27 }
0x2022   :  { %4295 = vtanh.f32 %v1200_v29 }
0x202c   :  { %v4296_v21 = vpop.eup %4295 }
0x202d   :  { %1203 = vrot.lane.b32.xlu1 %v4296_v21, %s4412_s24 }
0x209f   :  { %v1204_v30 = vpop.permute.xlu1 %1203 }
0x20a0   :  { %v4821_v35 = vmul.f32 %v1204_v30, %v1189_v9  ;;  %v3625_v30 = vld [vmem:[%s5469_s3 + $0x50] sm:$0xff] }
0x20a2   :  { %v1213_v20 = vpack.c.bf16 %v4821_v35, %v4821_v35 }
0x20a4   :  { %1215 = vrot.lane.b32.xlu0 %v1213_v20, %s4413_s25  ;;  %v3626_v20 = vld [vmem:[%s5469_s3 + $0x58] sm:$0xff] }
0x2116   :  { %v1216_v7 = vpop.permute.xlu0 %1215 }
0x2117   :  { %3974 = vmatmul.mubr.msk.bf16.vlgmr.msra.gmra.mrb[32].mxu1 %vm146_vm3, %v1216_v7  ;;  %v4900_v7 = vpack.c.bf16 %v3626_v20, %v3625_v30 }
0x2118   :  { %3986 = vmatpush3.bf16.msra.mxu1 %v4684_v6  ;;  %3989 = vmatprep.mubr.msk.bf16.mxu1 %vm4410_vm0, %v4409_v3 }
0x2119   :  { %3987 = vmatprep.subr.bf16.mxu1 %v4409_v3 }
0x211c   :  { %3988 = vmatpush3.bf16.msra.mxu1 %v4695_v13 }
0x211d   :  { %4005 = vmatprep.subr.bf16.mxu1 %v4409_v3 }
0x21ea   :  { %v1254_v37 = vpop.f32.mrb[32].mxu1 }
0x21eb   :  { %v1260_v38 = vadd.f32 %v1254_v37, %v830_v36  ;;  %v3975_v39 = vpop.f32.mrb[33].mxu1 }
0x21ec   :  { %v1257_v40 = vpop.f32.mrb[34].mxu1 }
0x21ed   :  { %4297 = vtanh.f32 %v1260_v38  ;;  %v3976_v42 = vpop.f32.mrb[35].mxu1 }
0x21ee   :  { %v838_v42 = vadd.f32 %v4779_v33, %v4722_v14 }
0x21f7   :  { %v4298_v43 = vpop.eup %4297 }
0x21f8   :  { %1266 = vrot.lane.b32.xlu1 %v4298_v43, %s4412_s24  ;;  %v1262_v6 = vmul.f32 0.5, %v4298_v43 }
0x21fa   :  { %v1263_v44 = vadd.f32 0.5, %v1262_v6 }
0x21fc   :  { %v1264_v13 = vmul.f32 %v1263_v44, %v1200_v29 }
0x226a   :  { %v1267_v45 = vpop.permute.xlu1 %1266 }
0x226b   :  { %v1269_v5 = vmul.f32 %v1267_v45, %v1263_v44 }
0x226d   :  { %1271 = vrot.lane.b32.xlu0 %v1269_v5, %s4413_s25 }
0x22df   :  { %v1272_v47 = vpop.permute.xlu0 %1271 }
0x22e0   :  { %v1274_v16 = vadd.f32 %v1272_v47, %v1264_v13  ;;  %v4927_v13 = vld [vmem:[%s5471_s4 + $0x2] ss:$0 sm:$0xff] }
0x22e2   :  { %4299 = vtanh.f32 %v1274_v16 }
0x22ec   :  { %v4300_v34 = vpop.eup %4299 }
0x22ed   :  { %1277 = vrot.lane.b32.xlu1 %v4300_v34, %s4412_s24 }
0x235f   :  { %v1278_v26 = vpop.permute.xlu1 %1277 }
0x2360   :  { %v4838_v51 = vmul.f32 %v1278_v26, %v1263_v44 }
0x2362   :  { %v1287_v41 = vpack.c.bf16 %v4838_v51, %v4838_v51 }
0x2364   :  { %1289 = vrot.lane.b32.xlu0 %v1287_v41, %s4413_s25 }
0x23d6   :  { %v1290_v31 = vpop.permute.xlu0 %1289 }
0x23d7   :  { %3982 = vmatmul.mubr.msk.bf16.vlgmr.msra.gmra.mrb[36].mxu0 %vm146_vm3, %v1290_v31 }
0x24aa   :  { %v1328_v53 = vpop.f32.mrb[36].mxu0 }
0x24ab   :  { %v1334_v48 = vadd.f32 %v1328_v53, %v835_v52  ;;  %v3983_v54 = vpop.f32.mrb[37].mxu0 }
0x24ac   :  { %v1331_v55 = vpop.f32.mrb[38].mxu0 }
0x24ad   :  { %4301 = vtanh.f32 %v1334_v48  ;;  %v3984_v56 = vpop.f32.mrb[39].mxu0 }
0x24b7   :  { %v4302_v58 = vpop.eup %4301 }
0x24b8   :  { %1340 = vrot.lane.b32.xlu1 %v4302_v58, %s4412_s24  ;;  %v1336_v59 = vmul.f32 0.5, %v4302_v58 }
0x24ba   :  { %v1337_v60 = vadd.f32 0.5, %v1336_v59 }
0x24bc   :  { %v1338_v8 = vmul.f32 %v1337_v60, %v1274_v16 }
0x252a   :  { %v1341_v61 = vpop.permute.xlu1 %1340 }
0x252b   :  { %v1343_v62 = vmul.f32 %v1341_v61, %v1337_v60 }
0x252d   :  { %1345 = vrot.lane.b32.xlu0 %v1343_v62, %s4413_s25 }
0x2531   :  { %912 = vrot.lane.b32.xlu0 %v4729_v46, %s4413_s25  ;;  %v3628_v46 = vld [vmem:[%s5472_s2 + $0x28] sm:$0xff] }
0x2535   :  { %1060 = vrot.lane.b32.xlu0 %v4788_v49, %s4413_s25  ;;  %v1459_v49 = vpack.c.bf16 %v3628_v46, %v3627_v63 }
0x2537   :  { %3993 = vmatprep.subr.bf16.mxu0 %v1459_v49 }
0x2538   :  { %3994 = vmatpush3.bf16.msra.mxu0 %v1459_v49 }
0x2539   :  { %3995 = vmatprep.subr.bf16.mxu0 %v1460_v4 }
0x253c   :  { %3996 = vmatpush3.bf16.msra.mxu0 %v1460_v4 }
0x253d   :  { %4021 = vmatprep.subr.bf16.mxu0 %v4409_v3 }
0x259f   :  { %v1346_v2 = vpop.permute.xlu0 %1345 }
0x25a0   :  { %v4852_v11 = vadd.f32 %v1346_v2, %v1338_v8 }
0x25a2   :  { %4303 = vtanh.f32 %v4852_v11 }
0x25a3   :  { %v913_v18 = vpop.permute.xlu0 %912 }
0x25a4   :  { %915 = vst.msk [vmem:[#allocation3] sm:$0xff] %vm146_vm3, %v913_v18 }
0x25a7   :  { %v1061_v57 = vpop.permute.xlu0 %1060 }
0x25a8   :  { %1063 = vst.msk [vmem:[#allocation3 + $0x10] sm:$0xff] %vm146_vm3, %v1061_v57 }
0x25ab   :  { %v1442_v9 = vld [vmem:[#allocation3] sm:$0xff] }
0x25ac   :  { %v4304_v10 = vpop.eup %4303 }
0x25ad   :  { %1351 = vrot.lane.b32.xlu1 %v4304_v10, %s4412_s24 }
0x25af   :  { %v1444_v27 = vld [vmem:[#allocation3 + $0x10] sm:$0xff] }
0x25b1   :  { %986 = vrot.lane.b32.xlu1 %v4757_v17, %s4413_s25 }
0x25b5   :  { %1134 = vrot.lane.b32.xlu1 %v4805_v50, %s4413_s25  ;;  %v3623_v50 = vld [vmem:[%s5469_s3 + $0x40] sm:$0xff] }
0x25b6   :  { %v4889_v21 = vpack.c.bf16 %v3624_v32, %v3623_v50 }
0x261f   :  { %v1352_v12 = vpop.permute.xlu1 %1351 }
0x2620   :  { %v4875_v15 = vmul.f32 %v1352_v12, %v1337_v60 }
0x2622   :  { %v1361_v22 = vpack.c.bf16 %v4875_v15, %v4875_v15 }
0x2623   :  { %v987_v23 = vpop.permute.xlu1 %986 }
0x2624   :  { %989 = vst.msk [vmem:[#allocation3 + $0x8] sm:$0xff] %vm146_vm3, %v987_v23  ;;  %1363 = vrot.lane.b32.xlu0 %v1361_v22, %s4413_s25 }
0x2627   :  { %v1135_v24 = vpop.permute.xlu1 %1134 }
0x2628   :  { %1137 = vst.msk [vmem:[#allocation3 + $0x18] sm:$0xff] %vm146_vm3, %v1135_v24 }
0x262b   :  { %v1443_v25 = vld [vmem:[#allocation3 + $0x8] sm:$0xff] }
0x262c   :  { %v1455_v17 = vpack.c.bf16 %v1443_v25, %v1442_v9 }
0x262e   :  { %3997 = vmatprep.mubr.msk.bf16.mxu0 %vm146_vm3, %v1455_v17 }
0x262f   :  { %v1445_v28 = vld [vmem:[#allocation3 + $0x18] sm:$0xff] }
0x2630   :  { %v1456_v29 = vpack.c.bf16 %v1445_v28, %v1444_v27 }
0x2632   :  { %3998 = vmatmul.mubr.msk.bf16.vlgmr.msra.gmra.mrb[40].mxu0 %vm146_vm3, %v1456_v29 }
0x2633   :  { %4022 = vmatpush3.bf16.msra.mxu0 %v4889_v21 }
0x2634   :  { %4023 = vmatprep.subr.bf16.mxu0 %v4409_v3 }
0x2637   :  { %4024 = vmatpush3.bf16.msra.mxu0 %v4900_v7 }
0x2638   :  { %4037 = vmatprep.subr.bf16.mxu0 %v4409_v3 }
0x2696   :  { %v1364_v36 = vpop.permute.xlu0 %1363 }
0x2697   :  { %3990 = vmatmul.mubr.msk.bf16.vlgmr.msra.gmra.mrb[36].mxu1 %vm146_vm3, %v1364_v36 }
0x2698   :  { %4006 = vmatpush3.bf16.msra.mxu1 %v4889_v21  ;;  %4009 = vmatprep.mubr.msk.bf16.mxu1 %vm4410_vm0, %v4409_v3 }
0x2699   :  { %4007 = vmatprep.subr.bf16.mxu1 %v4409_v3 }
0x269c   :  { %4008 = vmatpush3.bf16.msra.mxu1 %v4900_v7 }
0x269d   :  { %4013 = vmatprep.subr.bf16.mxu1 %v4409_v3 }
0x269f   :  { %4010 = vmatmul.mubr.bf16.vlgmr.msra.gmra.mrb[40].mxu1 %v4411_v19 }
0x26a0   :  { %4014 = vmatpush3.bf16.msra.mxu1 %v4889_v21  ;;  %4017 = vmatprep.mubr.msk.bf16.mxu1 %vm4410_vm0, %v4409_v3 }
0x26a1   :  { %4015 = vmatprep.subr.bf16.mxu1 %v4409_v3 }
0x26a4   :  { %4016 = vmatpush3.bf16.msra.mxu1 %v4900_v7 }
0x26a5   :  { %4029 = vmatprep.subr.bf16.mxu1 %v4409_v3 }
0x2705   :  { %v4918_v37 = vpop.f32.mrb[40].mxu0 }
0x2706   :  { %v1511_v38 = vpop.f32.mrb[41].mxu0 }
0x2707   :  { %v4920_v39 = vpop.f32.mrb[42].mxu0  ;;  %v1512_v47 = vadd.f32 %v4927_v13, %v1511_v38 }
0x2708   :  { %v1514_v40 = vpop.f32.mrb[43].mxu0 }
0x2709   :  { %v1515_v12 = vadd.f32 %v4927_v13, %v1514_v40 }
0x276a   :  { %v1402_v43 = vpop.f32.mrb[36].mxu1 }
0x276b   :  { %v1408_v6 = vadd.f32 %v1402_v43, %v838_v42  ;;  %v3991_v44 = vpop.f32.mrb[37].mxu1 }
0x276c   :  { %v1405_v45 = vpop.f32.mrb[38].mxu1 }
0x276d   :  { %v3992_v5 = vpop.f32.mrb[39].mxu1 }
0x2772   :  { %v1585_v16 = vpop.f32.mrb[40].mxu1 }
0x2773   :  { %v1591_v34 = vadd.f32 %v1585_v16, %v1512_v47  ;;  %v4011_v26 = vpop.f32.mrb[41].mxu1 }
0x2774   :  { %v1588_v41 = vpop.f32.mrb[42].mxu1 }
0x2775   :  { %4305 = vtanh.f32 %v1591_v34  ;;  %v4012_v31 = vpop.f32.mrb[43].mxu1 }
0x277f   :  { %v4306_v52 = vpop.eup %4305 }
0x2780   :  { %1597 = vrot.lane.b32.xlu1 %v4306_v52, %s4412_s24  ;;  %v1593_v14 = vmul.f32 0.5, %v4306_v52  ;;  %v1520_v52 = vadd.f32 %v4918_v37, %v4927_v13 }
0x2782   :  { %v1594_v33 = vadd.f32 0.5, %v1593_v14 }
0x2784   :  { %v1595_v54 = vmul.f32 0.0, %v1594_v33 }
0x27f2   :  { %v1598_v53 = vpop.permute.xlu1 %1597 }
0x27f3   :  { %v1600_v48 = vmul.f32 %v1598_v53, %v1594_v33 }
0x27f5   :  { %1602 = vrot.lane.b32.xlu0 %v1600_v48, %s4413_s25 }
0x2867   :  { %v1603_v55 = vpop.permute.xlu0 %1602 }
0x2868   :  { %v1605_v56 = vadd.f32 %v1603_v55, %v1595_v54 }
0x286a   :  { %4307 = vtanh.f32 %v1605_v56 }
0x286b   :  { %4309 = vtanh.f32 %v1408_v6 }
0x2874   :  { %v4308_v58 = vpop.eup %4307 }
0x2875   :  { %1608 = vrot.lane.b32.xlu1 %v4308_v58, %s4412_s24  ;;  %v4310_v59 = vpop.eup %4309 }
0x2876   :  { %v1410_v60 = vmul.f32 0.5, %v4310_v59 }
0x2878   :  { %v1411_v2 = vadd.f32 0.5, %v1410_v60 }
0x2879   :  { %1414 = vrot.lane.b32.xlu1 %v4310_v59, %s4412_s24 }
0x287a   :  { %v1412_v46 = vmul.f32 %v1411_v2, %v4852_v11 }
0x28e7   :  { %v1609_v61 = vpop.permute.xlu1 %1608 }
0x28e8   :  { %v4934_v62 = vmul.f32 %v1609_v61, %v1594_v33 }
0x28ea   :  { %v1618_v8 = vpack.c.bf16 %v4934_v62, %v4934_v62 }
0x28eb   :  { %v1415_v18 = vpop.permute.xlu1 %1414 }
0x28ec   :  { %v1417_v57 = vmul.f32 %v1415_v18, %v1411_v2  ;;  %1620 = vrot.lane.b32.xlu0 %v1618_v8, %s4413_s25 }
0x28ee   :  { %1419 = vrot.lane.b32.xlu1 %v1417_v57, %s4413_s25 }
0x295e   :  { %v1621_v63 = vpop.permute.xlu0 %1620 }
0x295f   :  { %4018 = vmatmul.mubr.msk.bf16.vlgmr.msra.gmra.mrb[44].mxu1 %vm146_vm3, %v1621_v63 }
0x2960   :  { %v1420_v49 = vpop.permute.xlu1 %1419  ;;  %4030 = vmatpush3.bf16.msra.mxu1 %v4889_v21  ;;  %4033 = vmatprep.mubr.msk.bf16.mxu1 %vm4410_vm0, %v4409_v3 }
0x2961   :  { %v1422_v0 = vadd.f32 %v1420_v49, %v1412_v46  ;;  %4031 = vmatprep.subr.bf16.mxu1 %v4409_v3  ;;  %v1523_v49 = vadd.f32 %v4920_v39, %v4927_v13 }
0x2963   :  { %4311 = vtanh.f32 %v1422_v0 }
0x2964   :  { %4032 = vmatpush3.bf16.msra.mxu1 %v4900_v7 }
0x2965   :  { %4045 = vmatprep.subr.bf16.mxu1 %v4409_v3 }
0x296d   :  { %v4312_v1 = vpop.eup %4311 }
0x296e   :  { %1425 = vrot.lane.b32.xlu1 %v4312_v1, %s4412_s24 }
0x2972   :  { %1208 = vrot.lane.b32.xlu1 %v4821_v35, %s4413_s25 }
0x2976   :  { %1356 = vrot.lane.b32.xlu1 %v4875_v15, %s4413_s25 }
0x29e0   :  { %v1426_v11 = vpop.permute.xlu1 %1425 }
0x29e1   :  { %v1428_v20 = vmul.f32 %v1426_v11, %v1411_v2 }
0x29e4   :  { %v1209_v4 = vpop.permute.xlu1 %1208 }
0x29e5   :  { %1211 = vst.msk [vmem:[#allocation3 + $0x20] sm:$0xff] %vm146_vm3, %v1209_v4 }
0x29e8   :  { %v1357_v10 = vpop.permute.xlu1 %1356 }
0x29e9   :  { %1359 = vst.msk [vmem:[#allocation3 + $0x30] sm:$0xff] %vm146_vm3, %v1357_v10 }
0x29ec   :  { %v1446_v6 = vld [vmem:[#allocation3 + $0x20] sm:$0xff] }
0x29f0   :  { %v1448_v45 = vld [vmem:[#allocation3 + $0x30] sm:$0xff] }
0x2a32   :  { %v1659_v22 = vpop.f32.mrb[44].mxu1 }
0x2a33   :  { %v1665_v23 = vadd.f32 %v1659_v22, %v1515_v12  ;;  %v4019_v24 = vpop.f32.mrb[45].mxu1 }
0x2a34   :  { %v1662_v9 = vpop.f32.mrb[46].mxu1 }
0x2a35   :  { %4313 = vtanh.f32 %v1665_v23  ;;  %v4020_v25 = vpop.f32.mrb[47].mxu1 }
0x2a3f   :  { %v4314_v17 = vpop.eup %4313 }
0x2a40   :  { %1671 = vrot.lane.b32.xlu0 %v4314_v17, %s4412_s24  ;;  %v1667_v35 = vmul.f32 0.5, %v4314_v17 }
0x2a42   :  { %v1668_v15 = vadd.f32 0.5, %v1667_v35 }
0x2a44   :  { %v1669_v27 = vmul.f32 %v1668_v15, %v1605_v56 }
0x2ab2   :  { %v1672_v50 = vpop.permute.xlu0 %1671 }
0x2ab3   :  { %v1674_v32 = vmul.f32 %v1672_v50, %v1668_v15 }
0x2ab5   :  { %1676 = vrot.lane.b32.xlu0 %v1674_v32, %s4413_s25 }
0x2b27   :  { %v1677_v28 = vpop.permute.xlu0 %1676 }
0x2b28   :  { %v1679_v29 = vadd.f32 %v1677_v28, %v1669_v27 }
0x2b2a   :  { %4315 = vtanh.f32 %v1679_v29 }
0x2b34   :  { %v4316_v30 = vpop.eup %4315 }
0x2b35   :  { %1682 = vrot.lane.b32.xlu0 %v4316_v30, %s4412_s24 }
0x2b39   :  { %1282 = vrot.lane.b32.xlu0 %v4838_v51, %s4413_s25 }
0x2b3d   :  { %1430 = vrot.lane.b32.xlu0 %v1428_v20, %s4413_s25 }
0x2ba7   :  { %v1683_v36 = vpop.permute.xlu0 %1682 }
0x2ba8   :  { %v4962_v38 = vmul.f32 %v1683_v36, %v1668_v15 }
0x2baa   :  { %v1692_v40 = vpack.c.bf16 %v4962_v38, %v4962_v38 }
0x2bab   :  { %v1283_v42 = vpop.permute.xlu0 %1282 }
0x2bac   :  { %1285 = vst.msk [vmem:[#allocation3 + $0x28] sm:$0xff] %vm146_vm3, %v1283_v42  ;;  %1694 = vrot.lane.b32.xlu1 %v1692_v40, %s4413_s25 }
0x2baf   :  { %v1431_v43 = vpop.permute.xlu0 %1430 }
0x2bb0   :  { %1433 = vst.msk [vmem:[#allocation3 + $0x38] sm:$0xff] %vm146_vm3, %v1431_v43 }
0x2bb3   :  { %v1447_v44 = vld [vmem:[#allocation3 + $0x28] sm:$0xff] }
0x2bb4   :  { %v1457_v51 = vpack.c.bf16 %v1447_v44, %v1446_v6 }
0x2bb6   :  { %4001 = vmatprep.mubr.msk.bf16.mxu0 %vm146_vm3, %v1457_v51 }
0x2bb7   :  { %v1449_v5 = vld [vmem:[#allocation3 + $0x38] sm:$0xff] }
0x2bb8   :  { %v1458_v47 = vpack.c.bf16 %v1449_v5, %v1448_v45 }
0x2bba   :  { %4002 = vmatmul.mubr.msk.bf16.gmra.mrb[44].mxu0 %vm146_vm3, %v1458_v47 }
0x2bbb   :  { %4025 = vmatprep.mubr.msk.bf16.mxu0 %vm4410_vm0, %v4409_v3 }
0x2c1e   :  { %v1695_v16 = vpop.permute.xlu1 %1694 }
0x2c1f   :  { %4026 = vmatmul.mubr.msk.bf16.vlgmr.msra.gmra.mrb[48].mxu0 %vm146_vm3, %v1695_v16 }
0x2c20   :  { %4038 = vmatpush3.bf16.msra.mxu0 %v4889_v21  ;;  %4041 = vmatprep.mubr.msk.bf16.mxu0 %vm4410_vm0, %v4409_v3 }
0x2c21   :  { %4039 = vmatprep.subr.bf16.mxu0 %v4409_v3 }
0x2c24   :  { %4040 = vmatpush3.bf16.msra.mxu0 %v4900_v7 }
0x2c25   :  { %4053 = vmatprep.subr.bf16.mxu0 %v4409_v3 }
0x2c8d   :  { %v4980_v34 = vpop.f32.mrb[44].mxu0 }
0x2c8e   :  { %v4982_v26 = vpop.f32.mrb[45].mxu0 }
0x2c8f   :  { %v4984_v41 = vpop.f32.mrb[46].mxu0  ;;  %v1528_v28 = vadd.f32 %v4927_v13, %v4982_v26 }
0x2c90   :  { %v4986_v31 = vpop.f32.mrb[47].mxu0 }
0x2cf2   :  { %v1733_v14 = vpop.f32.mrb[48].mxu0 }
0x2cf3   :  { %v1739_v33 = vadd.f32 %v1733_v14, %v1520_v52  ;;  %v4027_v53 = vpop.f32.mrb[49].mxu0 }
0x2cf4   :  { %v1736_v48 = vpop.f32.mrb[50].mxu0  ;;  %v1531_v53 = vadd.f32 %v4927_v13, %v4986_v31 }
0x2cf5   :  { %4317 = vtanh.f32 %v1739_v33  ;;  %v4028_v54 = vpop.f32.mrb[51].mxu0 }
0x2cff   :  { %v4318_v55 = vpop.eup %4317 }
0x2d00   :  { %1745 = vrot.lane.b32.xlu0 %v4318_v55, %s4412_s24  ;;  %v1741_v56 = vmul.f32 0.5, %v4318_v55 }
0x2d02   :  { %v1742_v58 = vadd.f32 0.5, %v1741_v56 }
0x2d04   :  { %v1743_v61 = vmul.f32 %v1742_v58, %v1679_v29 }
0x2d72   :  { %v1746_v59 = vpop.permute.xlu0 %1745 }
0x2d73   :  { %v1748_v60 = vmul.f32 %v1746_v59, %v1742_v58 }
0x2d75   :  { %1750 = vrot.lane.b32.xlu1 %v1748_v60, %s4413_s25 }
0x2de7   :  { %v1751_v8 = vpop.permute.xlu1 %1750 }
0x2de8   :  { %v1753_v2 = vadd.f32 %v1751_v8, %v1743_v61 }
0x2dea   :  { %4319 = vtanh.f32 %v1753_v2 }
0x2df4   :  { %v4320_v37 = vpop.eup %4319 }
0x2df5   :  { %1756 = vrot.lane.b32.xlu0 %v4320_v37, %s4412_s24 }
0x2e67   :  { %v1757_v18 = vpop.permute.xlu0 %1756 }
0x2e68   :  { %v4993_v57 = vmul.f32 %v1757_v18, %v1742_v58 }
0x2e6a   :  { %v1766_v63 = vpack.c.bf16 %v4993_v57, %v4993_v57 }
0x2e6c   :  { %1768 = vrot.lane.b32.xlu1 %v1766_v63, %s4413_s25 }
0x2ede   :  { %v1769_v46 = vpop.permute.xlu1 %1768 }
0x2edf   :  { %4034 = vmatmul.mubr.msk.bf16.vlgmr.msra.gmra.mrb[48].mxu1 %vm146_vm3, %v1769_v46 }
0x2ee0   :  { %4046 = vmatpush3.bf16.msra.mxu1 %v4889_v21  ;;  %4049 = vmatprep.mubr.msk.bf16.mxu1 %vm4410_vm0, %v4409_v3 }
0x2ee1   :  { %4047 = vmatprep.subr.bf16.mxu1 %v4409_v3 }
0x2ee4   :  { %4048 = vmatpush3.bf16.msra.mxu1 %v4900_v7 }
0x2ee5   :  { %4061 = vmatprep.subr.bf16.mxu1 %v4409_v3 }
0x2fb2   :  { %v1807_v0 = vpop.f32.mrb[48].mxu1 }
0x2fb3   :  { %v1813_v1 = vadd.f32 %v1807_v0, %v1523_v49  ;;  %v4035_v11 = vpop.f32.mrb[49].mxu1  ;;  %v1536_v0 = vadd.f32 %v4980_v34, %v4927_v13 }
0x2fb4   :  { %v1810_v4 = vpop.f32.mrb[50].mxu1 }
0x2fb5   :  { %4321 = vtanh.f32 %v1813_v1  ;;  %v4036_v10 = vpop.f32.mrb[51].mxu1 }
0x2fbf   :  { %v4322_v12 = vpop.eup %4321 }
0x2fc0   :  { %1819 = vrot.lane.b32.xlu0 %v4322_v12, %s4412_s24  ;;  %v1815_v22 = vmul.f32 0.5, %v4322_v12 }
0x2fc2   :  { %v1816_v23 = vadd.f32 0.5, %v1815_v22 }
0x2fc4   :  { %v1817_v25 = vmul.f32 %v1816_v23, %v1753_v2 }
0x3032   :  { %v1820_v24 = vpop.permute.xlu0 %1819 }
0x3033   :  { %v1822_v9 = vmul.f32 %v1820_v24, %v1816_v23 }
0x3035   :  { %1824 = vrot.lane.b32.xlu1 %v1822_v9, %s4413_s25 }
0x30a7   :  { %v1825_v17 = vpop.permute.xlu1 %1824 }
0x30a8   :  { %v1827_v35 = vadd.f32 %v1825_v17, %v1817_v25 }
0x30aa   :  { %4323 = vtanh.f32 %v1827_v35 }
0x30b4   :  { %v4324_v39 = vpop.eup %4323 }
0x30b5   :  { %1830 = vrot.lane.b32.xlu0 %v4324_v39, %s4412_s24 }
0x3127   :  { %v1831_v15 = vpop.permute.xlu0 %1830 }
0x3128   :  { %v5010_v50 = vmul.f32 %v1831_v15, %v1816_v23 }
0x312a   :  { %v1840_v32 = vpack.c.bf16 %v5010_v50, %v5010_v50 }
0x312c   :  { %1842 = vrot.lane.b32.xlu1 %v1840_v32, %s4413_s25  ;;  %v3647_v32 = vld [vmem:[%s5472_s2 + $0x40] sm:$0xff] }
0x319e   :  { %v1843_v27 = vpop.permute.xlu1 %1842 }
0x319f   :  { %4042 = vmatmul.mubr.msk.bf16.vlgmr.msra.gmra.mrb[52].mxu0 %vm146_vm3, %v1843_v27  ;;  %v3649_v27 = vld [vmem:[%s5472_s2 + $0x50] sm:$0xff] }
0x31a0   :  { %4054 = vmatpush3.bf16.msra.mxu0 %v4889_v21  ;;  %4057 = vmatprep.mubr.msk.bf16.mxu0 %vm4410_vm0, %v4409_v3 }
0x31a1   :  { %4055 = vmatprep.subr.bf16.mxu0 %v4409_v3 }
0x31a4   :  { %4056 = vmatpush3.bf16.msra.mxu0 %v4900_v7 }
0x3272   :  { %v1881_v29 = vpop.f32.mrb[52].mxu0 }
0x3273   :  { %v1887_v30 = vadd.f32 %v1881_v29, %v1528_v28  ;;  %v4043_v20 = vpop.f32.mrb[53].mxu0  ;;  %v3650_v28 = vld [vmem:[%s5472_s2 + $0x58] sm:$0xff] }
0x3274   :  { %v1884_v36 = vpop.f32.mrb[54].mxu0  ;;  %v2161_v29 = vpack.c.bf16 %v3650_v28, %v3649_v27 }
0x3275   :  { %4325 = vtanh.f32 %v1887_v30  ;;  %v4044_v40 = vpop.f32.mrb[55].mxu0 }
0x327f   :  { %v4326_v42 = vpop.eup %4325 }
0x3280   :  { %1893 = vrot.lane.b32.xlu0 %v4326_v42, %s4412_s24  ;;  %v1889_v43 = vmul.f32 0.5, %v4326_v42 }
0x3282   :  { %v1890_v6 = vadd.f32 0.5, %v1889_v43 }
0x3284   :  { %v1891_v45 = vmul.f32 %v1890_v6, %v1827_v35 }
0x32f2   :  { %v1894_v44 = vpop.permute.xlu0 %1893 }
0x32f3   :  { %v1896_v51 = vmul.f32 %v1894_v44, %v1890_v6 }
0x32f5   :  { %1898 = vrot.lane.b32.xlu1 %v1896_v51, %s4413_s25  ;;  %v3644_v51 = vld [vmem:[%s5469_s3 + $0x68] sm:$0xff] }
0x3367   :  { %v1899_v5 = vpop.permute.xlu1 %1898 }
0x3368   :  { %v1901_v47 = vadd.f32 %v1899_v5, %v1891_v45 }
0x336a   :  { %4327 = vtanh.f32 %v1901_v47 }
0x3374   :  { %v4328_v16 = vpop.eup %4327 }
0x3375   :  { %1904 = vrot.lane.b32.xlu0 %v4328_v16, %s4412_s24 }
0x33e7   :  { %v1905_v26 = vpop.permute.xlu0 %1904 }
0x33e8   :  { %v5026_v52 = vmul.f32 %v1905_v26, %v1890_v6  ;;  %v3645_v26 = vld [vmem:[%s5469_s3 + $0x70] sm:$0xff] }
0x33ea   :  { %v1914_v14 = vpack.c.bf16 %v5026_v52, %v5026_v52 }
0x33ec   :  { %1916 = vrot.lane.b32.xlu1 %v1914_v14, %s4413_s25  ;;  %v3646_v14 = vld [vmem:[%s5469_s3 + $0x78] sm:$0xff] }
0x345e   :  { %v1917_v33 = vpop.permute.xlu1 %1916 }
0x345f   :  { %4050 = vmatmul.mubr.msk.bf16.vlgmr.msra.gmra.mrb[52].mxu1 %vm146_vm3, %v1917_v33  ;;  %v5105_v33 = vpack.c.bf16 %v3646_v14, %v3645_v26 }
0x3460   :  { %4062 = vmatpush3.bf16.msra.mxu1 %v4889_v21  ;;  %4065 = vmatprep.mubr.msk.bf16.mxu1 %vm4410_vm0, %v4409_v3 }
0x3461   :  { %4063 = vmatprep.subr.bf16.mxu1 %v4409_v3 }
0x3464   :  { %4064 = vmatpush3.bf16.msra.mxu1 %v4900_v7 }
0x3465   :  { %4081 = vmatprep.subr.bf16.mxu1 %v4409_v3 }
0x3532   :  { %v1955_v48 = vpop.f32.mrb[52].mxu1 }
0x3533   :  { %v1961_v54 = vadd.f32 %v1955_v48, %v1531_v53  ;;  %v4051_v55 = vpop.f32.mrb[53].mxu1 }
0x3534   :  { %v1958_v56 = vpop.f32.mrb[54].mxu1 }
0x3535   :  { %4329 = vtanh.f32 %v1961_v54  ;;  %v4052_v58 = vpop.f32.mrb[55].mxu1 }
0x3536   :  { %v1539_v58 = vadd.f32 %v4984_v41, %v4927_v13 }
0x353f   :  { %v4330_v59 = vpop.eup %4329 }
0x3540   :  { %1967 = vrot.lane.b32.xlu0 %v4330_v59, %s4412_s24  ;;  %v1963_v21 = vmul.f32 0.5, %v4330_v59 }
0x3542   :  { %v1964_v60 = vadd.f32 0.5, %v1963_v21 }
0x3544   :  { %v1965_v7 = vmul.f32 %v1964_v60, %v1901_v47 }
0x35b2   :  { %v1968_v61 = vpop.permute.xlu0 %1967 }
0x35b3   :  { %v1970_v8 = vmul.f32 %v1968_v61, %v1964_v60 }
0x35b5   :  { %1972 = vrot.lane.b32.xlu1 %v1970_v8, %s4413_s25 }
0x3627   :  { %v1973_v2 = vpop.permute.xlu1 %1972 }
0x3628   :  { %v1975_v37 = vadd.f32 %v1973_v2, %v1965_v7  ;;  %v5132_v7 = vld [vmem:[%s5471_s4 + $0x3] ss:$0 sm:$0xff] }
0x362a   :  { %4331 = vtanh.f32 %v1975_v37 }
0x3634   :  { %v4332_v31 = vpop.eup %4331 }
0x3635   :  { %1978 = vrot.lane.b32.xlu0 %v4332_v31, %s4412_s24 }
0x36a7   :  { %v1979_v18 = vpop.permute.xlu0 %1978 }
0x36a8   :  { %v5043_v63 = vmul.f32 %v1979_v18, %v1964_v60 }
0x36aa   :  { %v1988_v46 = vpack.c.bf16 %v5043_v63, %v5043_v63 }
0x36ac   :  { %1990 = vrot.lane.b32.xlu1 %v1988_v46, %s4413_s25 }
0x371e   :  { %v1991_v49 = vpop.permute.xlu1 %1990 }
0x371f   :  { %4058 = vmatmul.mubr.msk.bf16.vlgmr.msra.gmra.mrb[56].mxu0 %vm146_vm3, %v1991_v49 }
0x37f2   :  { %v2029_v1 = vpop.f32.mrb[56].mxu0 }
0x37f3   :  { %v2035_v11 = vadd.f32 %v2029_v1, %v1536_v0  ;;  %v4059_v4 = vpop.f32.mrb[57].mxu0 }
0x37f4   :  { %v2032_v10 = vpop.f32.mrb[58].mxu0 }
0x37f5   :  { %4333 = vtanh.f32 %v2035_v11  ;;  %v4060_v12 = vpop.f32.mrb[59].mxu0 }
0x37ff   :  { %v4334_v22 = vpop.eup %4333 }
0x3800   :  { %2041 = vrot.lane.b32.xlu0 %v4334_v22, %s4412_s24  ;;  %v2037_v23 = vmul.f32 0.5, %v4334_v22 }
0x3802   :  { %v2038_v24 = vadd.f32 0.5, %v2037_v23 }
0x3804   :  { %v2039_v34 = vmul.f32 %v2038_v24, %v1975_v37 }
0x3872   :  { %v2042_v9 = vpop.permute.xlu0 %2041 }
0x3873   :  { %v2044_v25 = vmul.f32 %v2042_v9, %v2038_v24 }
0x3875   :  { %2046 = vrot.lane.b32.xlu1 %v2044_v25, %s4413_s25 }
0x3879   :  { %1613 = vrot.lane.b32.xlu1 %v4934_v62, %s4413_s25  ;;  %v3648_v62 = vld [vmem:[%s5472_s2 + $0x48] sm:$0xff] }
0x387d   :  { %1761 = vrot.lane.b32.xlu1 %v4993_v57, %s4413_s25  ;;  %v2160_v57 = vpack.c.bf16 %v3648_v62, %v3647_v32 }
0x387f   :  { %4069 = vmatprep.subr.bf16.mxu0 %v2160_v57 }
0x3880   :  { %4070 = vmatpush3.bf16.msra.mxu0 %v2160_v57 }
0x3881   :  { %4071 = vmatprep.subr.bf16.mxu0 %v2161_v29 }
0x3884   :  { %4072 = vmatpush3.bf16.msra.mxu0 %v2161_v29 }
0x3885   :  { %4097 = vmatprep.subr.bf16.mxu0 %v4409_v3 }
0x38e7   :  { %v2047_v17 = vpop.permute.xlu1 %2046 }
0x38e8   :  { %v5057_v35 = vadd.f32 %v2047_v17, %v2039_v34 }
0x38ea   :  { %4335 = vtanh.f32 %v5057_v35 }
0x38eb   :  { %v1614_v39 = vpop.permute.xlu1 %1613 }
0x38ec   :  { %1616 = vst.msk [vmem:[#allocation3] sm:$0xff] %vm146_vm3, %v1614_v39 }
0x38ef   :  { %v1762_v15 = vpop.permute.xlu1 %1761 }
0x38f0   :  { %1764 = vst.msk [vmem:[#allocation3 + $0x10] sm:$0xff] %vm146_vm3, %v1762_v15 }
0x38f3   :  { %v2143_v6 = vld [vmem:[#allocation3] sm:$0xff] }
0x38f4   :  { %v4336_v30 = vpop.eup %4335 }
0x38f5   :  { %2052 = vrot.lane.b32.xlu0 %v4336_v30, %s4412_s24 }
0x38f7   :  { %v2145_v45 = vld [vmem:[#allocation3 + $0x10] sm:$0xff] }
0x38f9   :  { %1687 = vrot.lane.b32.xlu0 %v4962_v38, %s4413_s25 }
0x38fd   :  { %1835 = vrot.lane.b32.xlu0 %v5010_v50, %s4413_s25  ;;  %v3643_v50 = vld [vmem:[%s5469_s3 + $0x60] sm:$0xff] }
0x38fe   :  { %v5094_v16 = vpack.c.bf16 %v3644_v51, %v3643_v50 }
0x3967   :  { %v2053_v20 = vpop.permute.xlu0 %2052 }
0x3968   :  { %v5080_v36 = vmul.f32 %v2053_v20, %v2038_v24 }
0x396a   :  { %v2062_v40 = vpack.c.bf16 %v5080_v36, %v5080_v36 }
0x396b   :  { %v1688_v42 = vpop.permute.xlu0 %1687 }
0x396c   :  { %1690 = vst.msk [vmem:[#allocation3 + $0x8] sm:$0xff] %vm146_vm3, %v1688_v42  ;;  %2064 = vrot.lane.b32.xlu1 %v2062_v40, %s4413_s25 }
0x396f   :  { %v1836_v43 = vpop.permute.xlu0 %1835 }
0x3970   :  { %1838 = vst.msk [vmem:[#allocation3 + $0x18] sm:$0xff] %vm146_vm3, %v1836_v43 }
0x3973   :  { %v2144_v44 = vld [vmem:[#allocation3 + $0x8] sm:$0xff] }
0x3974   :  { %v2156_v38 = vpack.c.bf16 %v2144_v44, %v2143_v6 }
0x3976   :  { %4073 = vmatprep.mubr.msk.bf16.mxu0 %vm146_vm3, %v2156_v38 }
0x3977   :  { %v2146_v5 = vld [vmem:[#allocation3 + $0x18] sm:$0xff] }
0x3978   :  { %v2157_v47 = vpack.c.bf16 %v2146_v5, %v2145_v45 }
0x397a   :  { %4074 = vmatmul.mubr.msk.bf16.vlgmr.msra.gmra.mrb[60].mxu0 %vm146_vm3, %v2157_v47 }
0x397b   :  { %4098 = vmatpush3.bf16.msra.mxu0 %v5094_v16 }
0x397c   :  { %4099 = vmatprep.subr.bf16.mxu0 %v4409_v3 }
0x397f   :  { %4100 = vmatpush3.bf16.msra.mxu0 %v5105_v33 }
0x3980   :  { %4113 = vmatprep.subr.bf16.mxu0 %v4409_v3 }
0x39de   :  { %v2065_v53 = vpop.permute.xlu1 %2064 }
0x39df   :  { %4066 = vmatmul.mubr.msk.bf16.vlgmr.msra.gmra.mrb[56].mxu1 %vm146_vm3, %v2065_v53 }
0x39e0   :  { %4082 = vmatpush3.bf16.msra.mxu1 %v5094_v16  ;;  %4085 = vmatprep.mubr.msk.bf16.mxu1 %vm4410_vm0, %v4409_v3 }
0x39e1   :  { %4083 = vmatprep.subr.bf16.mxu1 %v4409_v3 }
0x39e4   :  { %4084 = vmatpush3.bf16.msra.mxu1 %v5105_v33 }
0x39e5   :  { %4089 = vmatprep.subr.bf16.mxu1 %v4409_v3 }
0x39e7   :  { %4086 = vmatmul.mubr.bf16.vlgmr.msra.gmra.mrb[60].mxu1 %v4411_v19 }
0x39e8   :  { %4090 = vmatpush3.bf16.msra.mxu1 %v5094_v16  ;;  %4093 = vmatprep.mubr.msk.bf16.mxu1 %vm4410_vm0, %v4409_v3 }
0x39e9   :  { %4091 = vmatprep.subr.bf16.mxu1 %v4409_v3 }
0x39ec   :  { %4092 = vmatpush3.bf16.msra.mxu1 %v5105_v33 }
0x39ed   :  { %4105 = vmatprep.subr.bf16.mxu1 %v4409_v3 }
0x3a4d   :  { %v5123_v48 = vpop.f32.mrb[60].mxu0 }
0x3a4e   :  { %v2212_v54 = vpop.f32.mrb[61].mxu0 }
0x3a4f   :  { %v5125_v55 = vpop.f32.mrb[62].mxu0  ;;  %v2213_v2 = vadd.f32 %v5132_v7, %v2212_v54 }
0x3a50   :  { %v2215_v56 = vpop.f32.mrb[63].mxu0 }
0x3a51   :  { %v2216_v20 = vadd.f32 %v5132_v7, %v2215_v56 }
0x3ab2   :  { %v2103_v59 = vpop.f32.mrb[56].mxu1 }
0x3ab3   :  { %v2109_v21 = vadd.f32 %v2103_v59, %v1539_v58  ;;  %v4067_v60 = vpop.f32.mrb[57].mxu1 }
0x3ab4   :  { %v2106_v61 = vpop.f32.mrb[58].mxu1 }
0x3ab5   :  { %v4068_v8 = vpop.f32.mrb[59].mxu1 }
0x3aba   :  { %v2286_v37 = vpop.f32.mrb[60].mxu1 }
0x3abb   :  { %v2292_v31 = vadd.f32 %v2286_v37, %v2213_v2  ;;  %v4087_v18 = vpop.f32.mrb[61].mxu1 }
0x3abc   :  { %v2289_v46 = vpop.f32.mrb[62].mxu1 }
0x3abd   :  { %4337 = vtanh.f32 %v2292_v31  ;;  %v4088_v49 = vpop.f32.mrb[63].mxu1 }
0x3ac7   :  { %v4338_v0 = vpop.eup %4337 }
0x3ac8   :  { %2298 = vrot.lane.b32.xlu0 %v4338_v0, %s4412_s24  ;;  %v2294_v13 = vmul.f32 0.5, %v4338_v0  ;;  %v2221_v0 = vadd.f32 %v5123_v48, %v5132_v7 }
0x3aca   :  { %v2295_v41 = vadd.f32 0.5, %v2294_v13 }
0x3acc   :  { %v2296_v4 = vmul.f32 0.0, %v2295_v41 }
0x3b3a   :  { %v2299_v1 = vpop.permute.xlu0 %2298 }
0x3b3b   :  { %v2301_v11 = vmul.f32 %v2299_v1, %v2295_v41 }
0x3b3d   :  { %2303 = vrot.lane.b32.xlu1 %v2301_v11, %s4413_s25 }
0x3baf   :  { %v2304_v10 = vpop.permute.xlu1 %2303 }
0x3bb0   :  { %v2306_v12 = vadd.f32 %v2304_v10, %v2296_v4 }
0x3bb2   :  { %4339 = vtanh.f32 %v2306_v12 }
0x3bb3   :  { %4341 = vtanh.f32 %v2109_v21 }
0x3bbc   :  { %v4340_v22 = vpop.eup %4339 }
0x3bbd   :  { %2309 = vrot.lane.b32.xlu0 %v4340_v22, %s4412_s24  ;;  %v4342_v23 = vpop.eup %4341 }
0x3bbe   :  { %v2111_v24 = vmul.f32 0.5, %v4342_v23 }
0x3bc0   :  { %v2112_v17 = vadd.f32 0.5, %v2111_v24 }
0x3bc1   :  { %2115 = vrot.lane.b32.xlu0 %v4342_v23, %s4412_s24 }
0x3bc2   :  { %v2113_v62 = vmul.f32 %v2112_v17, %v5057_v35 }
0x3c2f   :  { %v2310_v9 = vpop.permute.xlu0 %2309 }
0x3c30   :  { %v5139_v25 = vmul.f32 %v2310_v9, %v2295_v41 }
0x3c32   :  { %v2319_v34 = vpack.c.bf16 %v5139_v25, %v5139_v25 }
0x3c33   :  { %v2116_v39 = vpop.permute.xlu0 %2115 }
0x3c34   :  { %v2118_v15 = vmul.f32 %v2116_v39, %v2112_v17  ;;  %2321 = vrot.lane.b32.xlu1 %v2319_v34, %s4413_s25 }
0x3c36   :  { %2120 = vrot.lane.b32.xlu0 %v2118_v15, %s4413_s25 }
0x3ca6   :  { %v2322_v32 = vpop.permute.xlu1 %2321 }
0x3ca7   :  { %4094 = vmatmul.mubr.msk.bf16.vlgmr.msra.gmra.mrb[64].mxu1 %vm146_vm3, %v2322_v32 }
0x3ca8   :  { %v2121_v57 = vpop.permute.xlu0 %2120  ;;  %4106 = vmatpush3.bf16.msra.mxu1 %v5094_v16  ;;  %4109 = vmatprep.mubr.msk.bf16.mxu1 %vm4410_vm0, %v4409_v3 }
0x3ca9   :  { %v2123_v27 = vadd.f32 %v2121_v57, %v2113_v62  ;;  %4107 = vmatprep.subr.bf16.mxu1 %v4409_v3  ;;  %v2224_v57 = vadd.f32 %v5125_v55, %v5132_v7 }
0x3cab   :  { %4343 = vtanh.f32 %v2123_v27 }
0x3cac   :  { %4108 = vmatpush3.bf16.msra.mxu1 %v5105_v33 }
0x3cad   :  { %4121 = vmatprep.subr.bf16.mxu1 %v4409_v3 }
0x3cb5   :  { %v4344_v28 = vpop.eup %4343 }
0x3cb6   :  { %2126 = vrot.lane.b32.xlu0 %v4344_v28, %s4412_s24 }
0x3cba   :  { %1909 = vrot.lane.b32.xlu0 %v5026_v52, %s4413_s25 }
0x3cbe   :  { %2057 = vrot.lane.b32.xlu0 %v5080_v36, %s4413_s25 }
0x3d28   :  { %v2127_v35 = vpop.permute.xlu0 %2126 }
0x3d29   :  { %v2129_v14 = vmul.f32 %v2127_v35, %v2112_v17 }
0x3d2c   :  { %v1910_v29 = vpop.permute.xlu0 %1909 }
0x3d2d   :  { %1912 = vst.msk [vmem:[#allocation3 + $0x20] sm:$0xff] %vm146_vm3, %v1910_v29 }
0x3d30   :  { %v2058_v30 = vpop.permute.xlu0 %2057 }
0x3d31   :  { %2060 = vst.msk [vmem:[#allocation3 + $0x30] sm:$0xff] %vm146_vm3, %v2058_v30 }
0x3d34   :  { %v2147_v21 = vld [vmem:[#allocation3 + $0x20] sm:$0xff] }
0x3d38   :  { %v2149_v61 = vld [vmem:[#allocation3 + $0x30] sm:$0xff] }
0x3d7a   :  { %v2360_v40 = vpop.f32.mrb[64].mxu1 }
0x3d7b   :  { %v2366_v42 = vadd.f32 %v2360_v40, %v2216_v20  ;;  %v4095_v43 = vpop.f32.mrb[65].mxu1 }
0x3d7c   :  { %v2363_v6 = vpop.f32.mrb[66].mxu1 }
0x3d7d   :  { %4345 = vtanh.f32 %v2366_v42  ;;  %v4096_v44 = vpop.f32.mrb[67].mxu1 }
0x3d87   :  { %v4346_v38 = vpop.eup %4345 }
0x3d88   :  { %2372 = vrot.lane.b32.xlu1 %v4346_v38, %s4412_s24  ;;  %v2368_v52 = vmul.f32 0.5, %v4346_v38 }
0x3d8a   :  { %v2369_v36 = vadd.f32 0.5, %v2368_v52 }
0x3d8c   :  { %v2370_v45 = vmul.f32 %v2369_v36, %v2306_v12 }
0x3dfa   :  { %v2373_v50 = vpop.permute.xlu1 %2372 }
0x3dfb   :  { %v2375_v51 = vmul.f32 %v2373_v50, %v2369_v36 }
0x3dfd   :  { %2377 = vrot.lane.b32.xlu1 %v2375_v51, %s4413_s25 }
0x3e6f   :  { %v2378_v5 = vpop.permute.xlu1 %2377 }
0x3e70   :  { %v2380_v47 = vadd.f32 %v2378_v5, %v2370_v45 }
0x3e72   :  { %4347 = vtanh.f32 %v2380_v47 }
0x3e7c   :  { %v4348_v26 = vpop.eup %4347 }
0x3e7d   :  { %2383 = vrot.lane.b32.xlu1 %v4348_v26, %s4412_s24 }
0x3e81   :  { %1983 = vrot.lane.b32.xlu1 %v5043_v63, %s4413_s25 }
0x3e85   :  { %2131 = vrot.lane.b32.xlu1 %v2129_v14, %s4413_s25 }
0x3eef   :  { %v2384_v53 = vpop.permute.xlu1 %2383 }
0x3ef0   :  { %v5167_v54 = vmul.f32 %v2384_v53, %v2369_v36 }
0x3ef2   :  { %v2393_v56 = vpack.c.bf16 %v5167_v54, %v5167_v54 }
0x3ef3   :  { %v1984_v58 = vpop.permute.xlu1 %1983 }
0x3ef4   :  { %1986 = vst.msk [vmem:[#allocation3 + $0x28] sm:$0xff] %vm146_vm3, %v1984_v58  ;;  %2395 = vrot.lane.b32.xlu0 %v2393_v56, %s4413_s25 }
0x3ef7   :  { %v2132_v59 = vpop.permute.xlu1 %2131 }
0x3ef8   :  { %2134 = vst.msk [vmem:[#allocation3 + $0x38] sm:$0xff] %vm146_vm3, %v2132_v59 }
0x3efb   :  { %v2148_v60 = vld [vmem:[#allocation3 + $0x28] sm:$0xff] }
0x3efc   :  { %v2158_v63 = vpack.c.bf16 %v2148_v60, %v2147_v21 }
0x3efe   :  { %4077 = vmatprep.mubr.msk.bf16.mxu0 %vm146_vm3, %v2158_v63 }
0x3eff   :  { %v2150_v8 = vld [vmem:[#allocation3 + $0x38] sm:$0xff] }
0x3f00   :  { %v2159_v2 = vpack.c.bf16 %v2150_v8, %v2149_v61 }
0x3f02   :  { %4078 = vmatmul.mubr.msk.bf16.gmra.mrb[64].mxu0 %vm146_vm3, %v2159_v2 }
0x3f03   :  { %4101 = vmatprep.mubr.msk.bf16.mxu0 %vm4410_vm0, %v4409_v3 }
0x3f66   :  { %v2396_v37 = vpop.permute.xlu0 %2395 }
0x3f67   :  { %4102 = vmatmul.mubr.msk.bf16.vlgmr.msra.gmra.mrb[68].mxu0 %vm146_vm3, %v2396_v37 }
0x3f68   :  { %4114 = vmatpush3.bf16.msra.mxu0 %v5094_v16  ;;  %4117 = vmatprep.mubr.msk.bf16.mxu0 %vm4410_vm0, %v4409_v3 }
0x3f69   :  { %4115 = vmatprep.subr.bf16.mxu0 %v4409_v3 }
0x3f6c   :  { %4116 = vmatpush3.bf16.msra.mxu0 %v5105_v33 }
0x3f6d   :  { %4129 = vmatprep.subr.bf16.mxu0 %v4409_v3 }
0x3fd5   :  { %v5185_v31 = vpop.f32.mrb[64].mxu0 }
0x3fd6   :  { %v5187_v18 = vpop.f32.mrb[65].mxu0 }
0x3fd7   :  { %v5189_v46 = vpop.f32.mrb[66].mxu0  ;;  %v2229_v5 = vadd.f32 %v5132_v7, %v5187_v18 }
0x3fd8   :  { %v5191_v49 = vpop.f32.mrb[67].mxu0 }
0x403a   :  { %v2434_v13 = vpop.f32.mrb[68].mxu0 }
0x403b   :  { %v2440_v41 = vadd.f32 %v2434_v13, %v2221_v0  ;;  %v4103_v1 = vpop.f32.mrb[69].mxu0 }
0x403c   :  { %v2437_v11 = vpop.f32.mrb[70].mxu0  ;;  %v2232_v1 = vadd.f32 %v5132_v7, %v5191_v49 }
0x403d   :  { %4349 = vtanh.f32 %v2440_v41  ;;  %v4104_v4 = vpop.f32.mrb[71].mxu0 }
0x4047   :  { %v4350_v10 = vpop.eup %4349 }
0x4048   :  { %2446 = vrot.lane.b32.xlu1 %v4350_v10, %s4412_s24  ;;  %v2442_v12 = vmul.f32 0.5, %v4350_v10 }
0x404a   :  { %v2443_v22 = vadd.f32 0.5, %v2442_v12 }
0x404c   :  { %v2444_v9 = vmul.f32 %v2443_v22, %v2380_v47 }
0x40ba   :  { %v2447_v23 = vpop.permute.xlu1 %2446 }
0x40bb   :  { %v2449_v24 = vmul.f32 %v2447_v23, %v2443_v22 }
0x40bd   :  { %2451 = vrot.lane.b32.xlu0 %v2449_v24, %s4413_s25 }
0x412f   :  { %v2452_v34 = vpop.permute.xlu0 %2451 }
0x4130   :  { %v2454_v17 = vadd.f32 %v2452_v34, %v2444_v9 }
0x4132   :  { %4351 = vtanh.f32 %v2454_v17 }
0x413c   :  { %v4352_v48 = vpop.eup %4351 }
0x413d   :  { %2457 = vrot.lane.b32.xlu1 %v4352_v48, %s4412_s24 }
0x41af   :  { %v2458_v39 = vpop.permute.xlu1 %2457 }
0x41b0   :  { %v5198_v15 = vmul.f32 %v2458_v39, %v2443_v22 }
0x41b2   :  { %v2467_v32 = vpack.c.bf16 %v5198_v15, %v5198_v15 }
0x41b4   :  { %2469 = vrot.lane.b32.xlu0 %v2467_v32, %s4413_s25 }
0x4226   :  { %v2470_v62 = vpop.permute.xlu0 %2469 }
0x4227   :  { %4110 = vmatmul.mubr.msk.bf16.vlgmr.msra.gmra.mrb[68].mxu1 %vm146_vm3, %v2470_v62 }
0x4228   :  { %4122 = vmatpush3.bf16.msra.mxu1 %v5094_v16  ;;  %4125 = vmatprep.mubr.msk.bf16.mxu1 %vm4410_vm0, %v4409_v3 }
0x4229   :  { %4123 = vmatprep.subr.bf16.mxu1 %v4409_v3 }
0x422c   :  { %4124 = vmatpush3.bf16.msra.mxu1 %v5105_v33 }
0x422d   :  { %4137 = vmatprep.subr.bf16.mxu1 %v4409_v3 }
0x42fa   :  { %v2508_v27 = vpop.f32.mrb[68].mxu1 }
0x42fb   :  { %v2514_v28 = vadd.f32 %v2508_v27, %v2224_v57  ;;  %v4111_v35 = vpop.f32.mrb[69].mxu1  ;;  %v2237_v27 = vadd.f32 %v5185_v31, %v5132_v7 }
0x42fc   :  { %v2511_v29 = vpop.f32.mrb[70].mxu1 }
0x42fd   :  { %4353 = vtanh.f32 %v2514_v28  ;;  %v4112_v30 = vpop.f32.mrb[71].mxu1 }
0x4307   :  { %v4354_v20 = vpop.eup %4353 }
0x4308   :  { %2520 = vrot.lane.b32.xlu1 %v4354_v20, %s4412_s24  ;;  %v2516_v40 = vmul.f32 0.5, %v4354_v20 }
0x430a   :  { %v2517_v42 = vadd.f32 0.5, %v2516_v40 }
0x430c   :  { %v2518_v44 = vmul.f32 %v2517_v42, %v2454_v17 }
0x437a   :  { %v2521_v43 = vpop.permute.xlu1 %2520 }
0x437b   :  { %v2523_v6 = vmul.f32 %v2521_v43, %v2517_v42 }
0x437d   :  { %2525 = vrot.lane.b32.xlu0 %v2523_v6, %s4413_s25 }
0x43ef   :  { %v2526_v38 = vpop.permute.xlu0 %2525 }
0x43f0   :  { %v2528_v52 = vadd.f32 %v2526_v38, %v2518_v44 }
0x43f2   :  { %4355 = vtanh.f32 %v2528_v52 }
0x43fc   :  { %v4356_v55 = vpop.eup %4355 }
0x43fd   :  { %2531 = vrot.lane.b32.xlu1 %v4356_v55, %s4412_s24 }
0x446f   :  { %v2532_v36 = vpop.permute.xlu1 %2531 }
0x4470   :  { %v5215_v50 = vmul.f32 %v2532_v36, %v2517_v42 }
0x4472   :  { %v2541_v51 = vpack.c.bf16 %v5215_v50, %v5215_v50 }
0x4474   :  { %2543 = vrot.lane.b32.xlu0 %v2541_v51, %s4413_s25  ;;  %v3667_v51 = vld [vmem:[%s5472_s2 + $0x60] sm:$0xff] }
0x44e6   :  { %v2544_v45 = vpop.permute.xlu0 %2543 }
0x44e7   :  { %4118 = vmatmul.mubr.msk.bf16.vlgmr.msra.gmra.mrb[72].mxu0 %vm146_vm3, %v2544_v45  ;;  %v3669_v45 = vld [vmem:[%s5472_s2 + $0x70] sm:$0xff] }
0x44e8   :  { %4130 = vmatpush3.bf16.msra.mxu0 %v5094_v16  ;;  %4133 = vmatprep.mubr.msk.bf16.mxu0 %vm4410_vm0, %v4409_v3 }
0x44e9   :  { %4131 = vmatprep.subr.bf16.mxu0 %v4409_v3 }
0x44ec   :  { %4132 = vmatpush3.bf16.msra.mxu0 %v5105_v33 }
0x45ba   :  { %v2582_v47 = vpop.f32.mrb[72].mxu0 }
0x45bb   :  { %v2588_v26 = vadd.f32 %v2582_v47, %v2229_v5  ;;  %v4119_v14 = vpop.f32.mrb[73].mxu0  ;;  %v3670_v5 = vld [vmem:[%s5472_s2 + $0x78] sm:$0xff] }
0x45bc   :  { %v2585_v53 = vpop.f32.mrb[74].mxu0  ;;  %v2862_v47 = vpack.c.bf16 %v3670_v5, %v3669_v45 }
0x45bd   :  { %4357 = vtanh.f32 %v2588_v26  ;;  %v4120_v56 = vpop.f32.mrb[75].mxu0 }
0x45c7   :  { %v4358_v58 = vpop.eup %4357 }
0x45c8   :  { %2594 = vrot.lane.b32.xlu1 %v4358_v58, %s4412_s24  ;;  %v2590_v59 = vmul.f32 0.5, %v4358_v58 }
0x45ca   :  { %v2591_v21 = vadd.f32 0.5, %v2590_v59 }
0x45cc   :  { %v2592_v61 = vmul.f32 %v2591_v21, %v2528_v52 }
0x463a   :  { %v2595_v60 = vpop.permute.xlu1 %2594 }
0x463b   :  { %v2597_v63 = vmul.f32 %v2595_v60, %v2591_v21 }
0x463d   :  { %2599 = vrot.lane.b32.xlu0 %v2597_v63, %s4413_s25  ;;  %v3664_v63 = vld [vmem:[%s5469_s3 + $0x88] sm:$0xff] }
0x46af   :  { %v2600_v8 = vpop.permute.xlu0 %2599 }
0x46b0   :  { %v2602_v2 = vadd.f32 %v2600_v8, %v2592_v61 }
0x46b2   :  { %4359 = vtanh.f32 %v2602_v2 }
0x46bc   :  { %v4360_v37 = vpop.eup %4359 }
0x46bd   :  { %2605 = vrot.lane.b32.xlu1 %v4360_v37, %s4412_s24 }
0x472f   :  { %v2606_v18 = vpop.permute.xlu1 %2605 }
0x4730   :  { %v5231_v0 = vmul.f32 %v2606_v18, %v2591_v21  ;;  %v3665_v18 = vld [vmem:[%s5469_s3 + $0x90] sm:$0xff] }
0x4732   :  { %v2615_v13 = vpack.c.bf16 %v5231_v0, %v5231_v0 }
0x4734   :  { %2617 = vrot.lane.b32.xlu0 %v2615_v13, %s4413_s25  ;;  %v3666_v13 = vld [vmem:[%s5469_s3 + $0x98] sm:$0xff] }
0x47a6   :  { %v2618_v41 = vpop.permute.xlu0 %2617 }
0x47a7   :  { %4126 = vmatmul.mubr.msk.bf16.vlgmr.msra.gmra.mrb[72].mxu1 %vm146_vm3, %v2618_v41  ;;  %v5310_v41 = vpack.c.bf16 %v3666_v13, %v3665_v18 }
0x47a8   :  { %4138 = vmatpush3.bf16.msra.mxu1 %v5094_v16  ;;  %4141 = vmatprep.mubr.msk.bf16.mxu1 %vm4410_vm0, %v4409_v3 }
0x47a9   :  { %4139 = vmatprep.subr.bf16.mxu1 %v4409_v3 }
0x47ac   :  { %4140 = vmatpush3.bf16.msra.mxu1 %v5105_v33 }
0x47ad   :  { %4157 = vmatprep.subr.bf16.mxu1 %v4409_v3 }
0x487a   :  { %v2656_v11 = vpop.f32.mrb[72].mxu1 }
0x487b   :  { %v2662_v4 = vadd.f32 %v2656_v11, %v2232_v1  ;;  %v4127_v10 = vpop.f32.mrb[73].mxu1 }
0x487c   :  { %v2659_v12 = vpop.f32.mrb[74].mxu1 }
0x487d   :  { %4361 = vtanh.f32 %v2662_v4  ;;  %v4128_v22 = vpop.f32.mrb[75].mxu1 }
0x4887   :  { %v4362_v23 = vpop.eup %4361 }
0x4888   :  { %2668 = vrot.lane.b32.xlu1 %v4362_v23, %s4412_s24  ;;  %v2664_v16 = vmul.f32 0.5, %v4362_v23 }
0x488a   :  { %v2665_v24 = vadd.f32 0.5, %v2664_v16 }
0x488c   :  { %v2666_v33 = vmul.f32 %v2665_v24, %v2602_v2 }
0x48fa   :  { %v2669_v9 = vpop.permute.xlu1 %2668 }
0x48fb   :  { %v2671_v34 = vmul.f32 %v2669_v9, %v2665_v24 }
0x48fd   :  { %2673 = vrot.lane.b32.xlu0 %v2671_v34, %s4413_s25  ;;  %v5337_v34 = vld [vmem:[%s5471_s4 + $0x4] ss:$0 sm:$0xff] }
0x496f   :  { %v2674_v17 = vpop.permute.xlu0 %2673 }
0x4970   :  { %v2676_v48 = vadd.f32 %v2674_v17, %v2666_v33 }
0x4972   :  { %4363 = vtanh.f32 %v2676_v48 }
0x497c   :  { %v4364_v49 = vpop.eup %4363 }
0x497d   :  { %2679 = vrot.lane.b32.xlu1 %v4364_v49, %s4412_s24 }
0x49ef   :  { %v2680_v39 = vpop.permute.xlu1 %2679 }
0x49f0   :  { %v5248_v32 = vmul.f32 %v2680_v39, %v2665_v24 }
0x49f2   :  { %v2689_v62 = vpack.c.bf16 %v5248_v32, %v5248_v32 }
0x49f4   :  { %2691 = vrot.lane.b32.xlu0 %v2689_v62, %s4413_s25 }
0x4a66   :  { %v2692_v57 = vpop.permute.xlu0 %2691 }
0x4a67   :  { %4134 = vmatmul.mubr.msk.bf16.vlgmr.msra.gmra.mrb[76].mxu0 %vm146_vm3, %v2692_v57 }
0x4b3a   :  { %v2730_v28 = vpop.f32.mrb[76].mxu0 }
0x4b3b   :  { %v2736_v35 = vadd.f32 %v2730_v28, %v2237_v27  ;;  %v4135_v29 = vpop.f32.mrb[77].mxu0 }
0x4b3c   :  { %v2733_v30 = vpop.f32.mrb[78].mxu0 }
0x4b3d   :  { %4365 = vtanh.f32 %v2736_v35  ;;  %v4136_v20 = vpop.f32.mrb[79].mxu0 }
0x4b47   :  { %v4366_v40 = vpop.eup %4365 }
0x4b48   :  { %2742 = vrot.lane.b32.xlu1 %v4366_v40, %s4412_s24  ;;  %v2738_v42 = vmul.f32 0.5, %v4366_v40 }
0x4b4a   :  { %v2739_v43 = vadd.f32 0.5, %v2738_v42 }
0x4b4c   :  { %v2740_v31 = vmul.f32 %v2739_v43, %v2676_v48 }
0x4bba   :  { %v2743_v6 = vpop.permute.xlu1 %2742 }
0x4bbb   :  { %v2745_v44 = vmul.f32 %v2743_v6, %v2739_v43 }
0x4bbd   :  { %2747 = vrot.lane.b32.xlu0 %v2745_v44, %s4413_s25 }
0x4bc1   :  { %2314 = vrot.lane.b32.xlu0 %v5139_v25, %s4413_s25  ;;  %v3668_v25 = vld [vmem:[%s5472_s2 + $0x68] sm:$0xff] }
0x4bc5   :  { %2462 = vrot.lane.b32.xlu0 %v5198_v15, %s4413_s25  ;;  %v2861_v15 = vpack.c.bf16 %v3668_v25, %v3667_v51 }
0x4bc7   :  { %4145 = vmatprep.subr.bf16.mxu0 %v2861_v15 }
0x4bc8   :  { %4146 = vmatpush3.bf16.msra.mxu0 %v2861_v15 }
0x4bc9   :  { %4147 = vmatprep.subr.bf16.mxu0 %v2862_v47 }
0x4bcc   :  { %4148 = vmatpush3.bf16.msra.mxu0 %v2862_v47 }
0x4bcd   :  { %4173 = vmatprep.subr.bf16.mxu0 %v4409_v3 }
0x4c2f   :  { %v2748_v38 = vpop.permute.xlu0 %2747 }
0x4c30   :  { %v5262_v52 = vadd.f32 %v2748_v38, %v2740_v31 }
0x4c32   :  { %4367 = vtanh.f32 %v5262_v52 }
0x4c33   :  { %v2315_v55 = vpop.permute.xlu0 %2314 }
0x4c34   :  { %2317 = vst.msk [vmem:[#allocation3] sm:$0xff] %vm146_vm3, %v2315_v55 }
0x4c37   :  { %v2463_v36 = vpop.permute.xlu0 %2462 }
0x4c38   :  { %2465 = vst.msk [vmem:[#allocation3 + $0x10] sm:$0xff] %vm146_vm3, %v2463_v36 }
0x4c3b   :  { %v2844_v21 = vld [vmem:[#allocation3] sm:$0xff] }
0x4c3c   :  { %v4368_v26 = vpop.eup %4367 }
0x4c3d   :  { %2753 = vrot.lane.b32.xlu1 %v4368_v26, %s4412_s24 }
0x4c3f   :  { %v2846_v61 = vld [vmem:[#allocation3 + $0x10] sm:$0xff] }
0x4c41   :  { %2388 = vrot.lane.b32.xlu1 %v5167_v54, %s4413_s25 }
0x4c45   :  { %2536 = vrot.lane.b32.xlu1 %v5215_v50, %s4413_s25  ;;  %v3663_v50 = vld [vmem:[%s5469_s3 + $0x80] sm:$0xff] }
0x4c46   :  { %v5299_v37 = vpack.c.bf16 %v3664_v63, %v3663_v50 }
0x4caf   :  { %v2754_v14 = vpop.permute.xlu1 %2753 }
0x4cb0   :  { %v5285_v53 = vmul.f32 %v2754_v14, %v2739_v43 }
0x4cb2   :  { %v2763_v56 = vpack.c.bf16 %v5285_v53, %v5285_v53 }
0x4cb3   :  { %v2389_v58 = vpop.permute.xlu1 %2388 }
0x4cb4   :  { %2391 = vst.msk [vmem:[#allocation3 + $0x8] sm:$0xff] %vm146_vm3, %v2389_v58  ;;  %2765 = vrot.lane.b32.xlu0 %v2763_v56, %s4413_s25 }
0x4cb7   :  { %v2537_v59 = vpop.permute.xlu1 %2536 }
0x4cb8   :  { %2539 = vst.msk [vmem:[#allocation3 + $0x18] sm:$0xff] %vm146_vm3, %v2537_v59 }
0x4cbb   :  { %v2845_v60 = vld [vmem:[#allocation3 + $0x8] sm:$0xff] }
0x4cbc   :  { %v2857_v54 = vpack.c.bf16 %v2845_v60, %v2844_v21 }
0x4cbe   :  { %4149 = vmatprep.mubr.msk.bf16.mxu0 %vm146_vm3, %v2857_v54 }
0x4cbf   :  { %v2847_v8 = vld [vmem:[#allocation3 + $0x18] sm:$0xff] }
0x4cc0   :  { %v2858_v2 = vpack.c.bf16 %v2847_v8, %v2846_v61 }
0x4cc2   :  { %4150 = vmatmul.mubr.msk.bf16.vlgmr.msra.gmra.mrb[80].mxu0 %vm146_vm3, %v2858_v2 }
0x4cc3   :  { %4174 = vmatpush3.bf16.msra.mxu0 %v5299_v37 }
0x4cc4   :  { %4175 = vmatprep.subr.bf16.mxu0 %v4409_v3 }
0x4cc7   :  { %4176 = vmatpush3.bf16.msra.mxu0 %v5310_v41 }
0x4cc8   :  { %4189 = vmatprep.subr.bf16.mxu0 %v4409_v3 }
0x4d26   :  { %v2766_v1 = vpop.permute.xlu0 %2765 }
0x4d27   :  { %4142 = vmatmul.mubr.msk.bf16.vlgmr.msra.gmra.mrb[76].mxu1 %vm146_vm3, %v2766_v1 }
0x4d28   :  { %4158 = vmatpush3.bf16.msra.mxu1 %v5299_v37  ;;  %4161 = vmatprep.mubr.msk.bf16.mxu1 %vm4410_vm0, %v4409_v3 }
0x4d29   :  { %4159 = vmatprep.subr.bf16.mxu1 %v4409_v3 }
0x4d2c   :  { %4160 = vmatpush3.bf16.msra.mxu1 %v5310_v41 }
0x4d2d   :  { %4165 = vmatprep.subr.bf16.mxu1 %v4409_v3 }
0x4d2f   :  { %4162 = vmatmul.mubr.bf16.vlgmr.msra.gmra.mrb[80].mxu1 %v4411_v19  ;;  %v2240_v19 = vadd.f32 %v5189_v46, %v5132_v7 }
0x4d30   :  { %4166 = vmatpush3.bf16.msra.mxu1 %v5299_v37  ;;  %4169 = vmatprep.mubr.msk.bf16.mxu1 %vm4410_vm0, %v4409_v3 }
0x4d31   :  { %4167 = vmatprep.subr.bf16.mxu1 %v4409_v3 }
0x4d34   :  { %4168 = vmatpush3.bf16.msra.mxu1 %v5310_v41 }
0x4d35   :  { %4181 = vmatprep.subr.bf16.mxu1 %v4409_v3 }
0x4d95   :  { %v5328_v11 = vpop.f32.mrb[80].mxu0 }
0x4d96   :  { %v2913_v4 = vpop.f32.mrb[81].mxu0 }
0x4d97   :  { %v5330_v10 = vpop.f32.mrb[82].mxu0  ;;  %v2914_v33 = vadd.f32 %v5337_v34, %v2913_v4 }
0x4d98   :  { %v2916_v12 = vpop.f32.mrb[83].mxu0 }
0x4d99   :  { %v2917_v26 = vadd.f32 %v5337_v34, %v2916_v12 }
0x4dfa   :  { %v2804_v22 = vpop.f32.mrb[76].mxu1 }
0x4dfb   :  { %v2810_v23 = vadd.f32 %v2804_v22, %v2240_v19  ;;  %v4143_v16 = vpop.f32.mrb[77].mxu1 }
0x4dfc   :  { %v2807_v24 = vpop.f32.mrb[78].mxu1 }
0x4dfd   :  { %v4144_v9 = vpop.f32.mrb[79].mxu1 }
0x4e02   :  { %v2987_v17 = vpop.f32.mrb[80].mxu1 }
0x4e03   :  { %v2993_v48 = vadd.f32 %v2987_v17, %v2914_v33  ;;  %v4163_v49 = vpop.f32.mrb[81].mxu1 }
0x4e04   :  { %v2990_v39 = vpop.f32.mrb[82].mxu1 }
0x4e05   :  { %4369 = vtanh.f32 %v2993_v48  ;;  %v4164_v62 = vpop.f32.mrb[83].mxu1 }
0x4e06   :  { %v2922_v62 = vadd.f32 %v5328_v11, %v5337_v34 }
0x4e0f   :  { %v4370_v57 = vpop.eup %4369 }
0x4e10   :  { %2999 = vrot.lane.b32.xlu1 %v4370_v57, %s4412_s24  ;;  %v2995_v7 = vmul.f32 0.5, %v4370_v57 }
0x4e12   :  { %v2996_v46 = vadd.f32 0.5, %v2995_v7 }
0x4e14   :  { %v2997_v35 = vmul.f32 0.0, %v2996_v46 }
0x4e82   :  { %v3000_v27 = vpop.permute.xlu1 %2999 }
0x4e83   :  { %v3002_v28 = vmul.f32 %v3000_v27, %v2996_v46 }
0x4e85   :  { %3004 = vrot.lane.b32.xlu0 %v3002_v28, %s4413_s25 }
0x4ef7   :  { %v3005_v29 = vpop.permute.xlu0 %3004 }
0x4ef8   :  { %v3007_v30 = vadd.f32 %v3005_v29, %v2997_v35 }
0x4efa   :  { %4371 = vtanh.f32 %v3007_v30 }
0x4efb   :  { %4373 = vtanh.f32 %v2810_v23 }
0x4f04   :  { %v4372_v20 = vpop.eup %4371 }
0x4f05   :  { %3010 = vrot.lane.b32.xlu1 %v4372_v20, %s4412_s24  ;;  %v4374_v40 = vpop.eup %4373 }
0x4f06   :  { %v2812_v42 = vmul.f32 0.5, %v4374_v40 }
0x4f08   :  { %v2813_v31 = vadd.f32 0.5, %v2812_v42 }
0x4f09   :  { %2816 = vrot.lane.b32.xlu1 %v4374_v40, %s4412_s24 }
0x4f0a   :  { %v2814_v51 = vmul.f32 %v2813_v31, %v5262_v52 }
0x4f77   :  { %v3011_v43 = vpop.permute.xlu1 %3010 }
0x4f78   :  { %v3013_v6 = vmul.f32 %v3011_v43, %v2996_v46 }
0x4f7a   :  { %v3015_v44 = vpack.c.bf16 %v3013_v6, %v3013_v6 }
0x4f7b   :  { %v2817_v38 = vpop.permute.xlu1 %2816 }
0x4f7c   :  { %v2819_v55 = vmul.f32 %v2817_v38, %v2813_v31  ;;  %3017 = vrot.lane.b32.xlu0 %v3015_v44, %s4413_s25 }
0x4f7e   :  { %2821 = vrot.lane.b32.xlu1 %v2819_v55, %s4413_s25 }
0x4fee   :  { %v3018_v36 = vpop.permute.xlu0 %3017 }
0x4fef   :  { %4170 = vmatmul.mubr.msk.bf16.vlgmr.msra.gmra.mrb[84].mxu1 %vm146_vm3, %v3018_v36  ;;  %v2925_v36 = vadd.f32 %v5330_v10, %v5337_v34 }
0x4ff0   :  { %v2822_v25 = vpop.permute.xlu1 %2821  ;;  %4182 = vmatpush3.bf16.msra.mxu1 %v5299_v37  ;;  %4185 = vmatprep.mubr.msk.bf16.mxu1 %vm4410_vm0, %v4409_v3 }
0x4ff1   :  { %v2824_v15 = vadd.f32 %v2822_v25, %v2814_v51  ;;  %4183 = vmatprep.subr.bf16.mxu1 %v4409_v3 }
0x4ff3   :  { %4375 = vtanh.f32 %v2824_v15 }
0x4ff4   :  { %4184 = vmatpush3.bf16.msra.mxu1 %v5310_v41 }
0x4ff5   :  { %4197 = vmatprep.subr.bf16.mxu1 %v4409_v3 }
0x4ffd   :  { %v4376_v45 = vpop.eup %4375 }
0x4ffe   :  { %2827 = vrot.lane.b32.xlu1 %v4376_v45, %s4412_s24 }
0x5002   :  { %2610 = vrot.lane.b32.xlu1 %v5231_v0, %s4413_s25 }
0x5006   :  { %2758 = vrot.lane.b32.xlu1 %v5285_v53, %s4413_s25 }
0x5070   :  { %v2828_v52 = vpop.permute.xlu1 %2827 }
0x5071   :  { %v2830_v18 = vmul.f32 %v2828_v52, %v2813_v31 }
0x5074   :  { %v2611_v5 = vpop.permute.xlu1 %2610 }
0x5075   :  { %2613 = vst.msk [vmem:[#allocation3 + $0x20] sm:$0xff] %vm146_vm3, %v2611_v5 }
0x5078   :  { %v2759_v47 = vpop.permute.xlu1 %2758 }
0x5079   :  { %2761 = vst.msk [vmem:[#allocation3 + $0x30] sm:$0xff] %vm146_vm3, %v2759_v47 }
0x507c   :  { %v2848_v22 = vld [vmem:[#allocation3 + $0x20] sm:$0xff] }
0x50c2   :  { %v3056_v14 = vpop.f32.mrb[84].mxu1 }
0x50c3   :  { %v3062_v56 = vadd.f32 %v3056_v14, %v2917_v26  ;;  %v4171_v58 = vpop.f32.mrb[85].mxu1 }
0x50c4   :  { %v3059_v59 = vpop.f32.mrb[86].mxu1 }
0x50c5   :  { %4377 = vtanh.f32 %v3062_v56  ;;  %v4172_v21 = vpop.f32.mrb[87].mxu1 }
0x50cf   :  { %v4378_v60 = vpop.eup %4377 }
0x50d0   :  { %3068 = vrot.lane.b32.xlu0 %v4378_v60, %s4412_s24  ;;  %v3064_v0 = vmul.f32 0.5, %v4378_v60 }
0x50d2   :  { %v3065_v53 = vadd.f32 0.5, %v3064_v0 }
0x50d4   :  { %v3066_v63 = vmul.f32 %v3065_v53, %v3007_v30 }
0x5142   :  { %v3069_v54 = vpop.permute.xlu0 %3068 }
0x5143   :  { %v3071_v50 = vmul.f32 %v3069_v54, %v3065_v53 }
0x5145   :  { %3073 = vrot.lane.b32.xlu0 %v3071_v50, %s4413_s25 }
0x51b7   :  { %v3074_v61 = vpop.permute.xlu0 %3073 }
0x51b8   :  { %v3076_v8 = vadd.f32 %v3074_v61, %v3066_v63 }
0x51ba   :  { %4379 = vtanh.f32 %v3076_v8 }
0x51c4   :  { %v4380_v2 = vpop.eup %4379 }
0x51c5   :  { %3079 = vrot.lane.b32.xlu0 %v4380_v2, %s4412_s24 }
0x51c9   :  { %2684 = vrot.lane.b32.xlu0 %v5248_v32, %s4413_s25  ;;  %v2850_v32 = vld [vmem:[#allocation3 + $0x30] sm:$0xff] }
0x51cd   :  { %2832 = vrot.lane.b32.xlu0 %v2830_v18, %s4413_s25 }
0x5237   :  { %v3080_v13 = vpop.permute.xlu0 %3079 }
0x5238   :  { %v3082_v1 = vmul.f32 %v3080_v13, %v3065_v53 }
0x523a   :  { %v3084_v4 = vpack.c.bf16 %v3082_v1, %v3082_v1 }
0x523b   :  { %v2685_v12 = vpop.permute.xlu0 %2684 }
0x523c   :  { %2687 = vst.msk [vmem:[#allocation3 + $0x28] sm:$0xff] %vm146_vm3, %v2685_v12  ;;  %3086 = vrot.lane.b32.xlu1 %v3084_v4, %s4413_s25 }
0x523f   :  { %v2833_v19 = vpop.permute.xlu0 %2832 }
0x5240   :  { %2835 = vst.msk [vmem:[#allocation3 + $0x38] sm:$0xff] %vm146_vm3, %v2833_v19 }
0x5243   :  { %v2849_v23 = vld [vmem:[#allocation3 + $0x28] sm:$0xff] }
0x5244   :  { %v2859_v16 = vpack.c.bf16 %v2849_v23, %v2848_v22 }
0x5246   :  { %4153 = vmatprep.mubr.msk.bf16.mxu0 %vm146_vm3, %v2859_v16 }
0x5247   :  { %v2851_v24 = vld [vmem:[#allocation3 + $0x38] sm:$0xff] }
0x5248   :  { %v2860_v9 = vpack.c.bf16 %v2851_v24, %v2850_v32 }
0x524a   :  { %4154 = vmatmul.mubr.msk.bf16.gmra.mrb[84].mxu0 %vm146_vm3, %v2860_v9 }
0x524b   :  { %4177 = vmatprep.mubr.msk.bf16.mxu0 %vm4410_vm0, %v4409_v3 }
0x52ae   :  { %v3087_v33 = vpop.permute.xlu1 %3086 }
0x52af   :  { %4178 = vmatmul.mubr.msk.bf16.vlgmr.msra.gmra.mrb[88].mxu0 %vm146_vm3, %v3087_v33 }
0x52b0   :  { %4190 = vmatpush3.bf16.msra.mxu0 %v5299_v37  ;;  %4193 = vmatprep.mubr.msk.bf16.mxu0 %vm4410_vm0, %v4409_v3 }
0x52b1   :  { %4191 = vmatprep.subr.bf16.mxu0 %v4409_v3 }
0x52b4   :  { %4192 = vmatpush3.bf16.msra.mxu0 %v5310_v41 }
0x52b5   :  { %4205 = vmatprep.subr.bf16.mxu0 %v4409_v3 }
0x531d   :  { %v5382_v17 = vpop.f32.mrb[84].mxu0 }
0x531e   :  { %v5384_v48 = vpop.f32.mrb[85].mxu0 }
0x531f   :  { %v5386_v49 = vpop.f32.mrb[86].mxu0  ;;  %v2930_v50 = vadd.f32 %v5337_v34, %v5384_v48 }
0x5320   :  { %v5388_v39 = vpop.f32.mrb[87].mxu0 }
0x5382   :  { %v3125_v57 = vpop.f32.mrb[88].mxu0 }
0x5383   :  { %v3131_v7 = vadd.f32 %v3125_v57, %v2922_v62  ;;  %v4179_v46 = vpop.f32.mrb[89].mxu0  ;;  %v2933_v62 = vadd.f32 %v5337_v34, %v5388_v39 }
0x5384   :  { %v3128_v27 = vpop.f32.mrb[90].mxu0 }
0x5385   :  { %4381 = vtanh.f32 %v3131_v7  ;;  %v4180_v28 = vpop.f32.mrb[91].mxu0 }
0x538f   :  { %v4382_v35 = vpop.eup %4381 }
0x5390   :  { %3137 = vrot.lane.b32.xlu0 %v4382_v35, %s4412_s24  ;;  %v3133_v29 = vmul.f32 0.5, %v4382_v35 }
0x5392   :  { %v3134_v30 = vadd.f32 0.5, %v3133_v29 }
0x5394   :  { %v3135_v42 = vmul.f32 %v3134_v30, %v3076_v8 }
0x5402   :  { %v3138_v20 = vpop.permute.xlu0 %3137 }
0x5403   :  { %v3140_v40 = vmul.f32 %v3138_v20, %v3134_v30 }
0x5405   :  { %3142 = vrot.lane.b32.xlu1 %v3140_v40, %s4413_s25 }
0x5477   :  { %v3143_v43 = vpop.permute.xlu1 %3142 }
0x5478   :  { %v3145_v6 = vadd.f32 %v3143_v43, %v3135_v42 }
0x547a   :  { %4383 = vtanh.f32 %v3145_v6 }
0x5484   :  { %v4384_v11 = vpop.eup %4383 }
0x5485   :  { %3148 = vrot.lane.b32.xlu0 %v4384_v11, %s4412_s24 }
0x54f7   :  { %v3149_v44 = vpop.permute.xlu0 %3148 }
0x54f8   :  { %v3151_v31 = vmul.f32 %v3149_v44, %v3134_v30 }
0x54fa   :  { %v3153_v38 = vpack.c.bf16 %v3151_v31, %v3151_v31  ;;  %v2938_v31 = vadd.f32 %v5382_v17, %v5337_v34 }
0x54fc   :  { %3155 = vrot.lane.b32.xlu1 %v3153_v38, %s4413_s25 }
0x556e   :  { %v3156_v55 = vpop.permute.xlu1 %3155 }
0x556f   :  { %4186 = vmatmul.mubr.msk.bf16.vlgmr.msra.gmra.mrb[88].mxu1 %vm146_vm3, %v3156_v55 }
0x5570   :  { %4198 = vmatpush3.bf16.msra.mxu1 %v5299_v37  ;;  %4201 = vmatprep.mubr.msk.bf16.mxu1 %vm4410_vm0, %v4409_v3 }
0x5571   :  { %4199 = vmatprep.subr.bf16.mxu1 %v4409_v3 }
0x5574   :  { %4200 = vmatpush3.bf16.msra.mxu1 %v5310_v41 }
0x5575   :  { %4213 = vmatprep.subr.bf16.mxu1 %v4409_v3 }
0x5642   :  { %v3194_v51 = vpop.f32.mrb[88].mxu1 }
0x5643   :  { %v3200_v25 = vadd.f32 %v3194_v51, %v2925_v36  ;;  %v4187_v15 = vpop.f32.mrb[89].mxu1 }
0x5644   :  { %v3197_v45 = vpop.f32.mrb[90].mxu1 }
0x5645   :  { %4385 = vtanh.f32 %v3200_v25  ;;  %v4188_v52 = vpop.f32.mrb[91].mxu1 }
0x564f   :  { %v4386_v5 = vpop.eup %4385 }
0x5650   :  { %3206 = vrot.lane.b32.xlu0 %v4386_v5, %s4412_s24  ;;  %v3202_v47 = vmul.f32 0.5, %v4386_v5 }
0x5652   :  { %v3203_v26 = vadd.f32 0.5, %v3202_v47 }
0x5654   :  { %v3204_v58 = vmul.f32 %v3203_v26, %v3145_v6 }
0x56c2   :  { %v3207_v14 = vpop.permute.xlu0 %3206 }
0x56c3   :  { %v3209_v56 = vmul.f32 %v3207_v14, %v3203_v26 }
0x56c5   :  { %3211 = vrot.lane.b32.xlu1 %v3209_v56, %s4413_s25 }
0x5737   :  { %v3212_v59 = vpop.permute.xlu1 %3211 }
0x5738   :  { %v3214_v21 = vadd.f32 %v3212_v59, %v3204_v58 }
0x573a   :  { %4387 = vtanh.f32 %v3214_v21 }
0x5744   :  { %v4388_v10 = vpop.eup %4387 }
0x5745   :  { %3217 = vrot.lane.b32.xlu0 %v4388_v10, %s4412_s24  ;;  %v2941_v10 = vadd.f32 %v5386_v49, %v5337_v34  ;;  %v4414_v34 = vmov 0.0|0.0   ;;  %v3497_v49 = vld [vmem:[%s5473_s5] sm:$0xff] }
0x57b7   :  { %v3218_v60 = vpop.permute.xlu0 %3217 }
0x57b8   :  { %v3220_v0 = vmul.f32 %v3218_v60, %v3203_v26 }
0x57ba   :  { %v3222_v53 = vpack.c.bf16 %v3220_v0, %v3220_v0 }
0x57bc   :  { %3224 = vrot.lane.b32.xlu1 %v3222_v53, %s4413_s25 }
0x582e   :  { %v3225_v54 = vpop.permute.xlu1 %3224 }
0x582f   :  { %4194 = vmatmul.mubr.msk.bf16.vlgmr.msra.gmra.mrb[92].mxu0 %vm146_vm3, %v3225_v54 }
0x5830   :  { %4206 = vmatpush3.bf16.msra.mxu0 %v5299_v37  ;;  %4209 = vmatprep.mubr.msk.bf16.mxu0 %vm4410_vm0, %v4409_v3 }
0x5831   :  { %4207 = vmatprep.subr.bf16.mxu0 %v4409_v3 }
0x5834   :  { %4208 = vmatpush3.bf16.msra.mxu0 %v5310_v41 }
0x5835   :  { %4232 = vmatprep.subr.bf16.mxu0 %v4414_v34 }
0x5902   :  { %v3263_v63 = vpop.f32.mrb[92].mxu0 }
0x5903   :  { %v3269_v61 = vadd.f32 %v3263_v63, %v2930_v50  ;;  %v4195_v8 = vpop.f32.mrb[93].mxu0 }
0x5904   :  { %v3266_v2 = vpop.f32.mrb[94].mxu0 }
0x5905   :  { %4389 = vtanh.f32 %v3269_v61  ;;  %v4196_v18 = vpop.f32.mrb[95].mxu0 }
0x590f   :  { %v4390_v13 = vpop.eup %4389 }
0x5910   :  { %3275 = vrot.lane.b32.xlu0 %v4390_v13, %s4412_s24  ;;  %v3271_v1 = vmul.f32 0.5, %v4390_v13 }
0x5912   :  { %v3272_v4 = vadd.f32 0.5, %v3271_v1 }
0x5914   :  { %v3273_v22 = vmul.f32 %v3272_v4, %v3214_v21 }
0x5982   :  { %v3276_v12 = vpop.permute.xlu0 %3275 }
0x5983   :  { %v3278_v19 = vmul.f32 %v3276_v12, %v3272_v4  ;;  %v3498_v12 = vld [vmem:[%s5473_s5 + $0x8] sm:$0xff] }
0x5985   :  { %3280 = vrot.lane.b32.xlu1 %v3278_v19, %s4413_s25  ;;  %v3499_v19 = vld [vmem:[%s5473_s5 + $0x10] sm:$0xff] }
0x59f7   :  { %v3281_v23 = vpop.permute.xlu1 %3280 }
0x59f8   :  { %v3283_v16 = vadd.f32 %v3281_v23, %v3273_v22  ;;  %v4233_v22 = vpack.c.bf16 %v3498_v12, %v3497_v49  ;;  %v3500_v23 = vld [vmem:[%s5473_s5 + $0x18] sm:$0xff] }
0x59fa   :  { %4391 = vtanh.f32 %v3283_v16 }
0x5a04   :  { %v4392_v32 = vpop.eup %4391 }
0x5a05   :  { %3286 = vrot.lane.b32.xlu0 %v4392_v32, %s4412_s24 }
0x5a77   :  { %v3287_v24 = vpop.permute.xlu0 %3286 }
0x5a78   :  { %v3289_v9 = vmul.f32 %v3287_v24, %v3272_v4 }
0x5a7a   :  { %v3291_v33 = vpack.c.bf16 %v3289_v9, %v3289_v9 }
0x5a7c   :  { %3293 = vrot.lane.b32.xlu1 %v3291_v33, %s4413_s25 }
0x5aee   :  { %v3294_v48 = vpop.permute.xlu1 %3293 }
0x5aef   :  { %4202 = vmatmul.mubr.msk.bf16.vlgmr.msra.gmra.mrb[92].mxu1 %vm146_vm3, %v3294_v48  ;;  %v3683_v48 = vld [vmem:[%s5474_s6] ss:$0 sm:$0xff] }
0x5af0   :  { %4214 = vmatpush3.bf16.msra.mxu1 %v5299_v37  ;;  %4217 = vmatprep.mubr.msk.bf16.mxu1 %vm4410_vm0, %v4409_v3 }
0x5af1   :  { %4215 = vmatprep.subr.bf16.mxu1 %v4409_v3 }
0x5af4   :  { %4216 = vmatpush3.bf16.msra.mxu1 %v5310_v41 }
0x5bc2   :  { %v3332_v57 = vpop.f32.mrb[92].mxu1 }
0x5bc3   :  { %v3338_v7 = vadd.f32 %v3332_v57, %v2933_v62  ;;  %v4203_v46 = vpop.f32.mrb[93].mxu1 }
0x5bc4   :  { %v3335_v27 = vpop.f32.mrb[94].mxu1 }
0x5bc5   :  { %4393 = vtanh.f32 %v3338_v7  ;;  %v4204_v28 = vpop.f32.mrb[95].mxu1 }
0x5bcf   :  { %v4394_v35 = vpop.eup %4393 }
0x5bd0   :  { %3344 = vrot.lane.b32.xlu0 %v4394_v35, %s4412_s24  ;;  %v3340_v37 = vmul.f32 0.5, %v4394_v35 }
0x5bd2   :  { %v3341_v29 = vadd.f32 0.5, %v3340_v37 }
0x5bd4   :  { %v3342_v40 = vmul.f32 %v3341_v29, %v3283_v16  ;;  %v4236_v16 = vpack.c.bf16 %v3500_v23, %v3499_v19 }
0x5c42   :  { %v3345_v30 = vpop.permute.xlu0 %3344 }
0x5c43   :  { %v3347_v20 = vmul.f32 %v3345_v30, %v3341_v29 }
0x5c45   :  { %3349 = vrot.lane.b32.xlu1 %v3347_v20, %s4413_s25 }
0x5cb7   :  { %v3350_v41 = vpop.permute.xlu1 %3349 }
0x5cb8   :  { %v3352_v42 = vadd.f32 %v3350_v41, %v3342_v40 }
0x5cba   :  { %4395 = vtanh.f32 %v3352_v42 }
0x5cc4   :  { %v4396_v39 = vpop.eup %4395 }
0x5cc5   :  { %3355 = vrot.lane.b32.xlu0 %v4396_v39, %s4412_s24 }
0x5d37   :  { %v3356_v43 = vpop.permute.xlu0 %3355 }
0x5d38   :  { %v3358_v6 = vmul.f32 %v3356_v43, %v3341_v29 }
0x5d3a   :  { %v3360_v11 = vpack.c.bf16 %v3358_v6, %v3358_v6 }
0x5d3c   :  { %3362 = vrot.lane.b32.xlu1 %v3360_v11, %s4413_s25 }
0x5dae   :  { %v3363_v44 = vpop.permute.xlu1 %3362 }
0x5daf   :  { %4210 = vmatmul.mubr.msk.bf16.vlgmr.msra.gmra.mrb[96].mxu0 %vm146_vm3, %v3363_v44 }
0x5db0   :  { %4229 = vmatprep.mubr.msk.f32.mxu0 %vm4410_vm0, %v4409_v3  ;;  %4234 = vmatpush3.bf16.msra.mxu0 %v4233_v22 }
0x5db1   :  { %4235 = vmatprep.subr.bf16.mxu0 %v4414_v34 }
0x5db4   :  { %4237 = vmatpush3.bf16.msra.mxu0 %v4236_v16 }
0x5e82   :  { %v3401_v38 = vpop.f32.mrb[96].mxu0 }
0x5e83   :  { %v3407_v55 = vadd.f32 %v3401_v38, %v2938_v31  ;;  %v4211_v36 = vpop.f32.mrb[97].mxu0 }
0x5e84   :  { %v3404_v51 = vpop.f32.mrb[98].mxu0 }
0x5e85   :  { %4397 = vtanh.f32 %v3407_v55  ;;  %v4212_v25 = vpop.f32.mrb[99].mxu0 }
0x5e8f   :  { %v4398_v15 = vpop.eup %4397 }
0x5e90   :  { %3413 = vrot.lane.b32.xlu0 %v4398_v15, %s4412_s24  ;;  %v3409_v45 = vmul.f32 0.5, %v4398_v15 }
0x5e92   :  { %v3410_v52 = vadd.f32 0.5, %v3409_v45 }
0x5e94   :  { %v3411_v26 = vmul.f32 %v3410_v52, %v3352_v42 }
0x5f02   :  { %v3414_v5 = vpop.permute.xlu0 %3413 }
0x5f03   :  { %v3416_v47 = vmul.f32 %v3414_v5, %v3410_v52 }
0x5f05   :  { %3418 = vrot.lane.b32.xlu1 %v3416_v47, %s4413_s25 }
0x5f77   :  { %v3419_v3 = vpop.permute.xlu1 %3418 }
0x5f78   :  { %v3421_v14 = vadd.f32 %v3419_v3, %v3411_v26 }
0x5f7a   :  { %4399 = vtanh.f32 %v3421_v14 }
0x5f84   :  { %v4400_v17 = vpop.eup %4399 }
0x5f85   :  { %3424 = vrot.lane.b32.xlu0 %v4400_v17, %s4412_s24 }
0x5ff7   :  { %v3425_v56 = vpop.permute.xlu0 %3424 }
0x5ff8   :  { %v3427_v58 = vmul.f32 %v3425_v56, %v3410_v52 }
0x5ffa   :  { %v3429_v59 = vpack.c.bf16 %v3427_v58, %v3427_v58 }
0x5ffc   :  { %3431 = vrot.lane.b32.xlu1 %v3429_v59, %s4413_s25 }
0x606e   :  { %v3432_v21 = vpop.permute.xlu1 %3431 }
0x606f   :  { %4218 = vmatmul.mubr.msk.bf16.vlgmr.msra.gmra.mrb[96].mxu1 %vm146_vm3, %v3432_v21 }
0x6142   :  { %v3470_v60 = vpop.f32.mrb[96].mxu1 }
0x6143   :  { %v3476_v0 = vadd.f32 %v3470_v60, %v2941_v10  ;;  %v4219_v53 = vpop.f32.mrb[97].mxu1 }
0x6144   :  { %v3473_v54 = vpop.f32.mrb[98].mxu1 }
0x6145   :  { %4401 = vtanh.f32 %v3476_v0  ;;  %v4220_v50 = vpop.f32.mrb[99].mxu1 }
0x614f   :  { %v4402_v63 = vpop.eup %4401 }
0x6150   :  { %3482 = vrot.lane.b32.xlu0 %v4402_v63, %s4412_s24  ;;  %v3478_v61 = vmul.f32 0.5, %v4402_v63 }
0x6152   :  { %v3479_v8 = vadd.f32 0.5, %v3478_v61 }
0x6154   :  { %v3480_v13 = vmul.f32 %v3479_v8, %v3421_v14 }
0x61c2   :  { %v3483_v2 = vpop.permute.xlu0 %3482 }
0x61c3   :  { %v3485_v18 = vmul.f32 %v3483_v2, %v3479_v8 }
0x61c5   :  { %3487 = vrot.lane.b32.xlu1 %v3485_v18, %s4413_s25 }
0x6237   :  { %v3488_v1 = vpop.permute.xlu1 %3487 }
0x6238   :  { %v3490_v4 = vadd.f32 %v3488_v1, %v3480_v13 }
0x623a   :  { %4403 = vtanh.f32 %v3490_v4 }
0x6244   :  { %v4404_v32 = vpop.eup %4403 }
0x6245   :  { %3493 = vrot.lane.b32.xlu0 %v4404_v32, %s4412_s24 }
0x62b7   :  { %v3494_v24 = vpop.permute.xlu0 %3493 }
0x62b8   :  { %v3496_v9 = vmul.f32 %v3494_v24, %v3479_v8 }
0x62ba   :  { %3509 = vrot.lane.b32.xlu1 %v3496_v9, %s4413_s25 }
0x632c   :  { %v3510_v33 = vpop.permute.xlu1 %3509 }
0x632d   :  { %4230 = vmatmul.mubr.msk.f32.vlgmr.msra.gmra.mrb[100].mxu0 %vm146_vm3, %v3510_v33 }
0x6400   :  { %v3579_v62 = vpop.f32.mrb[100].mxu0 }
0x6401   :  { %v3580_v57 = vadd.f32 %v3683_v48, %v3579_v62  ;;  %v4231_v7 = vpop.f32.mrb[101].mxu0 }
0x6403   :  { %v3685_v46 = vmul.f32 -1.442695, %v3580_v57 }
0x6405   :  { %4405 = vpow2.f32 %v3685_v46 }
0x640f   :  { %v4406_v27 = vpop.eup %4405 }
0x6410   :  { %v3586_v28 = vadd.f32 1.0, %v4406_v27 }
0x6412   :  { %4407 = vrcp.f32 %v3586_v28 }
0x641c   :  { %v4408_v35 = vpop.eup %4407 }
0x641d   :  { %3590 = vst.msk [vmem:[%s5475_s7] sm:$0xff] %vm3589_vm4, %v4408_v35 }

</bundles_post_ra>
